<compile_context>
chip_gen: v7x
topology: tpu7x:2x2x1
jax: 0.10.0
libtpu: 0.0.40
codegen_flags: <defaults>
</compile_context>

<pallas_src>
import functools

import jax
import jax.numpy as jnp
import numpy as np
from jax import lax
from jax.experimental import pallas as pl
from jax.experimental.pallas import tpu as pltpu


def _conv_out(n, k, s):
    return (n - k) // s + 1


def _round_up(x, m):
    return ((x + m - 1) // m) * m


# ------------------------------------------------------------------
# Fused Pallas kernel: conv1 -> conv2 -> conv3 -> enc fc -> fc1 -> fc2 -> fc3
# ------------------------------------------------------------------
def _qnet_fused_kernel(
        patch_ref, a_ref,
        w1_ref, b1_ref, w2_ref, b2_ref, w3_ref, b3_ref,
        wenc_ref, benc_ref, wf1x_ref, wf1a_ref, bf1_ref,
        wf2_ref, bf2_ref, wf3_ref, bf3_ref,
        o_ref,
        x1_scr, h2_scr,
        *, wo1, k2, s2, ho2, wo2):
    f32, bf16 = jnp.float32, jnp.bfloat16
    n_pos1, tb, k1 = patch_ref.shape
    c1 = w1_ref.shape[1]                     # 32 conv1 channels
    c2 = w2_ref.shape[1]                     # 64 conv2 channels

    # ---- conv1 + ReLU: ONE (n_pos1*tb, k1) x (k1, 32) matmul ---------------
    # Patch rows are position-major (row = pos*tb + b): the collapse below is
    # layout-free (tb % 8 == 0) and each per-position output block is a
    # contiguous, aligned sublane slab for the scatter that follows.  The /255
    # is folded into w1; patches carry raw 0..255 values exactly in bf16.
    p2d = patch_ref[...].reshape(n_pos1 * tb, k1)
    x1 = jnp.dot(p2d, w1_ref[...], preferred_element_type=f32) + b1_ref[...]
    x1 = jnp.maximum(x1, 0.0).astype(bf16)                  # (n_pos1*tb, 32)

    # ---- stage conv1 activations lane-dense: x1_scr[b, pos*32 + c] ---------
    for pos in range(n_pos1):
        x1_scr[:, pos * c1:(pos + 1) * c1] = x1[pos * tb:(pos + 1) * tb, :]

    # ---- conv2 + ReLU: ho2*wo2 (=9) matmuls with K = k2*k2*c1 = 512 --------
    # For each output position the 16 taps are 4 contiguous 128-lane windows
    # of the conv1 scratch (one per kernel row), concatenated along K in
    # (kh, kw, ci) order to match w2 = cw2.reshape(512, 64).
    w2 = w2_ref[...]
    b2 = b2_ref[...]
    row_lanes = wo1 * c1                                     # 256 lanes / row
    win = k2 * c1                                            # 128-lane window
    for oh in range(ho2):
        for ow in range(wo2):
            taps = []
            for kh in range(k2):
                start = (s2 * oh + kh) * row_lanes + s2 * ow * c1
                taps.append(x1_scr[:, start:start + win])    # (tb, 128)
            inp = jnp.concatenate(taps, axis=-1)             # (tb, 512)
            y = jnp.dot(inp, w2, preferred_element_type=f32) + b2
            p = oh * wo2 + ow
            h2_scr[:, p * c2:(p + 1) * c2] = jnp.maximum(y, 0.0).astype(bf16)

    # ---- conv3 + ReLU: ONE (tb, 576) x (576, 64) matmul --------------------
    # conv3's 3x3 kernel covers the whole conv2 map (output is 1x1), so the
    # lane-dense (tb, 9*64) scratch is exactly its flattened input.
    h3 = jnp.maximum(
        jnp.dot(h2_scr[...], w3_ref[...], preferred_element_type=f32)
        + b3_ref[...], 0.0).astype(bf16)                     # (tb, 64)

    # ---- encoder fc + ReLU  (conv3 output is 1x1 -> flatten == h3) ---------
    feat = jnp.maximum(
        jnp.dot(h3, wenc_ref[...], preferred_element_type=f32) + benc_ref[...],
        0.0).astype(bf16)                                    # (tb, 256)

    # ---- fc1 over concat([feat, action]); action / wf1a zero-padded to K=8 -
    z1 = (jnp.dot(feat, wf1x_ref[...], preferred_element_type=f32)
          + jnp.dot(a_ref[...].astype(bf16), wf1a_ref[...],
                    preferred_element_type=f32)
          + bf1_ref[...])
    q1 = jnp.maximum(z1, 0.0).astype(bf16)                   # (tb, 256)

    # ---- fc2 + ReLU ---------------------------------------------------------
    q2 = jnp.maximum(
        jnp.dot(q1, wf2_ref[...], preferred_element_type=f32) + bf2_ref[...],
        0.0).astype(bf16)                                    # (tb, 64)

    # ---- fc3: (1,64) x (tb,64) contract-last -> lane-dense (1, tb) Q row ----
    q_row = lax.dot_general(
        wf3_ref[...], q2, (((1,), (1,)), ((), ())),
        preferred_element_type=f32) + bf3_ref[...]           # (1, tb)
    o_ref[...] = q_row.reshape(1, 1, tb).astype(o_ref.dtype)


# ------------------------------------------------------------------
# Glue: conv1 patch extraction on uint8 (position-major layout)
# ------------------------------------------------------------------
def _conv1_patches_posmajor(obs_u8, k, s):
    """(B,H,W,C) uint8 -> ((Ho*Wo, B, k*k*C) bf16, (Ho, Wo)).

    Patch features are ordered (kh, kw, C) to match the HWIO weight flattening.
    Position-major so the in-kernel collapse to (Ho*Wo*tb, kkC) is free and the
    conv1 -> lane-dense scratch scatter is contiguous.  Values 0..255 are exact
    in bf16 and the /255 is folded into the conv1 weights.
    """
    B, H, W, C = obs_u8.shape
    Ho = _conv_out(H, k, s)
    Wo = _conv_out(W, k, s)
    rows = []
    for i in range(k):
        cols = []
        for j in range(k):
            cols.append(obs_u8[:, i:i + s * Ho:s, j:j + s * Wo:s, :])  # (B,Ho,Wo,C)
        rows.append(jnp.stack(cols, axis=3))                           # (B,Ho,Wo,k,C)
    p = jnp.stack(rows, axis=3)                                        # (B,Ho,Wo,k,k,C)
    p = p.reshape(B, Ho * Wo, k * k * C)
    p = jnp.transpose(p, (1, 0, 2)).astype(jnp.bfloat16)               # (Ho*Wo,B,kkC)
    return p, (Ho, Wo)


# ------------------------------------------------------------------
# Parameters (deterministic synthetic init, Kaiming-ish) + kernel packing
# ------------------------------------------------------------------
def init_params(key, in_channels, H, W, action_dim):
    ks = jax.random.split(key, 14)

    def dense(kw, kb, fi, fo):
        bound = 1.0 / np.sqrt(fi)
        w = jax.random.uniform(kw, (fi, fo), jnp.float32, -bound, bound)
        b = jax.random.uniform(kb, (1, fo), jnp.float32, -bound, bound)
        return w, b

    def conv(kw, kb, k, ci, co):
        fi = k * k * ci
        bound = 1.0 / np.sqrt(fi)
        w = jax.random.uniform(kw, (k, k, ci, co), jnp.float32, -bound, bound)
        b = jax.random.uniform(kb, (co,), jnp.float32, -bound, bound)
        return w, b

    h1, w1 = _conv_out(H, 8, 4), _conv_out(W, 8, 4)
    h2, w2 = _conv_out(h1, 4, 2), _conv_out(w1, 4, 2)
    h3, w3 = _conv_out(h2, 3, 1), _conv_out(w2, 3, 1)
    n_flatten = h3 * w3 * 64

    p = {}
    p["cw1"], p["cb1"] = conv(ks[0], ks[1], 8, in_channels, 32)
    p["cw2"], p["cb2"] = conv(ks[2], ks[3], 4, 32, 64)
    p["cw3"], p["cb3"] = conv(ks[4], ks[5], 3, 64, 64)
    p["wenc"], p["benc"] = dense(ks[6], ks[7], n_flatten, 256)          # encoder fc
    p["wfc1"], p["bfc1"] = dense(ks[8], ks[9], 256 + action_dim, 256)   # fc1 (feat||a)
    p["wfc2"], p["bfc2"] = dense(ks[10], ks[11], 256, 64)               # fc2
    p["wfc3"], p["bfc3"] = dense(ks[12], ks[13], 64, 1)                 # fc3 -> Q
    return p


def pack_params(p):
    """Flatten / pre-scale / bf16-cast parameters into kernel operands."""
    bf = jnp.bfloat16
    f = {}
    co1 = p["cw1"].shape[3]
    f["w1"] = (p["cw1"].reshape(-1, co1) * (1.0 / 255.0)).astype(bf)    # /255 folded
    f["b1"] = p["cb1"].reshape(1, -1)
    co2 = p["cw2"].shape[3]
    f["w2"] = p["cw2"].reshape(-1, co2).astype(bf)          # (k2*k2*32, 64) (kh,kw,ci)
    f["b2"] = p["cb2"].reshape(1, -1)
    co3 = p["cw3"].shape[3]
    f["w3"] = p["cw3"].reshape(-1, co3).astype(bf)          # (3*3*64, 64)  (r,c,ci)
    f["b3"] = p["cb3"].reshape(1, -1)
    f["wenc"] = p["wenc"].astype(bf)
    f["benc"] = p["benc"]
    lat = p["wenc"].shape[1]                                # 256
    act_dim = p["wfc1"].shape[0] - lat
    a_pad = _round_up(act_dim, 8)
    f["wf1x"] = p["wfc1"][:lat].astype(bf)                  # feature rows (256, 256)
    wf1a = jnp.zeros((a_pad, p["wfc1"].shape[1]), jnp.float32)
    wf1a = wf1a.at[:act_dim].set(p["wfc1"][lat:])           # action rows, zero-padded
    f["wf1a"] = wf1a.astype(bf)
    f["bf1"] = p["bfc1"]
    f["wf2"] = p["wfc2"].astype(bf)
    f["bf2"] = p["bfc2"]
    f["wf3"] = p["wfc3"].T.astype(bf)                       # (1, 64)
    f["bf3"] = p["bfc3"]                                    # (1, 1)
    return f


# ------------------------------------------------------------------
# QNetwork forward (Pallas path)
# ------------------------------------------------------------------
def qnetwork_forward(obs_u8, a, f):
    B, H, W, C = obs_u8.shape
    A = a.shape[1]
    A_pad = f["wf1a"].shape[0]
    K1 = f["w1"].shape[0]                      # 8*8*C
    c1 = f["w1"].shape[1]                      # 32
    c2 = f["w2"].shape[1]                      # 64

    ho1, wo1 = _conv_out(H, 8, 4), _conv_out(W, 8, 4)
    ho2, wo2 = _conv_out(ho1, 4, 2), _conv_out(wo1, 4, 2)
    ho3, wo3 = _conv_out(ho2, 3, 1), _conv_out(wo2, 3, 1)
    # torch flattens NCHW; identical to NHWC only because conv3 output is 1x1.
    assert (ho3, wo3) == (1, 1), "flatten order differs unless conv3 output is 1x1"
    assert f["wenc"].shape[0] == ho3 * wo3 * f["w3"].shape[1]
    n_pos1 = ho1 * wo1

    # Batch tiling: tb is always a multiple of 8 (so the (8,128) BlockSpec rule
    # holds for any B), capped at 128 rows/tile; batches >= 32 get >= 2 tiles so
    # v7x's two TensorCores both get work and patch DMA overlaps compute.
    n_tiles = -(-B // 128)
    if n_tiles == 1 and B >= 32:
        n_tiles = 2
    tb = _round_up(-(-B // n_tiles), 8)
    B_pad = n_tiles * tb

    patches, _ = _conv1_patches_posmajor(obs_u8, k=8, s=4)   # (n_pos1, B, K1) bf16
    if B_pad != B:
        patches = jnp.pad(patches, ((0, 0), (0, B_pad - B), (0, 0)))
    a_padded = jnp.pad(a.astype(jnp.float32), ((0, B_pad - B), (0, A_pad - A)))

    kernel = functools.partial(
        _qnet_fused_kernel, wo1=wo1, k2=4, s2=2, ho2=ho2, wo2=wo2)

    resident = lambda i: (0, 0)                              # weights stay VMEM-resident

    weights = [f["w1"], f["b1"], f["w2"], f["b2"], f["w3"], f["b3"],
               f["wenc"], f["benc"], f["wf1x"], f["wf1a"], f["bf1"],
               f["wf2"], f["bf2"], f["wf3"], f["bf3"]]
    weight_bytes = sum(int(w.size) * w.dtype.itemsize for w in weights)
    flops_per_row = 2 * (n_pos1 * K1 * c1
                         + ho2 * wo2 * int(np.prod(f["w2"].shape))
                         + sum(int(np.prod(f[k].shape))
                               for k in ("w3", "wenc", "wf1x", "wf1a", "wf2", "wf3")))
    cost = pl.CostEstimate(
        flops=int(B_pad * flops_per_row),
        transcendentals=0,
        bytes_accessed=int(patches.size) * 2 + int(a_padded.size) * 4
                       + weight_bytes + B_pad * 4)

    out = pl.pallas_call(
        kernel,
        out_shape=jax.ShapeDtypeStruct((n_tiles, 1, tb), jnp.float32),
        grid_spec=pltpu.PrefetchScalarGridSpec(
            num_scalar_prefetch=0,
            grid=(n_tiles,),
            in_specs=[
                pl.BlockSpec((n_pos1, tb, K1), lambda i: (0, i, 0)),  # patches
                pl.BlockSpec((tb, A_pad), lambda i: (i, 0)),          # action (padded)
            ] + [pl.BlockSpec(w.shape, resident) for w in weights],
            out_specs=pl.BlockSpec((1, 1, tb), lambda i: (i, 0, 0)),  # lane-dense Q row
            scratch_shapes=[
                pltpu.VMEM((tb, n_pos1 * c1), jnp.bfloat16),          # conv1 acts
                pltpu.VMEM((tb, ho2 * wo2 * c2), jnp.bfloat16),       # conv2 acts
            ]),
        compiler_params=pltpu.CompilerParams(
            dimension_semantics=("parallel",),
            vmem_limit_bytes=48 * 1024 * 1024),
        cost_estimate=cost,
    )(patches, a_padded, *weights)

    return out.reshape(B_pad, 1)[:B]


# ------------------------------------------------------------------
# Pure-JAX reference (verification only)
# ------------------------------------------------------------------
def qnetwork_forward_ref(obs_u8, a, params):
    x = obs_u8.astype(jnp.float32) / 255.0
    dn = ("NHWC", "HWIO", "NHWC")

    def conv(x, w, b, s):
        y = lax.conv_general_dilated(x, w, (s, s), "VALID", dimension_numbers=dn)
        return jnp.maximum(y + b, 0.0)

    x = conv(x, params["cw1"], params["cb1"], 4)
    x = conv(x, params["cw2"], params["cb2"], 2)
    x = conv(x, params["cw3"], params["cb3"], 1)
    feat = x.reshape(x.shape[0], -1)                       # conv3 out is 1x1
    feat = jnp.maximum(feat @ params["wenc"] + params["benc"], 0.0)
    h = jnp.concatenate([feat, a], axis=1)
    h = jnp.maximum(h @ params["wfc1"] + params["bfc1"], 0.0)
    h = jnp.maximum(h @ params["wfc2"] + params["bfc2"], 0.0)
    return h @ params["wfc3"] + params["bfc3"]


# ------------------------------------------------------------------
if __name__ == "__main__":
    key = jax.random.PRNGKey(0)
    k_obs, k_act, k_par = jax.random.split(key, 3)

    # Small shapes consistent with the module:
    #  obs (B=2, 36, 36, 3) -> conv stack -> (B, 1, 1, 64) -> n_flatten = 64
    #  action dim = 7 (QNetwork.fc1 = Linear(latent + 7, 256))
    B, H, W, C = 2, 36, 36, 3
    ACT = 7

    obs = jax.random.randint(k_obs, (B, H, W, C), 0, 256, dtype=jnp.int32).astype(jnp.uint8)
    act = jax.random.uniform(k_act, (B, ACT), jnp.float32, -1.0, 1.0)
    params = init_params(k_par, C, H, W, ACT)
    packed = pack_params(params)

    fwd = jax.jit(qnetwork_forward)
    out = jax.block_until_ready(fwd(obs, act, packed))

    ref = jax.block_until_ready(qnetwork_forward_ref(obs, act, params))
    np.testing.assert_allclose(np.asarray(out), np.asarray(ref), rtol=2e-2, atol=2e-2)

    assert out.shape == (B, 1) and out.dtype == jnp.float32
    print("KERNEL_OK")
</pallas_src>

<mosaic_0001>
module attributes {stable_mosaic.version = 11 : i64} {
  func.func @_qnet_fused_kernel(%arg0: i32, %arg1: memref<64x8x192xbf16, #tpu.memory_space<vmem>>, %arg2: memref<8x8xf32, #tpu.memory_space<vmem>>, %arg3: memref<192x32xbf16, #tpu.memory_space<vmem>>, %arg4: memref<1x32xf32, #tpu.memory_space<vmem>>, %arg5: memref<512x64xbf16, #tpu.memory_space<vmem>>, %arg6: memref<1x64xf32, #tpu.memory_space<vmem>>, %arg7: memref<576x64xbf16, #tpu.memory_space<vmem>>, %arg8: memref<1x64xf32, #tpu.memory_space<vmem>>, %arg9: memref<64x256xbf16, #tpu.memory_space<vmem>>, %arg10: memref<1x256xf32, #tpu.memory_space<vmem>>, %arg11: memref<256x256xbf16, #tpu.memory_space<vmem>>, %arg12: memref<8x256xbf16, #tpu.memory_space<vmem>>, %arg13: memref<1x256xf32, #tpu.memory_space<vmem>>, %arg14: memref<256x64xbf16, #tpu.memory_space<vmem>>, %arg15: memref<1x64xf32, #tpu.memory_space<vmem>>, %arg16: memref<1x64xbf16, #tpu.memory_space<vmem>>, %arg17: memref<1x1xf32, #tpu.memory_space<vmem>>, %arg18: memref<1x1x8xf32, #tpu.memory_space<vmem>>, %arg19: memref<8x2048xbf16, #tpu.memory_space<vmem>>, %arg20: memref<8x576xbf16, #tpu.memory_space<vmem>>) attributes {dimension_semantics = [#tpu.dimension_semantics<parallel>], iteration_bounds = array<i64: 1>, scalar_prefetch = 0 : i64, scratch_operands = 2 : i64, tpu.core_type = #tpu.core_type<tc>, window_params = [{transform_indices = @transform_0, window_bounds = array<i64: 64, 8, 192>}, {transform_indices = @transform_1, window_bounds = array<i64: 8, 8>}, {pipeline_mode = #tpu.pipeline_mode<synchronous>, transform_indices = @transform_2, window_bounds = array<i64: 192, 32>}, {pipeline_mode = #tpu.pipeline_mode<synchronous>, transform_indices = @transform_3, window_bounds = array<i64: 1, 32>}, {pipeline_mode = #tpu.pipeline_mode<synchronous>, transform_indices = @transform_4, window_bounds = array<i64: 512, 64>}, {pipeline_mode = #tpu.pipeline_mode<synchronous>, transform_indices = @transform_5, window_bounds = array<i64: 1, 64>}, {pipeline_mode = #tpu.pipeline_mode<synchronous>, transform_indices = @transform_6, window_bounds = array<i64: 576, 64>}, {pipeline_mode = #tpu.pipeline_mode<synchronous>, transform_indices = @transform_7, window_bounds = array<i64: 1, 64>}, {pipeline_mode = #tpu.pipeline_mode<synchronous>, transform_indices = @transform_8, window_bounds = array<i64: 64, 256>}, {pipeline_mode = #tpu.pipeline_mode<synchronous>, transform_indices = @transform_9, window_bounds = array<i64: 1, 256>}, {pipeline_mode = #tpu.pipeline_mode<synchronous>, transform_indices = @transform_10, window_bounds = array<i64: 256, 256>}, {pipeline_mode = #tpu.pipeline_mode<synchronous>, transform_indices = @transform_11, window_bounds = array<i64: 8, 256>}, {pipeline_mode = #tpu.pipeline_mode<synchronous>, transform_indices = @transform_12, window_bounds = array<i64: 1, 256>}, {pipeline_mode = #tpu.pipeline_mode<synchronous>, transform_indices = @transform_13, window_bounds = array<i64: 256, 64>}, {pipeline_mode = #tpu.pipeline_mode<synchronous>, transform_indices = @transform_14, window_bounds = array<i64: 1, 64>}, {pipeline_mode = #tpu.pipeline_mode<synchronous>, transform_indices = @transform_15, window_bounds = array<i64: 1, 64>}, {pipeline_mode = #tpu.pipeline_mode<synchronous>, transform_indices = @transform_16, window_bounds = array<i64: 1, 1>}, {transform_indices = @transform_17, window_bounds = array<i64: 1, 1, 8>}]} {
    %c0 = arith.constant 0 : index
    %c0_0 = arith.constant 0 : index
    %c0_1 = arith.constant 0 : index
    %0 = vector.load %arg1[%c0, %c0_0, %c0_1] : memref<64x8x192xbf16, #tpu.memory_space<vmem>>, vector<64x8x192xbf16>
    %1 = vector.shape_cast %0 : vector<64x8x192xbf16> to vector<512x192xbf16>
    %c0_2 = arith.constant 0 : index
    %c0_3 = arith.constant 0 : index
    %2 = vector.load %arg3[%c0_2, %c0_3] : memref<192x32xbf16, #tpu.memory_space<vmem>>, vector<192x32xbf16>
    %cst = arith.constant dense<0.000000e+00> : vector<512x32xf32>
    %3 = tpu.matmul %1, %2, %cst {dimension_numbers = #tpu.dot_dimension_numbers<[1], [0], [0], [1], [0, 0, 1, 1], [], []>} : vector<512x192xbf16>, vector<192x32xbf16>, vector<512x32xf32> -> vector<512x32xf32>
    %c0_4 = arith.constant 0 : index
    %c0_5 = arith.constant 0 : index
    %4 = vector.load %arg4[%c0_4, %c0_5] : memref<1x32xf32, #tpu.memory_space<vmem>>, vector<1x32xf32>
    %5 = vector.broadcast %4 : vector<1x32xf32> to vector<512x32xf32>
    %6 = arith.addf %3, %5 : vector<512x32xf32>
    %cst_6 = arith.constant 0.000000e+00 : f32
    %7 = vector.broadcast %cst_6 : f32 to vector<512x32xf32>
    %8 = arith.maximumf %6, %7 : vector<512x32xf32>
    %9 = arith.truncf %8 : vector<512x32xf32> to vector<512x32xbf16>
    %10 = vector.extract_strided_slice %9 {offsets = [0, 0], sizes = [8, 32], strides = [1, 1]} : vector<512x32xbf16> to vector<8x32xbf16>
    %c0_7 = arith.constant 0 : index
    %c0_8 = arith.constant 0 : index
    %11 = vector.load %arg19[%c0_7, %c0_8] : memref<8x2048xbf16, #tpu.memory_space<vmem>>, vector<8x32xbf16>
    tpu.vector_store %arg19[%c0_7, %c0_8], %10 {strides = array<i32>} : memref<8x2048xbf16, #tpu.memory_space<vmem>>, vector<8x32xbf16>,
    %12 = vector.extract_strided_slice %9 {offsets = [8, 0], sizes = [8, 32], strides = [1, 1]} : vector<512x32xbf16> to vector<8x32xbf16>
    %c0_9 = arith.constant 0 : index
    %c32 = arith.constant 32 : index
    %13 = vector.load %arg19[%c0_9, %c32] : memref<8x2048xbf16, #tpu.memory_space<vmem>>, vector<8x32xbf16>
    tpu.vector_store %arg19[%c0_9, %c32], %12 {strides = array<i32>} : memref<8x2048xbf16, #tpu.memory_space<vmem>>, vector<8x32xbf16>,
    %14 = vector.extract_strided_slice %9 {offsets = [16, 0], sizes = [8, 32], strides = [1, 1]} : vector<512x32xbf16> to vector<8x32xbf16>
    %c0_10 = arith.constant 0 : index
    %c64 = arith.constant 64 : index
    %15 = vector.load %arg19[%c0_10, %c64] : memref<8x2048xbf16, #tpu.memory_space<vmem>>, vector<8x32xbf16>
    tpu.vector_store %arg19[%c0_10, %c64], %14 {strides = array<i32>} : memref<8x2048xbf16, #tpu.memory_space<vmem>>, vector<8x32xbf16>,
    %16 = vector.extract_strided_slice %9 {offsets = [24, 0], sizes = [8, 32], strides = [1, 1]} : vector<512x32xbf16> to vector<8x32xbf16>
    %c0_11 = arith.constant 0 : index
    %c96 = arith.constant 96 : index
    %17 = vector.load %arg19[%c0_11, %c96] : memref<8x2048xbf16, #tpu.memory_space<vmem>>, vector<8x32xbf16>
    tpu.vector_store %arg19[%c0_11, %c96], %16 {strides = array<i32>} : memref<8x2048xbf16, #tpu.memory_space<vmem>>, vector<8x32xbf16>,
    %18 = vector.extract_strided_slice %9 {offsets = [32, 0], sizes = [8, 32], strides = [1, 1]} : vector<512x32xbf16> to vector<8x32xbf16>
    %c0_12 = arith.constant 0 : index
    %c128 = arith.constant 128 : index
    %19 = vector.load %arg19[%c0_12, %c128] : memref<8x2048xbf16, #tpu.memory_space<vmem>>, vector<8x32xbf16>
    tpu.vector_store %arg19[%c0_12, %c128], %18 {strides = array<i32>} : memref<8x2048xbf16, #tpu.memory_space<vmem>>, vector<8x32xbf16>,
    %20 = vector.extract_strided_slice %9 {offsets = [40, 0], sizes = [8, 32], strides = [1, 1]} : vector<512x32xbf16> to vector<8x32xbf16>
    %c0_13 = arith.constant 0 : index
    %c160 = arith.constant 160 : index
    %21 = vector.load %arg19[%c0_13, %c160] : memref<8x2048xbf16, #tpu.memory_space<vmem>>, vector<8x32xbf16>
    tpu.vector_store %arg19[%c0_13, %c160], %20 {strides = array<i32>} : memref<8x2048xbf16, #tpu.memory_space<vmem>>, vector<8x32xbf16>,
    %22 = vector.extract_strided_slice %9 {offsets = [48, 0], sizes = [8, 32], strides = [1, 1]} : vector<512x32xbf16> to vector<8x32xbf16>
    %c0_14 = arith.constant 0 : index
    %c192 = arith.constant 192 : index
    %23 = vector.load %arg19[%c0_14, %c192] : memref<8x2048xbf16, #tpu.memory_space<vmem>>, vector<8x32xbf16>
    tpu.vector_store %arg19[%c0_14, %c192], %22 {strides = array<i32>} : memref<8x2048xbf16, #tpu.memory_space<vmem>>, vector<8x32xbf16>,
    %24 = vector.extract_strided_slice %9 {offsets = [56, 0], sizes = [8, 32], strides = [1, 1]} : vector<512x32xbf16> to vector<8x32xbf16>
    %c0_15 = arith.constant 0 : index
    %c224 = arith.constant 224 : index
    %25 = vector.load %arg19[%c0_15, %c224] : memref<8x2048xbf16, #tpu.memory_space<vmem>>, vector<8x32xbf16>
    tpu.vector_store %arg19[%c0_15, %c224], %24 {strides = array<i32>} : memref<8x2048xbf16, #tpu.memory_space<vmem>>, vector<8x32xbf16>,
    %26 = vector.extract_strided_slice %9 {offsets = [64, 0], sizes = [8, 32], strides = [1, 1]} : vector<512x32xbf16> to vector<8x32xbf16>
    %c0_16 = arith.constant 0 : index
    %c256 = arith.constant 256 : index
    %27 = vector.load %arg19[%c0_16, %c256] : memref<8x2048xbf16, #tpu.memory_space<vmem>>, vector<8x32xbf16>
    tpu.vector_store %arg19[%c0_16, %c256], %26 {strides = array<i32>} : memref<8x2048xbf16, #tpu.memory_space<vmem>>, vector<8x32xbf16>,
    %28 = vector.extract_strided_slice %9 {offsets = [72, 0], sizes = [8, 32], strides = [1, 1]} : vector<512x32xbf16> to vector<8x32xbf16>
    %c0_17 = arith.constant 0 : index
    %c288 = arith.constant 288 : index
    %29 = vector.load %arg19[%c0_17, %c288] : memref<8x2048xbf16, #tpu.memory_space<vmem>>, vector<8x32xbf16>
    tpu.vector_store %arg19[%c0_17, %c288], %28 {strides = array<i32>} : memref<8x2048xbf16, #tpu.memory_space<vmem>>, vector<8x32xbf16>,
    %30 = vector.extract_strided_slice %9 {offsets = [80, 0], sizes = [8, 32], strides = [1, 1]} : vector<512x32xbf16> to vector<8x32xbf16>
    %c0_18 = arith.constant 0 : index
    %c320 = arith.constant 320 : index
    %31 = vector.load %arg19[%c0_18, %c320] : memref<8x2048xbf16, #tpu.memory_space<vmem>>, vector<8x32xbf16>
    tpu.vector_store %arg19[%c0_18, %c320], %30 {strides = array<i32>} : memref<8x2048xbf16, #tpu.memory_space<vmem>>, vector<8x32xbf16>,
    %32 = vector.extract_strided_slice %9 {offsets = [88, 0], sizes = [8, 32], strides = [1, 1]} : vector<512x32xbf16> to vector<8x32xbf16>
    %c0_19 = arith.constant 0 : index
    %c352 = arith.constant 352 : index
    %33 = vector.load %arg19[%c0_19, %c352] : memref<8x2048xbf16, #tpu.memory_space<vmem>>, vector<8x32xbf16>
    tpu.vector_store %arg19[%c0_19, %c352], %32 {strides = array<i32>} : memref<8x2048xbf16, #tpu.memory_space<vmem>>, vector<8x32xbf16>,
    %34 = vector.extract_strided_slice %9 {offsets = [96, 0], sizes = [8, 32], strides = [1, 1]} : vector<512x32xbf16> to vector<8x32xbf16>
    %c0_20 = arith.constant 0 : index
    %c384 = arith.constant 384 : index
    %35 = vector.load %arg19[%c0_20, %c384] : memref<8x2048xbf16, #tpu.memory_space<vmem>>, vector<8x32xbf16>
    tpu.vector_store %arg19[%c0_20, %c384], %34 {strides = array<i32>} : memref<8x2048xbf16, #tpu.memory_space<vmem>>, vector<8x32xbf16>,
    %36 = vector.extract_strided_slice %9 {offsets = [104, 0], sizes = [8, 32], strides = [1, 1]} : vector<512x32xbf16> to vector<8x32xbf16>
    %c0_21 = arith.constant 0 : index
    %c416 = arith.constant 416 : index
    %37 = vector.load %arg19[%c0_21, %c416] : memref<8x2048xbf16, #tpu.memory_space<vmem>>, vector<8x32xbf16>
    tpu.vector_store %arg19[%c0_21, %c416], %36 {strides = array<i32>} : memref<8x2048xbf16, #tpu.memory_space<vmem>>, vector<8x32xbf16>,
    %38 = vector.extract_strided_slice %9 {offsets = [112, 0], sizes = [8, 32], strides = [1, 1]} : vector<512x32xbf16> to vector<8x32xbf16>
    %c0_22 = arith.constant 0 : index
    %c448 = arith.constant 448 : index
    %39 = vector.load %arg19[%c0_22, %c448] : memref<8x2048xbf16, #tpu.memory_space<vmem>>, vector<8x32xbf16>
    tpu.vector_store %arg19[%c0_22, %c448], %38 {strides = array<i32>} : memref<8x2048xbf16, #tpu.memory_space<vmem>>, vector<8x32xbf16>,
    %40 = vector.extract_strided_slice %9 {offsets = [120, 0], sizes = [8, 32], strides = [1, 1]} : vector<512x32xbf16> to vector<8x32xbf16>
    %c0_23 = arith.constant 0 : index
    %c480 = arith.constant 480 : index
    %41 = vector.load %arg19[%c0_23, %c480] : memref<8x2048xbf16, #tpu.memory_space<vmem>>, vector<8x32xbf16>
    tpu.vector_store %arg19[%c0_23, %c480], %40 {strides = array<i32>} : memref<8x2048xbf16, #tpu.memory_space<vmem>>, vector<8x32xbf16>,
    %42 = vector.extract_strided_slice %9 {offsets = [128, 0], sizes = [8, 32], strides = [1, 1]} : vector<512x32xbf16> to vector<8x32xbf16>
    %c0_24 = arith.constant 0 : index
    %c512 = arith.constant 512 : index
    %43 = vector.load %arg19[%c0_24, %c512] : memref<8x2048xbf16, #tpu.memory_space<vmem>>, vector<8x32xbf16>
    tpu.vector_store %arg19[%c0_24, %c512], %42 {strides = array<i32>} : memref<8x2048xbf16, #tpu.memory_space<vmem>>, vector<8x32xbf16>,
    %44 = vector.extract_strided_slice %9 {offsets = [136, 0], sizes = [8, 32], strides = [1, 1]} : vector<512x32xbf16> to vector<8x32xbf16>
    %c0_25 = arith.constant 0 : index
    %c544 = arith.constant 544 : index
    %45 = vector.load %arg19[%c0_25, %c544] : memref<8x2048xbf16, #tpu.memory_space<vmem>>, vector<8x32xbf16>
    tpu.vector_store %arg19[%c0_25, %c544], %44 {strides = array<i32>} : memref<8x2048xbf16, #tpu.memory_space<vmem>>, vector<8x32xbf16>,
    %46 = vector.extract_strided_slice %9 {offsets = [144, 0], sizes = [8, 32], strides = [1, 1]} : vector<512x32xbf16> to vector<8x32xbf16>
    %c0_26 = arith.constant 0 : index
    %c576 = arith.constant 576 : index
    %47 = vector.load %arg19[%c0_26, %c576] : memref<8x2048xbf16, #tpu.memory_space<vmem>>, vector<8x32xbf16>
    tpu.vector_store %arg19[%c0_26, %c576], %46 {strides = array<i32>} : memref<8x2048xbf16, #tpu.memory_space<vmem>>, vector<8x32xbf16>,
    %48 = vector.extract_strided_slice %9 {offsets = [152, 0], sizes = [8, 32], strides = [1, 1]} : vector<512x32xbf16> to vector<8x32xbf16>
    %c0_27 = arith.constant 0 : index
    %c608 = arith.constant 608 : index
    %49 = vector.load %arg19[%c0_27, %c608] : memref<8x2048xbf16, #tpu.memory_space<vmem>>, vector<8x32xbf16>
    tpu.vector_store %arg19[%c0_27, %c608], %48 {strides = array<i32>} : memref<8x2048xbf16, #tpu.memory_space<vmem>>, vector<8x32xbf16>,
    %50 = vector.extract_strided_slice %9 {offsets = [160, 0], sizes = [8, 32], strides = [1, 1]} : vector<512x32xbf16> to vector<8x32xbf16>
    %c0_28 = arith.constant 0 : index
    %c640 = arith.constant 640 : index
    %51 = vector.load %arg19[%c0_28, %c640] : memref<8x2048xbf16, #tpu.memory_space<vmem>>, vector<8x32xbf16>
    tpu.vector_store %arg19[%c0_28, %c640], %50 {strides = array<i32>} : memref<8x2048xbf16, #tpu.memory_space<vmem>>, vector<8x32xbf16>,
    %52 = vector.extract_strided_slice %9 {offsets = [168, 0], sizes = [8, 32], strides = [1, 1]} : vector<512x32xbf16> to vector<8x32xbf16>
    %c0_29 = arith.constant 0 : index
    %c672 = arith.constant 672 : index
    %53 = vector.load %arg19[%c0_29, %c672] : memref<8x2048xbf16, #tpu.memory_space<vmem>>, vector<8x32xbf16>
    tpu.vector_store %arg19[%c0_29, %c672], %52 {strides = array<i32>} : memref<8x2048xbf16, #tpu.memory_space<vmem>>, vector<8x32xbf16>,
    %54 = vector.extract_strided_slice %9 {offsets = [176, 0], sizes = [8, 32], strides = [1, 1]} : vector<512x32xbf16> to vector<8x32xbf16>
    %c0_30 = arith.constant 0 : index
    %c704 = arith.constant 704 : index
    %55 = vector.load %arg19[%c0_30, %c704] : memref<8x2048xbf16, #tpu.memory_space<vmem>>, vector<8x32xbf16>
    tpu.vector_store %arg19[%c0_30, %c704], %54 {strides = array<i32>} : memref<8x2048xbf16, #tpu.memory_space<vmem>>, vector<8x32xbf16>,
    %56 = vector.extract_strided_slice %9 {offsets = [184, 0], sizes = [8, 32], strides = [1, 1]} : vector<512x32xbf16> to vector<8x32xbf16>
    %c0_31 = arith.constant 0 : index
    %c736 = arith.constant 736 : index
    %57 = vector.load %arg19[%c0_31, %c736] : memref<8x2048xbf16, #tpu.memory_space<vmem>>, vector<8x32xbf16>
    tpu.vector_store %arg19[%c0_31, %c736], %56 {strides = array<i32>} : memref<8x2048xbf16, #tpu.memory_space<vmem>>, vector<8x32xbf16>,
    %58 = vector.extract_strided_slice %9 {offsets = [192, 0], sizes = [8, 32], strides = [1, 1]} : vector<512x32xbf16> to vector<8x32xbf16>
    %c0_32 = arith.constant 0 : index
    %c768 = arith.constant 768 : index
    %59 = vector.load %arg19[%c0_32, %c768] : memref<8x2048xbf16, #tpu.memory_space<vmem>>, vector<8x32xbf16>
    tpu.vector_store %arg19[%c0_32, %c768], %58 {strides = array<i32>} : memref<8x2048xbf16, #tpu.memory_space<vmem>>, vector<8x32xbf16>,
    %60 = vector.extract_strided_slice %9 {offsets = [200, 0], sizes = [8, 32], strides = [1, 1]} : vector<512x32xbf16> to vector<8x32xbf16>
    %c0_33 = arith.constant 0 : index
    %c800 = arith.constant 800 : index
    %61 = vector.load %arg19[%c0_33, %c800] : memref<8x2048xbf16, #tpu.memory_space<vmem>>, vector<8x32xbf16>
    tpu.vector_store %arg19[%c0_33, %c800], %60 {strides = array<i32>} : memref<8x2048xbf16, #tpu.memory_space<vmem>>, vector<8x32xbf16>,
    %62 = vector.extract_strided_slice %9 {offsets = [208, 0], sizes = [8, 32], strides = [1, 1]} : vector<512x32xbf16> to vector<8x32xbf16>
    %c0_34 = arith.constant 0 : index
    %c832 = arith.constant 832 : index
    %63 = vector.load %arg19[%c0_34, %c832] : memref<8x2048xbf16, #tpu.memory_space<vmem>>, vector<8x32xbf16>
    tpu.vector_store %arg19[%c0_34, %c832], %62 {strides = array<i32>} : memref<8x2048xbf16, #tpu.memory_space<vmem>>, vector<8x32xbf16>,
    %64 = vector.extract_strided_slice %9 {offsets = [216, 0], sizes = [8, 32], strides = [1, 1]} : vector<512x32xbf16> to vector<8x32xbf16>
    %c0_35 = arith.constant 0 : index
    %c864 = arith.constant 864 : index
    %65 = vector.load %arg19[%c0_35, %c864] : memref<8x2048xbf16, #tpu.memory_space<vmem>>, vector<8x32xbf16>
    tpu.vector_store %arg19[%c0_35, %c864], %64 {strides = array<i32>} : memref<8x2048xbf16, #tpu.memory_space<vmem>>, vector<8x32xbf16>,
    %66 = vector.extract_strided_slice %9 {offsets = [224, 0], sizes = [8, 32], strides = [1, 1]} : vector<512x32xbf16> to vector<8x32xbf16>
    %c0_36 = arith.constant 0 : index
    %c896 = arith.constant 896 : index
    %67 = vector.load %arg19[%c0_36, %c896] : memref<8x2048xbf16, #tpu.memory_space<vmem>>, vector<8x32xbf16>
    tpu.vector_store %arg19[%c0_36, %c896], %66 {strides = array<i32>} : memref<8x2048xbf16, #tpu.memory_space<vmem>>, vector<8x32xbf16>,
    %68 = vector.extract_strided_slice %9 {offsets = [232, 0], sizes = [8, 32], strides = [1, 1]} : vector<512x32xbf16> to vector<8x32xbf16>
    %c0_37 = arith.constant 0 : index
    %c928 = arith.constant 928 : index
    %69 = vector.load %arg19[%c0_37, %c928] : memref<8x2048xbf16, #tpu.memory_space<vmem>>, vector<8x32xbf16>
    tpu.vector_store %arg19[%c0_37, %c928], %68 {strides = array<i32>} : memref<8x2048xbf16, #tpu.memory_space<vmem>>, vector<8x32xbf16>,
    %70 = vector.extract_strided_slice %9 {offsets = [240, 0], sizes = [8, 32], strides = [1, 1]} : vector<512x32xbf16> to vector<8x32xbf16>
    %c0_38 = arith.constant 0 : index
    %c960 = arith.constant 960 : index
    %71 = vector.load %arg19[%c0_38, %c960] : memref<8x2048xbf16, #tpu.memory_space<vmem>>, vector<8x32xbf16>
    tpu.vector_store %arg19[%c0_38, %c960], %70 {strides = array<i32>} : memref<8x2048xbf16, #tpu.memory_space<vmem>>, vector<8x32xbf16>,
    %72 = vector.extract_strided_slice %9 {offsets = [248, 0], sizes = [8, 32], strides = [1, 1]} : vector<512x32xbf16> to vector<8x32xbf16>
    %c0_39 = arith.constant 0 : index
    %c992 = arith.constant 992 : index
    %73 = vector.load %arg19[%c0_39, %c992] : memref<8x2048xbf16, #tpu.memory_space<vmem>>, vector<8x32xbf16>
    tpu.vector_store %arg19[%c0_39, %c992], %72 {strides = array<i32>} : memref<8x2048xbf16, #tpu.memory_space<vmem>>, vector<8x32xbf16>,
    %74 = vector.extract_strided_slice %9 {offsets = [256, 0], sizes = [8, 32], strides = [1, 1]} : vector<512x32xbf16> to vector<8x32xbf16>
    %c0_40 = arith.constant 0 : index
    %c1024 = arith.constant 1024 : index
    %75 = vector.load %arg19[%c0_40, %c1024] : memref<8x2048xbf16, #tpu.memory_space<vmem>>, vector<8x32xbf16>
    tpu.vector_store %arg19[%c0_40, %c1024], %74 {strides = array<i32>} : memref<8x2048xbf16, #tpu.memory_space<vmem>>, vector<8x32xbf16>,
    %76 = vector.extract_strided_slice %9 {offsets = [264, 0], sizes = [8, 32], strides = [1, 1]} : vector<512x32xbf16> to vector<8x32xbf16>
    %c0_41 = arith.constant 0 : index
    %c1056 = arith.constant 1056 : index
    %77 = vector.load %arg19[%c0_41, %c1056] : memref<8x2048xbf16, #tpu.memory_space<vmem>>, vector<8x32xbf16>
    tpu.vector_store %arg19[%c0_41, %c1056], %76 {strides = array<i32>} : memref<8x2048xbf16, #tpu.memory_space<vmem>>, vector<8x32xbf16>,
    %78 = vector.extract_strided_slice %9 {offsets = [272, 0], sizes = [8, 32], strides = [1, 1]} : vector<512x32xbf16> to vector<8x32xbf16>
    %c0_42 = arith.constant 0 : index
    %c1088 = arith.constant 1088 : index
    %79 = vector.load %arg19[%c0_42, %c1088] : memref<8x2048xbf16, #tpu.memory_space<vmem>>, vector<8x32xbf16>
    tpu.vector_store %arg19[%c0_42, %c1088], %78 {strides = array<i32>} : memref<8x2048xbf16, #tpu.memory_space<vmem>>, vector<8x32xbf16>,
    %80 = vector.extract_strided_slice %9 {offsets = [280, 0], sizes = [8, 32], strides = [1, 1]} : vector<512x32xbf16> to vector<8x32xbf16>
    %c0_43 = arith.constant 0 : index
    %c1120 = arith.constant 1120 : index
    %81 = vector.load %arg19[%c0_43, %c1120] : memref<8x2048xbf16, #tpu.memory_space<vmem>>, vector<8x32xbf16>
    tpu.vector_store %arg19[%c0_43, %c1120], %80 {strides = array<i32>} : memref<8x2048xbf16, #tpu.memory_space<vmem>>, vector<8x32xbf16>,
    %82 = vector.extract_strided_slice %9 {offsets = [288, 0], sizes = [8, 32], strides = [1, 1]} : vector<512x32xbf16> to vector<8x32xbf16>
    %c0_44 = arith.constant 0 : index
    %c1152 = arith.constant 1152 : index
    %83 = vector.load %arg19[%c0_44, %c1152] : memref<8x2048xbf16, #tpu.memory_space<vmem>>, vector<8x32xbf16>
    tpu.vector_store %arg19[%c0_44, %c1152], %82 {strides = array<i32>} : memref<8x2048xbf16, #tpu.memory_space<vmem>>, vector<8x32xbf16>,
    %84 = vector.extract_strided_slice %9 {offsets = [296, 0], sizes = [8, 32], strides = [1, 1]} : vector<512x32xbf16> to vector<8x32xbf16>
    %c0_45 = arith.constant 0 : index
    %c1184 = arith.constant 1184 : index
    %85 = vector.load %arg19[%c0_45, %c1184] : memref<8x2048xbf16, #tpu.memory_space<vmem>>, vector<8x32xbf16>
    tpu.vector_store %arg19[%c0_45, %c1184], %84 {strides = array<i32>} : memref<8x2048xbf16, #tpu.memory_space<vmem>>, vector<8x32xbf16>,
    %86 = vector.extract_strided_slice %9 {offsets = [304, 0], sizes = [8, 32], strides = [1, 1]} : vector<512x32xbf16> to vector<8x32xbf16>
    %c0_46 = arith.constant 0 : index
    %c1216 = arith.constant 1216 : index
    %87 = vector.load %arg19[%c0_46, %c1216] : memref<8x2048xbf16, #tpu.memory_space<vmem>>, vector<8x32xbf16>
    tpu.vector_store %arg19[%c0_46, %c1216], %86 {strides = array<i32>} : memref<8x2048xbf16, #tpu.memory_space<vmem>>, vector<8x32xbf16>,
    %88 = vector.extract_strided_slice %9 {offsets = [312, 0], sizes = [8, 32], strides = [1, 1]} : vector<512x32xbf16> to vector<8x32xbf16>
    %c0_47 = arith.constant 0 : index
    %c1248 = arith.constant 1248 : index
    %89 = vector.load %arg19[%c0_47, %c1248] : memref<8x2048xbf16, #tpu.memory_space<vmem>>, vector<8x32xbf16>
    tpu.vector_store %arg19[%c0_47, %c1248], %88 {strides = array<i32>} : memref<8x2048xbf16, #tpu.memory_space<vmem>>, vector<8x32xbf16>,
    %90 = vector.extract_strided_slice %9 {offsets = [320, 0], sizes = [8, 32], strides = [1, 1]} : vector<512x32xbf16> to vector<8x32xbf16>
    %c0_48 = arith.constant 0 : index
    %c1280 = arith.constant 1280 : index
    %91 = vector.load %arg19[%c0_48, %c1280] : memref<8x2048xbf16, #tpu.memory_space<vmem>>, vector<8x32xbf16>
    tpu.vector_store %arg19[%c0_48, %c1280], %90 {strides = array<i32>} : memref<8x2048xbf16, #tpu.memory_space<vmem>>, vector<8x32xbf16>,
    %92 = vector.extract_strided_slice %9 {offsets = [328, 0], sizes = [8, 32], strides = [1, 1]} : vector<512x32xbf16> to vector<8x32xbf16>
    %c0_49 = arith.constant 0 : index
    %c1312 = arith.constant 1312 : index
    %93 = vector.load %arg19[%c0_49, %c1312] : memref<8x2048xbf16, #tpu.memory_space<vmem>>, vector<8x32xbf16>
    tpu.vector_store %arg19[%c0_49, %c1312], %92 {strides = array<i32>} : memref<8x2048xbf16, #tpu.memory_space<vmem>>, vector<8x32xbf16>,
    %94 = vector.extract_strided_slice %9 {offsets = [336, 0], sizes = [8, 32], strides = [1, 1]} : vector<512x32xbf16> to vector<8x32xbf16>
    %c0_50 = arith.constant 0 : index
    %c1344 = arith.constant 1344 : index
    %95 = vector.load %arg19[%c0_50, %c1344] : memref<8x2048xbf16, #tpu.memory_space<vmem>>, vector<8x32xbf16>
    tpu.vector_store %arg19[%c0_50, %c1344], %94 {strides = array<i32>} : memref<8x2048xbf16, #tpu.memory_space<vmem>>, vector<8x32xbf16>,
    %96 = vector.extract_strided_slice %9 {offsets = [344, 0], sizes = [8, 32], strides = [1, 1]} : vector<512x32xbf16> to vector<8x32xbf16>
    %c0_51 = arith.constant 0 : index
    %c1376 = arith.constant 1376 : index
    %97 = vector.load %arg19[%c0_51, %c1376] : memref<8x2048xbf16, #tpu.memory_space<vmem>>, vector<8x32xbf16>
    tpu.vector_store %arg19[%c0_51, %c1376], %96 {strides = array<i32>} : memref<8x2048xbf16, #tpu.memory_space<vmem>>, vector<8x32xbf16>,
    %98 = vector.extract_strided_slice %9 {offsets = [352, 0], sizes = [8, 32], strides = [1, 1]} : vector<512x32xbf16> to vector<8x32xbf16>
    %c0_52 = arith.constant 0 : index
    %c1408 = arith.constant 1408 : index
    %99 = vector.load %arg19[%c0_52, %c1408] : memref<8x2048xbf16, #tpu.memory_space<vmem>>, vector<8x32xbf16>
    tpu.vector_store %arg19[%c0_52, %c1408], %98 {strides = array<i32>} : memref<8x2048xbf16, #tpu.memory_space<vmem>>, vector<8x32xbf16>,
    %100 = vector.extract_strided_slice %9 {offsets = [360, 0], sizes = [8, 32], strides = [1, 1]} : vector<512x32xbf16> to vector<8x32xbf16>
    %c0_53 = arith.constant 0 : index
    %c1440 = arith.constant 1440 : index
    %101 = vector.load %arg19[%c0_53, %c1440] : memref<8x2048xbf16, #tpu.memory_space<vmem>>, vector<8x32xbf16>
    tpu.vector_store %arg19[%c0_53, %c1440], %100 {strides = array<i32>} : memref<8x2048xbf16, #tpu.memory_space<vmem>>, vector<8x32xbf16>,
    %102 = vector.extract_strided_slice %9 {offsets = [368, 0], sizes = [8, 32], strides = [1, 1]} : vector<512x32xbf16> to vector<8x32xbf16>
    %c0_54 = arith.constant 0 : index
    %c1472 = arith.constant 1472 : index
    %103 = vector.load %arg19[%c0_54, %c1472] : memref<8x2048xbf16, #tpu.memory_space<vmem>>, vector<8x32xbf16>
    tpu.vector_store %arg19[%c0_54, %c1472], %102 {strides = array<i32>} : memref<8x2048xbf16, #tpu.memory_space<vmem>>, vector<8x32xbf16>,
    %104 = vector.extract_strided_slice %9 {offsets = [376, 0], sizes = [8, 32], strides = [1, 1]} : vector<512x32xbf16> to vector<8x32xbf16>
    %c0_55 = arith.constant 0 : index
    %c1504 = arith.constant 1504 : index
    %105 = vector.load %arg19[%c0_55, %c1504] : memref<8x2048xbf16, #tpu.memory_space<vmem>>, vector<8x32xbf16>
    tpu.vector_store %arg19[%c0_55, %c1504], %104 {strides = array<i32>} : memref<8x2048xbf16, #tpu.memory_space<vmem>>, vector<8x32xbf16>,
    %106 = vector.extract_strided_slice %9 {offsets = [384, 0], sizes = [8, 32], strides = [1, 1]} : vector<512x32xbf16> to vector<8x32xbf16>
    %c0_56 = arith.constant 0 : index
    %c1536 = arith.constant 1536 : index
    %107 = vector.load %arg19[%c0_56, %c1536] : memref<8x2048xbf16, #tpu.memory_space<vmem>>, vector<8x32xbf16>
    tpu.vector_store %arg19[%c0_56, %c1536], %106 {strides = array<i32>} : memref<8x2048xbf16, #tpu.memory_space<vmem>>, vector<8x32xbf16>,
    %108 = vector.extract_strided_slice %9 {offsets = [392, 0], sizes = [8, 32], strides = [1, 1]} : vector<512x32xbf16> to vector<8x32xbf16>
    %c0_57 = arith.constant 0 : index
    %c1568 = arith.constant 1568 : index
    %109 = vector.load %arg19[%c0_57, %c1568] : memref<8x2048xbf16, #tpu.memory_space<vmem>>, vector<8x32xbf16>
    tpu.vector_store %arg19[%c0_57, %c1568], %108 {strides = array<i32>} : memref<8x2048xbf16, #tpu.memory_space<vmem>>, vector<8x32xbf16>,
    %110 = vector.extract_strided_slice %9 {offsets = [400, 0], sizes = [8, 32], strides = [1, 1]} : vector<512x32xbf16> to vector<8x32xbf16>
    %c0_58 = arith.constant 0 : index
    %c1600 = arith.constant 1600 : index
    %111 = vector.load %arg19[%c0_58, %c1600] : memref<8x2048xbf16, #tpu.memory_space<vmem>>, vector<8x32xbf16>
    tpu.vector_store %arg19[%c0_58, %c1600], %110 {strides = array<i32>} : memref<8x2048xbf16, #tpu.memory_space<vmem>>, vector<8x32xbf16>,
    %112 = vector.extract_strided_slice %9 {offsets = [408, 0], sizes = [8, 32], strides = [1, 1]} : vector<512x32xbf16> to vector<8x32xbf16>
    %c0_59 = arith.constant 0 : index
    %c1632 = arith.constant 1632 : index
    %113 = vector.load %arg19[%c0_59, %c1632] : memref<8x2048xbf16, #tpu.memory_space<vmem>>, vector<8x32xbf16>
    tpu.vector_store %arg19[%c0_59, %c1632], %112 {strides = array<i32>} : memref<8x2048xbf16, #tpu.memory_space<vmem>>, vector<8x32xbf16>,
    %114 = vector.extract_strided_slice %9 {offsets = [416, 0], sizes = [8, 32], strides = [1, 1]} : vector<512x32xbf16> to vector<8x32xbf16>
    %c0_60 = arith.constant 0 : index
    %c1664 = arith.constant 1664 : index
    %115 = vector.load %arg19[%c0_60, %c1664] : memref<8x2048xbf16, #tpu.memory_space<vmem>>, vector<8x32xbf16>
    tpu.vector_store %arg19[%c0_60, %c1664], %114 {strides = array<i32>} : memref<8x2048xbf16, #tpu.memory_space<vmem>>, vector<8x32xbf16>,
    %116 = vector.extract_strided_slice %9 {offsets = [424, 0], sizes = [8, 32], strides = [1, 1]} : vector<512x32xbf16> to vector<8x32xbf16>
    %c0_61 = arith.constant 0 : index
    %c1696 = arith.constant 1696 : index
    %117 = vector.load %arg19[%c0_61, %c1696] : memref<8x2048xbf16, #tpu.memory_space<vmem>>, vector<8x32xbf16>
    tpu.vector_store %arg19[%c0_61, %c1696], %116 {strides = array<i32>} : memref<8x2048xbf16, #tpu.memory_space<vmem>>, vector<8x32xbf16>,
    %118 = vector.extract_strided_slice %9 {offsets = [432, 0], sizes = [8, 32], strides = [1, 1]} : vector<512x32xbf16> to vector<8x32xbf16>
    %c0_62 = arith.constant 0 : index
    %c1728 = arith.constant 1728 : index
    %119 = vector.load %arg19[%c0_62, %c1728] : memref<8x2048xbf16, #tpu.memory_space<vmem>>, vector<8x32xbf16>
    tpu.vector_store %arg19[%c0_62, %c1728], %118 {strides = array<i32>} : memref<8x2048xbf16, #tpu.memory_space<vmem>>, vector<8x32xbf16>,
    %120 = vector.extract_strided_slice %9 {offsets = [440, 0], sizes = [8, 32], strides = [1, 1]} : vector<512x32xbf16> to vector<8x32xbf16>
    %c0_63 = arith.constant 0 : index
    %c1760 = arith.constant 1760 : index
    %121 = vector.load %arg19[%c0_63, %c1760] : memref<8x2048xbf16, #tpu.memory_space<vmem>>, vector<8x32xbf16>
    tpu.vector_store %arg19[%c0_63, %c1760], %120 {strides = array<i32>} : memref<8x2048xbf16, #tpu.memory_space<vmem>>, vector<8x32xbf16>,
    %122 = vector.extract_strided_slice %9 {offsets = [448, 0], sizes = [8, 32], strides = [1, 1]} : vector<512x32xbf16> to vector<8x32xbf16>
    %c0_64 = arith.constant 0 : index
    %c1792 = arith.constant 1792 : index
    %123 = vector.load %arg19[%c0_64, %c1792] : memref<8x2048xbf16, #tpu.memory_space<vmem>>, vector<8x32xbf16>
    tpu.vector_store %arg19[%c0_64, %c1792], %122 {strides = array<i32>} : memref<8x2048xbf16, #tpu.memory_space<vmem>>, vector<8x32xbf16>,
    %124 = vector.extract_strided_slice %9 {offsets = [456, 0], sizes = [8, 32], strides = [1, 1]} : vector<512x32xbf16> to vector<8x32xbf16>
    %c0_65 = arith.constant 0 : index
    %c1824 = arith.constant 1824 : index
    %125 = vector.load %arg19[%c0_65, %c1824] : memref<8x2048xbf16, #tpu.memory_space<vmem>>, vector<8x32xbf16>
    tpu.vector_store %arg19[%c0_65, %c1824], %124 {strides = array<i32>} : memref<8x2048xbf16, #tpu.memory_space<vmem>>, vector<8x32xbf16>,
    %126 = vector.extract_strided_slice %9 {offsets = [464, 0], sizes = [8, 32], strides = [1, 1]} : vector<512x32xbf16> to vector<8x32xbf16>
    %c0_66 = arith.constant 0 : index
    %c1856 = arith.constant 1856 : index
    %127 = vector.load %arg19[%c0_66, %c1856] : memref<8x2048xbf16, #tpu.memory_space<vmem>>, vector<8x32xbf16>
    tpu.vector_store %arg19[%c0_66, %c1856], %126 {strides = array<i32>} : memref<8x2048xbf16, #tpu.memory_space<vmem>>, vector<8x32xbf16>,
    %128 = vector.extract_strided_slice %9 {offsets = [472, 0], sizes = [8, 32], strides = [1, 1]} : vector<512x32xbf16> to vector<8x32xbf16>
    %c0_67 = arith.constant 0 : index
    %c1888 = arith.constant 1888 : index
    %129 = vector.load %arg19[%c0_67, %c1888] : memref<8x2048xbf16, #tpu.memory_space<vmem>>, vector<8x32xbf16>
    tpu.vector_store %arg19[%c0_67, %c1888], %128 {strides = array<i32>} : memref<8x2048xbf16, #tpu.memory_space<vmem>>, vector<8x32xbf16>,
    %130 = vector.extract_strided_slice %9 {offsets = [480, 0], sizes = [8, 32], strides = [1, 1]} : vector<512x32xbf16> to vector<8x32xbf16>
    %c0_68 = arith.constant 0 : index
    %c1920 = arith.constant 1920 : index
    %131 = vector.load %arg19[%c0_68, %c1920] : memref<8x2048xbf16, #tpu.memory_space<vmem>>, vector<8x32xbf16>
    tpu.vector_store %arg19[%c0_68, %c1920], %130 {strides = array<i32>} : memref<8x2048xbf16, #tpu.memory_space<vmem>>, vector<8x32xbf16>,
    %132 = vector.extract_strided_slice %9 {offsets = [488, 0], sizes = [8, 32], strides = [1, 1]} : vector<512x32xbf16> to vector<8x32xbf16>
    %c0_69 = arith.constant 0 : index
    %c1952 = arith.constant 1952 : index
    %133 = vector.load %arg19[%c0_69, %c1952] : memref<8x2048xbf16, #tpu.memory_space<vmem>>, vector<8x32xbf16>
    tpu.vector_store %arg19[%c0_69, %c1952], %132 {strides = array<i32>} : memref<8x2048xbf16, #tpu.memory_space<vmem>>, vector<8x32xbf16>,
    %134 = vector.extract_strided_slice %9 {offsets = [496, 0], sizes = [8, 32], strides = [1, 1]} : vector<512x32xbf16> to vector<8x32xbf16>
    %c0_70 = arith.constant 0 : index
    %c1984 = arith.constant 1984 : index
    %135 = vector.load %arg19[%c0_70, %c1984] : memref<8x2048xbf16, #tpu.memory_space<vmem>>, vector<8x32xbf16>
    tpu.vector_store %arg19[%c0_70, %c1984], %134 {strides = array<i32>} : memref<8x2048xbf16, #tpu.memory_space<vmem>>, vector<8x32xbf16>,
    %136 = vector.extract_strided_slice %9 {offsets = [504, 0], sizes = [8, 32], strides = [1, 1]} : vector<512x32xbf16> to vector<8x32xbf16>
    %c0_71 = arith.constant 0 : index
    %c2016 = arith.constant 2016 : index
    %137 = vector.load %arg19[%c0_71, %c2016] : memref<8x2048xbf16, #tpu.memory_space<vmem>>, vector<8x32xbf16>
    tpu.vector_store %arg19[%c0_71, %c2016], %136 {strides = array<i32>} : memref<8x2048xbf16, #tpu.memory_space<vmem>>, vector<8x32xbf16>,
    %c0_72 = arith.constant 0 : index
    %c0_73 = arith.constant 0 : index
    %138 = vector.load %arg5[%c0_72, %c0_73] : memref<512x64xbf16, #tpu.memory_space<vmem>>, vector<512x64xbf16>
    %c0_74 = arith.constant 0 : index
    %c0_75 = arith.constant 0 : index
    %139 = vector.load %arg6[%c0_74, %c0_75] : memref<1x64xf32, #tpu.memory_space<vmem>>, vector<1x64xf32>
    %c0_76 = arith.constant 0 : index
    %c0_77 = arith.constant 0 : index
    %140 = vector.load %arg19[%c0_76, %c0_77] : memref<8x2048xbf16, #tpu.memory_space<vmem>>, vector<8x128xbf16>
    %c0_78 = arith.constant 0 : index
    %c256_79 = arith.constant 256 : index
    %141 = vector.load %arg19[%c0_78, %c256_79] : memref<8x2048xbf16, #tpu.memory_space<vmem>>, vector<8x128xbf16>
    %c0_80 = arith.constant 0 : index
    %c512_81 = arith.constant 512 : index
    %142 = vector.load %arg19[%c0_80, %c512_81] : memref<8x2048xbf16, #tpu.memory_space<vmem>>, vector<8x128xbf16>
    %c0_82 = arith.constant 0 : index
    %c768_83 = arith.constant 768 : index
    %143 = vector.load %arg19[%c0_82, %c768_83] : memref<8x2048xbf16, #tpu.memory_space<vmem>>, vector<8x128xbf16>
    %144 = tpu.concatenate %140, %141, %142, %143 in 1 : vector<8x128xbf16>, vector<8x128xbf16>, vector<8x128xbf16>, vector<8x128xbf16> -> vector<8x512xbf16>
    %cst_84 = arith.constant dense<0.000000e+00> : vector<8x64xf32>
    %145 = tpu.matmul %144, %138, %cst_84 {dimension_numbers = #tpu.dot_dimension_numbers<[1], [0], [0], [1], [0, 0, 1, 1], [], []>} : vector<8x512xbf16>, vector<512x64xbf16>, vector<8x64xf32> -> vector<8x64xf32>
    %146 = vector.broadcast %139 : vector<1x64xf32> to vector<8x64xf32>
    %147 = arith.addf %145, %146 : vector<8x64xf32>
    %cst_85 = arith.constant 0.000000e+00 : f32
    %148 = vector.broadcast %cst_85 : f32 to vector<8x64xf32>
    %149 = arith.maximumf %147, %148 : vector<8x64xf32>
    %150 = arith.truncf %149 : vector<8x64xf32> to vector<8x64xbf16>
    %c0_86 = arith.constant 0 : index
    %c0_87 = arith.constant 0 : index
    %151 = vector.load %arg20[%c0_86, %c0_87] : memref<8x576xbf16, #tpu.memory_space<vmem>>, vector<8x64xbf16>
    tpu.vector_store %arg20[%c0_86, %c0_87], %150 {strides = array<i32>} : memref<8x576xbf16, #tpu.memory_space<vmem>>, vector<8x64xbf16>,
    %c0_88 = arith.constant 0 : index
    %c64_89 = arith.constant 64 : index
    %152 = vector.load %arg19[%c0_88, %c64_89] : memref<8x2048xbf16, #tpu.memory_space<vmem>>, vector<8x128xbf16>
    %c0_90 = arith.constant 0 : index
    %c320_91 = arith.constant 320 : index
    %153 = vector.load %arg19[%c0_90, %c320_91] : memref<8x2048xbf16, #tpu.memory_space<vmem>>, vector<8x128xbf16>
    %c0_92 = arith.constant 0 : index
    %c576_93 = arith.constant 576 : index
    %154 = vector.load %arg19[%c0_92, %c576_93] : memref<8x2048xbf16, #tpu.memory_space<vmem>>, vector<8x128xbf16>
    %c0_94 = arith.constant 0 : index
    %c832_95 = arith.constant 832 : index
    %155 = vector.load %arg19[%c0_94, %c832_95] : memref<8x2048xbf16, #tpu.memory_space<vmem>>, vector<8x128xbf16>
    %156 = tpu.concatenate %152, %153, %154, %155 in 1 : vector<8x128xbf16>, vector<8x128xbf16>, vector<8x128xbf16>, vector<8x128xbf16> -> vector<8x512xbf16>
    %cst_96 = arith.constant dense<0.000000e+00> : vector<8x64xf32>
    %157 = tpu.matmul %156, %138, %cst_96 {dimension_numbers = #tpu.dot_dimension_numbers<[1], [0], [0], [1], [0, 0, 1, 1], [], []>} : vector<8x512xbf16>, vector<512x64xbf16>, vector<8x64xf32> -> vector<8x64xf32>
    %158 = vector.broadcast %139 : vector<1x64xf32> to vector<8x64xf32>
    %159 = arith.addf %157, %158 : vector<8x64xf32>
    %cst_97 = arith.constant 0.000000e+00 : f32
    %160 = vector.broadcast %cst_97 : f32 to vector<8x64xf32>
    %161 = arith.maximumf %159, %160 : vector<8x64xf32>
    %162 = arith.truncf %161 : vector<8x64xf32> to vector<8x64xbf16>
    %c0_98 = arith.constant 0 : index
    %c64_99 = arith.constant 64 : index
    %163 = vector.load %arg20[%c0_98, %c64_99] : memref<8x576xbf16, #tpu.memory_space<vmem>>, vector<8x64xbf16>
    tpu.vector_store %arg20[%c0_98, %c64_99], %162 {strides = array<i32>} : memref<8x576xbf16, #tpu.memory_space<vmem>>, vector<8x64xbf16>,
    %c0_100 = arith.constant 0 : index
    %c128_101 = arith.constant 128 : index
    %164 = vector.load %arg19[%c0_100, %c128_101] : memref<8x2048xbf16, #tpu.memory_space<vmem>>, vector<8x128xbf16>
    %c0_102 = arith.constant 0 : index
    %c384_103 = arith.constant 384 : index
    %165 = vector.load %arg19[%c0_102, %c384_103] : memref<8x2048xbf16, #tpu.memory_space<vmem>>, vector<8x128xbf16>
    %c0_104 = arith.constant 0 : index
    %c640_105 = arith.constant 640 : index
    %166 = vector.load %arg19[%c0_104, %c640_105] : memref<8x2048xbf16, #tpu.memory_space<vmem>>, vector<8x128xbf16>
    %c0_106 = arith.constant 0 : index
    %c896_107 = arith.constant 896 : index
    %167 = vector.load %arg19[%c0_106, %c896_107] : memref<8x2048xbf16, #tpu.memory_space<vmem>>, vector<8x128xbf16>
    %168 = tpu.concatenate %164, %165, %166, %167 in 1 : vector<8x128xbf16>, vector<8x128xbf16>, vector<8x128xbf16>, vector<8x128xbf16> -> vector<8x512xbf16>
    %cst_108 = arith.constant dense<0.000000e+00> : vector<8x64xf32>
    %169 = tpu.matmul %168, %138, %cst_108 {dimension_numbers = #tpu.dot_dimension_numbers<[1], [0], [0], [1], [0, 0, 1, 1], [], []>} : vector<8x512xbf16>, vector<512x64xbf16>, vector<8x64xf32> -> vector<8x64xf32>
    %170 = vector.broadcast %139 : vector<1x64xf32> to vector<8x64xf32>
    %171 = arith.addf %169, %170 : vector<8x64xf32>
    %cst_109 = arith.constant 0.000000e+00 : f32
    %172 = vector.broadcast %cst_109 : f32 to vector<8x64xf32>
    %173 = arith.maximumf %171, %172 : vector<8x64xf32>
    %174 = arith.truncf %173 : vector<8x64xf32> to vector<8x64xbf16>
    %c0_110 = arith.constant 0 : index
    %c128_111 = arith.constant 128 : index
    %175 = vector.load %arg20[%c0_110, %c128_111] : memref<8x576xbf16, #tpu.memory_space<vmem>>, vector<8x64xbf16>
    tpu.vector_store %arg20[%c0_110, %c128_111], %174 {strides = array<i32>} : memref<8x576xbf16, #tpu.memory_space<vmem>>, vector<8x64xbf16>,
    %c0_112 = arith.constant 0 : index
    %c512_113 = arith.constant 512 : index
    %176 = vector.load %arg19[%c0_112, %c512_113] : memref<8x2048xbf16, #tpu.memory_space<vmem>>, vector<8x128xbf16>
    %c0_114 = arith.constant 0 : index
    %c768_115 = arith.constant 768 : index
    %177 = vector.load %arg19[%c0_114, %c768_115] : memref<8x2048xbf16, #tpu.memory_space<vmem>>, vector<8x128xbf16>
    %c0_116 = arith.constant 0 : index
    %c1024_117 = arith.constant 1024 : index
    %178 = vector.load %arg19[%c0_116, %c1024_117] : memref<8x2048xbf16, #tpu.memory_space<vmem>>, vector<8x128xbf16>
    %c0_118 = arith.constant 0 : index
    %c1280_119 = arith.constant 1280 : index
    %179 = vector.load %arg19[%c0_118, %c1280_119] : memref<8x2048xbf16, #tpu.memory_space<vmem>>, vector<8x128xbf16>
    %180 = tpu.concatenate %176, %177, %178, %179 in 1 : vector<8x128xbf16>, vector<8x128xbf16>, vector<8x128xbf16>, vector<8x128xbf16> -> vector<8x512xbf16>
    %cst_120 = arith.constant dense<0.000000e+00> : vector<8x64xf32>
    %181 = tpu.matmul %180, %138, %cst_120 {dimension_numbers = #tpu.dot_dimension_numbers<[1], [0], [0], [1], [0, 0, 1, 1], [], []>} : vector<8x512xbf16>, vector<512x64xbf16>, vector<8x64xf32> -> vector<8x64xf32>
    %182 = vector.broadcast %139 : vector<1x64xf32> to vector<8x64xf32>
    %183 = arith.addf %181, %182 : vector<8x64xf32>
    %cst_121 = arith.constant 0.000000e+00 : f32
    %184 = vector.broadcast %cst_121 : f32 to vector<8x64xf32>
    %185 = arith.maximumf %183, %184 : vector<8x64xf32>
    %186 = arith.truncf %185 : vector<8x64xf32> to vector<8x64xbf16>
    %c0_122 = arith.constant 0 : index
    %c192_123 = arith.constant 192 : index
    %187 = vector.load %arg20[%c0_122, %c192_123] : memref<8x576xbf16, #tpu.memory_space<vmem>>, vector<8x64xbf16>
    tpu.vector_store %arg20[%c0_122, %c192_123], %186 {strides = array<i32>} : memref<8x576xbf16, #tpu.memory_space<vmem>>, vector<8x64xbf16>,
    %c0_124 = arith.constant 0 : index
    %c576_125 = arith.constant 576 : index
    %188 = vector.load %arg19[%c0_124, %c576_125] : memref<8x2048xbf16, #tpu.memory_space<vmem>>, vector<8x128xbf16>
    %c0_126 = arith.constant 0 : index
    %c832_127 = arith.constant 832 : index
    %189 = vector.load %arg19[%c0_126, %c832_127] : memref<8x2048xbf16, #tpu.memory_space<vmem>>, vector<8x128xbf16>
    %c0_128 = arith.constant 0 : index
    %c1088_129 = arith.constant 1088 : index
    %190 = vector.load %arg19[%c0_128, %c1088_129] : memref<8x2048xbf16, #tpu.memory_space<vmem>>, vector<8x128xbf16>
    %c0_130 = arith.constant 0 : index
    %c1344_131 = arith.constant 1344 : index
    %191 = vector.load %arg19[%c0_130, %c1344_131] : memref<8x2048xbf16, #tpu.memory_space<vmem>>, vector<8x128xbf16>
    %192 = tpu.concatenate %188, %189, %190, %191 in 1 : vector<8x128xbf16>, vector<8x128xbf16>, vector<8x128xbf16>, vector<8x128xbf16> -> vector<8x512xbf16>
    %cst_132 = arith.constant dense<0.000000e+00> : vector<8x64xf32>
    %193 = tpu.matmul %192, %138, %cst_132 {dimension_numbers = #tpu.dot_dimension_numbers<[1], [0], [0], [1], [0, 0, 1, 1], [], []>} : vector<8x512xbf16>, vector<512x64xbf16>, vector<8x64xf32> -> vector<8x64xf32>
    %194 = vector.broadcast %139 : vector<1x64xf32> to vector<8x64xf32>
    %195 = arith.addf %193, %194 : vector<8x64xf32>
    %cst_133 = arith.constant 0.000000e+00 : f32
    %196 = vector.broadcast %cst_133 : f32 to vector<8x64xf32>
    %197 = arith.maximumf %195, %196 : vector<8x64xf32>
    %198 = arith.truncf %197 : vector<8x64xf32> to vector<8x64xbf16>
    %c0_134 = arith.constant 0 : index
    %c256_135 = arith.constant 256 : index
    %199 = vector.load %arg20[%c0_134, %c256_135] : memref<8x576xbf16, #tpu.memory_space<vmem>>, vector<8x64xbf16>
    tpu.vector_store %arg20[%c0_134, %c256_135], %198 {strides = array<i32>} : memref<8x576xbf16, #tpu.memory_space<vmem>>, vector<8x64xbf16>,
    %c0_136 = arith.constant 0 : index
    %c640_137 = arith.constant 640 : index
    %200 = vector.load %arg19[%c0_136, %c640_137] : memref<8x2048xbf16, #tpu.memory_space<vmem>>, vector<8x128xbf16>
    %c0_138 = arith.constant 0 : index
    %c896_139 = arith.constant 896 : index
    %201 = vector.load %arg19[%c0_138, %c896_139] : memref<8x2048xbf16, #tpu.memory_space<vmem>>, vector<8x128xbf16>
    %c0_140 = arith.constant 0 : index
    %c1152_141 = arith.constant 1152 : index
    %202 = vector.load %arg19[%c0_140, %c1152_141] : memref<8x2048xbf16, #tpu.memory_space<vmem>>, vector<8x128xbf16>
    %c0_142 = arith.constant 0 : index
    %c1408_143 = arith.constant 1408 : index
    %203 = vector.load %arg19[%c0_142, %c1408_143] : memref<8x2048xbf16, #tpu.memory_space<vmem>>, vector<8x128xbf16>
    %204 = tpu.concatenate %200, %201, %202, %203 in 1 : vector<8x128xbf16>, vector<8x128xbf16>, vector<8x128xbf16>, vector<8x128xbf16> -> vector<8x512xbf16>
    %cst_144 = arith.constant dense<0.000000e+00> : vector<8x64xf32>
    %205 = tpu.matmul %204, %138, %cst_144 {dimension_numbers = #tpu.dot_dimension_numbers<[1], [0], [0], [1], [0, 0, 1, 1], [], []>} : vector<8x512xbf16>, vector<512x64xbf16>, vector<8x64xf32> -> vector<8x64xf32>
    %206 = vector.broadcast %139 : vector<1x64xf32> to vector<8x64xf32>
    %207 = arith.addf %205, %206 : vector<8x64xf32>
    %cst_145 = arith.constant 0.000000e+00 : f32
    %208 = vector.broadcast %cst_145 : f32 to vector<8x64xf32>
    %209 = arith.maximumf %207, %208 : vector<8x64xf32>
    %210 = arith.truncf %209 : vector<8x64xf32> to vector<8x64xbf16>
    %c0_146 = arith.constant 0 : index
    %c320_147 = arith.constant 320 : index
    %211 = vector.load %arg20[%c0_146, %c320_147] : memref<8x576xbf16, #tpu.memory_space<vmem>>, vector<8x64xbf16>
    tpu.vector_store %arg20[%c0_146, %c320_147], %210 {strides = array<i32>} : memref<8x576xbf16, #tpu.memory_space<vmem>>, vector<8x64xbf16>,
    %c0_148 = arith.constant 0 : index
    %c1024_149 = arith.constant 1024 : index
    %212 = vector.load %arg19[%c0_148, %c1024_149] : memref<8x2048xbf16, #tpu.memory_space<vmem>>, vector<8x128xbf16>
    %c0_150 = arith.constant 0 : index
    %c1280_151 = arith.constant 1280 : index
    %213 = vector.load %arg19[%c0_150, %c1280_151] : memref<8x2048xbf16, #tpu.memory_space<vmem>>, vector<8x128xbf16>
    %c0_152 = arith.constant 0 : index
    %c1536_153 = arith.constant 1536 : index
    %214 = vector.load %arg19[%c0_152, %c1536_153] : memref<8x2048xbf16, #tpu.memory_space<vmem>>, vector<8x128xbf16>
    %c0_154 = arith.constant 0 : index
    %c1792_155 = arith.constant 1792 : index
    %215 = vector.load %arg19[%c0_154, %c1792_155] : memref<8x2048xbf16, #tpu.memory_space<vmem>>, vector<8x128xbf16>
    %216 = tpu.concatenate %212, %213, %214, %215 in 1 : vector<8x128xbf16>, vector<8x128xbf16>, vector<8x128xbf16>, vector<8x128xbf16> -> vector<8x512xbf16>
    %cst_156 = arith.constant dense<0.000000e+00> : vector<8x64xf32>
    %217 = tpu.matmul %216, %138, %cst_156 {dimension_numbers = #tpu.dot_dimension_numbers<[1], [0], [0], [1], [0, 0, 1, 1], [], []>} : vector<8x512xbf16>, vector<512x64xbf16>, vector<8x64xf32> -> vector<8x64xf32>
    %218 = vector.broadcast %139 : vector<1x64xf32> to vector<8x64xf32>
    %219 = arith.addf %217, %218 : vector<8x64xf32>
    %cst_157 = arith.constant 0.000000e+00 : f32
    %220 = vector.broadcast %cst_157 : f32 to vector<8x64xf32>
    %221 = arith.maximumf %219, %220 : vector<8x64xf32>
    %222 = arith.truncf %221 : vector<8x64xf32> to vector<8x64xbf16>
    %c0_158 = arith.constant 0 : index
    %c384_159 = arith.constant 384 : index
    %223 = vector.load %arg20[%c0_158, %c384_159] : memref<8x576xbf16, #tpu.memory_space<vmem>>, vector<8x64xbf16>
    tpu.vector_store %arg20[%c0_158, %c384_159], %222 {strides = array<i32>} : memref<8x576xbf16, #tpu.memory_space<vmem>>, vector<8x64xbf16>,
    %c0_160 = arith.constant 0 : index
    %c1088_161 = arith.constant 1088 : index
    %224 = vector.load %arg19[%c0_160, %c1088_161] : memref<8x2048xbf16, #tpu.memory_space<vmem>>, vector<8x128xbf16>
    %c0_162 = arith.constant 0 : index
    %c1344_163 = arith.constant 1344 : index
    %225 = vector.load %arg19[%c0_162, %c1344_163] : memref<8x2048xbf16, #tpu.memory_space<vmem>>, vector<8x128xbf16>
    %c0_164 = arith.constant 0 : index
    %c1600_165 = arith.constant 1600 : index
    %226 = vector.load %arg19[%c0_164, %c1600_165] : memref<8x2048xbf16, #tpu.memory_space<vmem>>, vector<8x128xbf16>
    %c0_166 = arith.constant 0 : index
    %c1856_167 = arith.constant 1856 : index
    %227 = vector.load %arg19[%c0_166, %c1856_167] : memref<8x2048xbf16, #tpu.memory_space<vmem>>, vector<8x128xbf16>
    %228 = tpu.concatenate %224, %225, %226, %227 in 1 : vector<8x128xbf16>, vector<8x128xbf16>, vector<8x128xbf16>, vector<8x128xbf16> -> vector<8x512xbf16>
    %cst_168 = arith.constant dense<0.000000e+00> : vector<8x64xf32>
    %229 = tpu.matmul %228, %138, %cst_168 {dimension_numbers = #tpu.dot_dimension_numbers<[1], [0], [0], [1], [0, 0, 1, 1], [], []>} : vector<8x512xbf16>, vector<512x64xbf16>, vector<8x64xf32> -> vector<8x64xf32>
    %230 = vector.broadcast %139 : vector<1x64xf32> to vector<8x64xf32>
    %231 = arith.addf %229, %230 : vector<8x64xf32>
    %cst_169 = arith.constant 0.000000e+00 : f32
    %232 = vector.broadcast %cst_169 : f32 to vector<8x64xf32>
    %233 = arith.maximumf %231, %232 : vector<8x64xf32>
    %234 = arith.truncf %233 : vector<8x64xf32> to vector<8x64xbf16>
    %c0_170 = arith.constant 0 : index
    %c448_171 = arith.constant 448 : index
    %235 = vector.load %arg20[%c0_170, %c448_171] : memref<8x576xbf16, #tpu.memory_space<vmem>>, vector<8x64xbf16>
    tpu.vector_store %arg20[%c0_170, %c448_171], %234 {strides = array<i32>} : memref<8x576xbf16, #tpu.memory_space<vmem>>, vector<8x64xbf16>,
    %c0_172 = arith.constant 0 : index
    %c1152_173 = arith.constant 1152 : index
    %236 = vector.load %arg19[%c0_172, %c1152_173] : memref<8x2048xbf16, #tpu.memory_space<vmem>>, vector<8x128xbf16>
    %c0_174 = arith.constant 0 : index
    %c1408_175 = arith.constant 1408 : index
    %237 = vector.load %arg19[%c0_174, %c1408_175] : memref<8x2048xbf16, #tpu.memory_space<vmem>>, vector<8x128xbf16>
    %c0_176 = arith.constant 0 : index
    %c1664_177 = arith.constant 1664 : index
    %238 = vector.load %arg19[%c0_176, %c1664_177] : memref<8x2048xbf16, #tpu.memory_space<vmem>>, vector<8x128xbf16>
    %c0_178 = arith.constant 0 : index
    %c1920_179 = arith.constant 1920 : index
    %239 = vector.load %arg19[%c0_178, %c1920_179] : memref<8x2048xbf16, #tpu.memory_space<vmem>>, vector<8x128xbf16>
    %240 = tpu.concatenate %236, %237, %238, %239 in 1 : vector<8x128xbf16>, vector<8x128xbf16>, vector<8x128xbf16>, vector<8x128xbf16> -> vector<8x512xbf16>
    %cst_180 = arith.constant dense<0.000000e+00> : vector<8x64xf32>
    %241 = tpu.matmul %240, %138, %cst_180 {dimension_numbers = #tpu.dot_dimension_numbers<[1], [0], [0], [1], [0, 0, 1, 1], [], []>} : vector<8x512xbf16>, vector<512x64xbf16>, vector<8x64xf32> -> vector<8x64xf32>
    %242 = vector.broadcast %139 : vector<1x64xf32> to vector<8x64xf32>
    %243 = arith.addf %241, %242 : vector<8x64xf32>
    %cst_181 = arith.constant 0.000000e+00 : f32
    %244 = vector.broadcast %cst_181 : f32 to vector<8x64xf32>
    %245 = arith.maximumf %243, %244 : vector<8x64xf32>
    %246 = arith.truncf %245 : vector<8x64xf32> to vector<8x64xbf16>
    %c0_182 = arith.constant 0 : index
    %c512_183 = arith.constant 512 : index
    %247 = vector.load %arg20[%c0_182, %c512_183] : memref<8x576xbf16, #tpu.memory_space<vmem>>, vector<8x64xbf16>
    tpu.vector_store %arg20[%c0_182, %c512_183], %246 {strides = array<i32>} : memref<8x576xbf16, #tpu.memory_space<vmem>>, vector<8x64xbf16>,
    %c0_184 = arith.constant 0 : index
    %c0_185 = arith.constant 0 : index
    %248 = vector.load %arg20[%c0_184, %c0_185] : memref<8x576xbf16, #tpu.memory_space<vmem>>, vector<8x576xbf16>
    %c0_186 = arith.constant 0 : index
    %c0_187 = arith.constant 0 : index
    %249 = vector.load %arg7[%c0_186, %c0_187] : memref<576x64xbf16, #tpu.memory_space<vmem>>, vector<576x64xbf16>
    %cst_188 = arith.constant dense<0.000000e+00> : vector<8x64xf32>
    %250 = tpu.matmul %248, %249, %cst_188 {dimension_numbers = #tpu.dot_dimension_numbers<[1], [0], [0], [1], [0, 0, 1, 1], [], []>} : vector<8x576xbf16>, vector<576x64xbf16>, vector<8x64xf32> -> vector<8x64xf32>
    %c0_189 = arith.constant 0 : index
    %c0_190 = arith.constant 0 : index
    %251 = vector.load %arg8[%c0_189, %c0_190] : memref<1x64xf32, #tpu.memory_space<vmem>>, vector<1x64xf32>
    %252 = vector.broadcast %251 : vector<1x64xf32> to vector<8x64xf32>
    %253 = arith.addf %250, %252 : vector<8x64xf32>
    %cst_191 = arith.constant 0.000000e+00 : f32
    %254 = vector.broadcast %cst_191 : f32 to vector<8x64xf32>
    %255 = arith.maximumf %253, %254 : vector<8x64xf32>
    %256 = arith.truncf %255 : vector<8x64xf32> to vector<8x64xbf16>
    %c0_192 = arith.constant 0 : index
    %c0_193 = arith.constant 0 : index
    %257 = vector.load %arg9[%c0_192, %c0_193] : memref<64x256xbf16, #tpu.memory_space<vmem>>, vector<64x256xbf16>
    %cst_194 = arith.constant dense<0.000000e+00> : vector<8x256xf32>
    %258 = tpu.matmul %256, %257, %cst_194 {dimension_numbers = #tpu.dot_dimension_numbers<[1], [0], [0], [1], [0, 0, 1, 1], [], []>} : vector<8x64xbf16>, vector<64x256xbf16>, vector<8x256xf32> -> vector<8x256xf32>
    %c0_195 = arith.constant 0 : index
    %c0_196 = arith.constant 0 : index
    %259 = vector.load %arg10[%c0_195, %c0_196] : memref<1x256xf32, #tpu.memory_space<vmem>>, vector<1x256xf32>
    %260 = vector.broadcast %259 : vector<1x256xf32> to vector<8x256xf32>
    %261 = arith.addf %258, %260 : vector<8x256xf32>
    %cst_197 = arith.constant 0.000000e+00 : f32
    %262 = vector.broadcast %cst_197 : f32 to vector<8x256xf32>
    %263 = arith.maximumf %261, %262 : vector<8x256xf32>
    %264 = arith.truncf %263 : vector<8x256xf32> to vector<8x256xbf16>
    %c0_198 = arith.constant 0 : index
    %c0_199 = arith.constant 0 : index
    %265 = vector.load %arg11[%c0_198, %c0_199] : memref<256x256xbf16, #tpu.memory_space<vmem>>, vector<256x256xbf16>
    %cst_200 = arith.constant dense<0.000000e+00> : vector<8x256xf32>
    %266 = tpu.matmul %264, %265, %cst_200 {dimension_numbers = #tpu.dot_dimension_numbers<[1], [0], [0], [1], [0, 0, 1, 1], [], []>} : vector<8x256xbf16>, vector<256x256xbf16>, vector<8x256xf32> -> vector<8x256xf32>
    %c0_201 = arith.constant 0 : index
    %c0_202 = arith.constant 0 : index
    %267 = vector.load %arg2[%c0_201, %c0_202] : memref<8x8xf32, #tpu.memory_space<vmem>>, vector<8x8xf32>
    %268 = arith.truncf %267 : vector<8x8xf32> to vector<8x8xbf16>
    %c0_203 = arith.constant 0 : index
    %c0_204 = arith.constant 0 : index
    %269 = vector.load %arg12[%c0_203, %c0_204] : memref<8x256xbf16, #tpu.memory_space<vmem>>, vector<8x256xbf16>
    %cst_205 = arith.constant dense<0.000000e+00> : vector<8x256xf32>
    %270 = tpu.matmul %268, %269, %cst_205 {dimension_numbers = #tpu.dot_dimension_numbers<[1], [0], [0], [1], [0, 0, 1, 1], [], []>} : vector<8x8xbf16>, vector<8x256xbf16>, vector<8x256xf32> -> vector<8x256xf32>
    %271 = arith.addf %266, %270 : vector<8x256xf32>
    %c0_206 = arith.constant 0 : index
    %c0_207 = arith.constant 0 : index
    %272 = vector.load %arg13[%c0_206, %c0_207] : memref<1x256xf32, #tpu.memory_space<vmem>>, vector<1x256xf32>
    %273 = vector.broadcast %272 : vector<1x256xf32> to vector<8x256xf32>
    %274 = arith.addf %271, %273 : vector<8x256xf32>
    %cst_208 = arith.constant 0.000000e+00 : f32
    %275 = vector.broadcast %cst_208 : f32 to vector<8x256xf32>
    %276 = arith.maximumf %274, %275 : vector<8x256xf32>
    %277 = arith.truncf %276 : vector<8x256xf32> to vector<8x256xbf16>
    %c0_209 = arith.constant 0 : index
    %c0_210 = arith.constant 0 : index
    %278 = vector.load %arg14[%c0_209, %c0_210] : memref<256x64xbf16, #tpu.memory_space<vmem>>, vector<256x64xbf16>
    %cst_211 = arith.constant dense<0.000000e+00> : vector<8x64xf32>
    %279 = tpu.matmul %277, %278, %cst_211 {dimension_numbers = #tpu.dot_dimension_numbers<[1], [0], [0], [1], [0, 0, 1, 1], [], []>} : vector<8x256xbf16>, vector<256x64xbf16>, vector<8x64xf32> -> vector<8x64xf32>
    %c0_212 = arith.constant 0 : index
    %c0_213 = arith.constant 0 : index
    %280 = vector.load %arg15[%c0_212, %c0_213] : memref<1x64xf32, #tpu.memory_space<vmem>>, vector<1x64xf32>
    %281 = vector.broadcast %280 : vector<1x64xf32> to vector<8x64xf32>
    %282 = arith.addf %279, %281 : vector<8x64xf32>
    %cst_214 = arith.constant 0.000000e+00 : f32
    %283 = vector.broadcast %cst_214 : f32 to vector<8x64xf32>
    %284 = arith.maximumf %282, %283 : vector<8x64xf32>
    %285 = arith.truncf %284 : vector<8x64xf32> to vector<8x64xbf16>
    %c0_215 = arith.constant 0 : index
    %c0_216 = arith.constant 0 : index
    %286 = vector.load %arg16[%c0_215, %c0_216] : memref<1x64xbf16, #tpu.memory_space<vmem>>, vector<1x64xbf16>
    %cst_217 = arith.constant dense<0.000000e+00> : vector<1x8xf32>
    %287 = tpu.matmul %286, %285, %cst_217 {dimension_numbers = #tpu.dot_dimension_numbers<[1], [1], [0], [0], [0, 0, 1, 0], [], []>} : vector<1x64xbf16>, vector<8x64xbf16>, vector<1x8xf32> -> vector<1x8xf32>
    %c0_218 = arith.constant 0 : index
    %c0_219 = arith.constant 0 : index
    %288 = vector.load %arg17[%c0_218, %c0_219] : memref<1x1xf32, #tpu.memory_space<vmem>>, vector<1x1xf32>
    %289 = vector.broadcast %288 : vector<1x1xf32> to vector<1x8xf32>
    %290 = arith.addf %287, %289 : vector<1x8xf32>
    %291 = vector.shape_cast %290 : vector<1x8xf32> to vector<1x1x8xf32>
    %c0_220 = arith.constant 0 : index
    %c0_221 = arith.constant 0 : index
    %c0_222 = arith.constant 0 : index
    %292 = vector.load %arg18[%c0_220, %c0_221, %c0_222] : memref<1x1x8xf32, #tpu.memory_space<vmem>>, vector<1x1x8xf32>
    tpu.vector_store %arg18[%c0_220, %c0_221, %c0_222], %291 {strides = array<i32>} : memref<1x1x8xf32, #tpu.memory_space<vmem>>, vector<1x1x8xf32>,
    return
  }
  func.func @transform_0(%arg0: i32) -> (i32, i32, i32) {
    %c0_i32 = arith.constant 0 : i32
    %c0_i32_0 = arith.constant 0 : i32
    %c0_i32_1 = arith.constant 0 : i32
    return %c0_i32, %arg0, %c0_i32_0 : i32, i32, i32
  }
  func.func @transform_1(%arg0: i32) -> (i32, i32) {
    %c0_i32 = arith.constant 0 : i32
    %c0_i32_0 = arith.constant 0 : i32
    return %arg0, %c0_i32 : i32, i32
  }
  func.func @transform_2(%arg0: i32) -> (i32, i32) {
    %c0_i32 = arith.constant 0 : i32
    %c0_i32_0 = arith.constant 0 : i32
    %c0_i32_1 = arith.constant 0 : i32
    return %c0_i32, %c0_i32_0 : i32, i32
  }
  func.func @transform_3(%arg0: i32) -> (i32, i32) {
    %c0_i32 = arith.constant 0 : i32
    %c0_i32_0 = arith.constant 0 : i32
    %c0_i32_1 = arith.constant 0 : i32
    return %c0_i32, %c0_i32_0 : i32, i32
  }
  func.func @transform_4(%arg0: i32) -> (i32, i32) {
    %c0_i32 = arith.constant 0 : i32
    %c0_i32_0 = arith.constant 0 : i32
    %c0_i32_1 = arith.constant 0 : i32
    return %c0_i32, %c0_i32_0 : i32, i32
  }
  func.func @transform_5(%arg0: i32) -> (i32, i32) {
    %c0_i32 = arith.constant 0 : i32
    %c0_i32_0 = arith.constant 0 : i32
    %c0_i32_1 = arith.constant 0 : i32
    return %c0_i32, %c0_i32_0 : i32, i32
  }
  func.func @transform_6(%arg0: i32) -> (i32, i32) {
    %c0_i32 = arith.constant 0 : i32
    %c0_i32_0 = arith.constant 0 : i32
    %c0_i32_1 = arith.constant 0 : i32
    return %c0_i32, %c0_i32_0 : i32, i32
  }
  func.func @transform_7(%arg0: i32) -> (i32, i32) {
    %c0_i32 = arith.constant 0 : i32
    %c0_i32_0 = arith.constant 0 : i32
    %c0_i32_1 = arith.constant 0 : i32
    return %c0_i32, %c0_i32_0 : i32, i32
  }
  func.func @transform_8(%arg0: i32) -> (i32, i32) {
    %c0_i32 = arith.constant 0 : i32
    %c0_i32_0 = arith.constant 0 : i32
    %c0_i32_1 = arith.constant 0 : i32
    return %c0_i32, %c0_i32_0 : i32, i32
  }
  func.func @transform_9(%arg0: i32) -> (i32, i32) {
    %c0_i32 = arith.constant 0 : i32
    %c0_i32_0 = arith.constant 0 : i32
    %c0_i32_1 = arith.constant 0 : i32
    return %c0_i32, %c0_i32_0 : i32, i32
  }
  func.func @transform_10(%arg0: i32) -> (i32, i32) {
    %c0_i32 = arith.constant 0 : i32
    %c0_i32_0 = arith.constant 0 : i32
    %c0_i32_1 = arith.constant 0 : i32
    return %c0_i32, %c0_i32_0 : i32, i32
  }
  func.func @transform_11(%arg0: i32) -> (i32, i32) {
    %c0_i32 = arith.constant 0 : i32
    %c0_i32_0 = arith.constant 0 : i32
    %c0_i32_1 = arith.constant 0 : i32
    return %c0_i32, %c0_i32_0 : i32, i32
  }
  func.func @transform_12(%arg0: i32) -> (i32, i32) {
    %c0_i32 = arith.constant 0 : i32
    %c0_i32_0 = arith.constant 0 : i32
    %c0_i32_1 = arith.constant 0 : i32
    return %c0_i32, %c0_i32_0 : i32, i32
  }
  func.func @transform_13(%arg0: i32) -> (i32, i32) {
    %c0_i32 = arith.constant 0 : i32
    %c0_i32_0 = arith.constant 0 : i32
    %c0_i32_1 = arith.constant 0 : i32
    return %c0_i32, %c0_i32_0 : i32, i32
  }
  func.func @transform_14(%arg0: i32) -> (i32, i32) {
    %c0_i32 = arith.constant 0 : i32
    %c0_i32_0 = arith.constant 0 : i32
    %c0_i32_1 = arith.constant 0 : i32
    return %c0_i32, %c0_i32_0 : i32, i32
  }
  func.func @transform_15(%arg0: i32) -> (i32, i32) {
    %c0_i32 = arith.constant 0 : i32
    %c0_i32_0 = arith.constant 0 : i32
    %c0_i32_1 = arith.constant 0 : i32
    return %c0_i32, %c0_i32_0 : i32, i32
  }
  func.func @transform_16(%arg0: i32) -> (i32, i32) {
    %c0_i32 = arith.constant 0 : i32
    %c0_i32_0 = arith.constant 0 : i32
    %c0_i32_1 = arith.constant 0 : i32
    return %c0_i32, %c0_i32_0 : i32, i32
  }
  func.func @transform_17(%arg0: i32) -> (i32, i32, i32) {
    %c0_i32 = arith.constant 0 : i32
    %c0_i32_0 = arith.constant 0 : i32
    %c0_i32_1 = arith.constant 0 : i32
    return %arg0, %c0_i32, %c0_i32_0 : i32, i32, i32
  }
}

</mosaic_0001>

<bundles_post_ra>
// kernel: qnetwork_forward.1
= control target key start
LH: loop header
LB: loop body
LE: loop exit
PB: predicated region body
PF: predicated region fallthrough
CT: control target
= control target key end

     0   :  { %v4817_v0 = vmov 0   ;;  %vm514_vm0 = vcmask 523264   ;;  %vm996_vm1 = vcmask 257024   ;;  %s4818_s22 = smov 32   ;;  %s4819_s19 = smov 64   ;;  %vm1004_vm2 = vcmask 519424   ;;  %s6494_s2 = inlined_call_operand.vmem [shape: bf16[192,32], index: 2, kind: input, shape index: {}]   ;;  %s6495_s0 = inlined_call_operand.vmem [shape: bf16[64,8,192], index: 0, kind: input, shape index: {}]   ;;  %s6496_s3 = inlined_call_operand.vmem [shape: f32[1,32], index: 3, kind: input, shape index: {}]   ;;  %s6497_s4 = inlined_call_operand.vmem [shape: bf16[512,64], index: 4, kind: input, shape index: {}]   ;;  %s6498_s5 = inlined_call_operand.vmem [shape: f32[1,64], index: 5, kind: input, shape index: {}]   ;;  %s6499_s6 = inlined_call_operand.vmem [shape: bf16[576,64], index: 6, kind: input, shape index: {}]   ;;  %s6500_s8 = inlined_call_operand.vmem [shape: bf16[64,256], index: 8, kind: input, shape index: {}]   ;;  %s6501_s10 = inlined_call_operand.vmem [shape: bf16[256,256], index: 10, kind: input, shape index: {}]   ;;  %s6502_s7 = inlined_call_operand.vmem [shape: f32[1,64], index: 7, kind: input, shape index: {}]   ;;  %s6503_s11 = inlined_call_operand.vmem [shape: bf16[8,256], index: 11, kind: input, shape index: {}]   ;;  %s6504_s1 = inlined_call_operand.vmem [shape: f32[8,8], index: 1, kind: input, shape index: {}]   ;;  %s6505_s13 = inlined_call_operand.vmem [shape: bf16[256,64], index: 13, kind: input, shape index: {}]   ;;  %s6506_s9 = inlined_call_operand.vmem [shape: f32[1,256], index: 9, kind: input, shape index: {}]   ;;  %s6507_s12 = inlined_call_operand.vmem [shape: f32[1,256], index: 12, kind: input, shape index: {}]   ;;  %s6508_s16 = inlined_call_operand.<no memory space> [shape: f32[1,1], index: 16, kind: input, shape index: {}]   ;;  %s6509_s14 = inlined_call_operand.vmem [shape: f32[1,64], index: 14, kind: input, shape index: {}]   ;;  %s6510_s15 = inlined_call_operand.vmem [shape: bf16[1,64], index: 15, kind: input, shape index: {}]   ;;  %s6511_s17 = inlined_call_operand.vmem [shape: f32[1,1,8], index: 17, kind: output, shape index: {}]  }
   0x1   :  { %6514 = sst [smem:[#allocation5_spill]] %s6494_s2  ;;  %611 = vmatprep.subr.bf16.mxu0 %v4817_v0  ;;  %4509 = vset.pattern.permute.xlu0 %v4817_v0  ;;  %v5133_v61 = vld [vmem:[%s6496_s3] ss:$0 sm:$0xff]  ;;  %s4820_s2 = smov 96   ;;  %vm1012_vm3 = vcmask 781824   ;;  %vm1019_vm4 = vcmask 1044224  }
   0x2   :  { %6515 = sst [smem:[#allocation6_spill]] %s6495_s0  ;;  %s6516_s26 = sld [smem:[#allocation5_spill]]  ;;  %vm1685_vm5 = vcmask 519168   ;;  %vm1824_vm6 = vcmask 1043968   ;;  %vm4822_vm7 = vmmov 0   ;;  %vm3133_vm8 = vcmask 1043456  }
   0x3   :  { %s6517_s20 = sld [smem:[#allocation6_spill]]  ;;  %vm3129_vm9 = vcmask 64512   ;;  %vm3634_vm10 = vcmask 57344  }
   0x8   :  { %v4510_v1 = vld [vmem:[%s6516_s26] sm:$0xff]   ;;  %v4511_v2 = vld [vmem:[%s6516_s26 + $0x8] sm:$0xff]   ;;  %v4512_v3 = vld [vmem:[%s6516_s26 + $0x10] sm:$0xff]  }
   0x9   :  { %612 = vmatpush1.bf16.msra.mxu0 %v4510_v1  ;;  %v4513_v4 = vld [vmem:[%s6516_s26 + $0x18] sm:$0xff]   ;;  %v4524_v5 = vld [vmem:[%s6517_s20 + $0x4] ss:$8 sps:$4 sm:$0xff]   ;;  %v4516_v8 = vld [vmem:[%s6516_s26 + $0x30] sm:$0xff]  }
   0xa   :  { %613 = vmatprep.subr.bf16.mxu0 %v4817_v0  ;;  %v4514_v6 = vld [vmem:[%s6516_s26 + $0x20] sm:$0xff]   ;;  %3717 = vmatprep.mubr.msk.bf16.mxu0 %vm514_vm0, %v4524_v5  ;;  %v4515_v7 = vld [vmem:[%s6516_s26 + $0x28] sm:$0xff]   ;;  %v4517_v9 = vld [vmem:[%s6516_s26 + $0x38] sm:$0xff]  }
   0xb   :  { %v4518_v10 = vld [vmem:[%s6516_s26 + $0x40] sm:$0xff]   ;;  %v4519_v11 = vld [vmem:[%s6516_s26 + $0x48] sm:$0xff]   ;;  %v4520_v12 = vld [vmem:[%s6516_s26 + $0x50] sm:$0xff]  }
   0xc   :  { %v4521_v13 = vld [vmem:[%s6516_s26 + $0x58] sm:$0xff]   ;;  %v4522_v14 = vld [vmem:[%s6517_s20] ss:$8 sps:$4 sm:$0xff]   ;;  %v4528_v17 = vld [vmem:[%s6517_s20 + $0x24] ss:$8 sps:$4 sm:$0xff]  }
   0xd   :  { %614 = vmatpush1.bf16.msra.mxu0 %v4511_v2  ;;  %v4525_v15 = vld [vmem:[%s6517_s20 + $0x14] ss:$8 sps:$4 sm:$0xff]   ;;  %v4527_v16 = vld [vmem:[%s6517_s20 + $0x10] ss:$8 sps:$4 sm:$0xff]   ;;  %v4530_v18 = vld [vmem:[%s6517_s20 + $0x20] ss:$8 sps:$4 sm:$0xff]  }
   0xe   :  { %615 = vmatprep.subr.bf16.mxu0 %v4817_v0  ;;  %v4531_v19 = vld [vmem:[%s6517_s20 + $0x34] ss:$8 sps:$4 sm:$0xff]   ;;  %v4533_v20 = vld [vmem:[%s6517_s20 + $0x30] ss:$8 sps:$4 sm:$0xff]   ;;  %v4534_v21 = vld [vmem:[%s6517_s20 + $0x44] ss:$8 sps:$4 sm:$0xff]  }
   0xf   :  { %v4536_v22 = vld [vmem:[%s6517_s20 + $0x40] ss:$8 sps:$4 sm:$0xff]   ;;  %v4537_v23 = vld [vmem:[%s6517_s20 + $0x54] ss:$8 sps:$4 sm:$0xff]   ;;  %v4539_v24 = vld [vmem:[%s6517_s20 + $0x50] ss:$8 sps:$4 sm:$0xff]  }
  0x10   :  { %v4540_v25 = vld [vmem:[%s6517_s20 + $0x64] ss:$8 sps:$4 sm:$0xff]   ;;  %v4542_v26 = vld [vmem:[%s6517_s20 + $0x60] ss:$8 sps:$4 sm:$0xff]   ;;  %v4543_v27 = vld [vmem:[%s6517_s20 + $0x74] ss:$8 sps:$4 sm:$0xff]  }
  0x11   :  { %616 = vmatpush1.bf16.msra.mxu0 %v4512_v3  ;;  %v4545_v28 = vld [vmem:[%s6517_s20 + $0x70] ss:$8 sps:$4 sm:$0xff]   ;;  %v4546_v29 = vld [vmem:[%s6517_s20 + $0x84] ss:$8 sps:$4 sm:$0xff]   ;;  %v4548_v30 = vld [vmem:[%s6517_s20 + $0x80] ss:$8 sps:$4 sm:$0xff]  }
  0x12   :  { %617 = vmatprep.subr.bf16.mxu0 %v4817_v0  ;;  %v4549_v31 = vld [vmem:[%s6517_s20 + $0x94] ss:$8 sps:$4 sm:$0xff]   ;;  %v4551_v32 = vld [vmem:[%s6517_s20 + $0x90] ss:$8 sps:$4 sm:$0xff]   ;;  %v4552_v33 = vld [vmem:[%s6517_s20 + $0xa4] ss:$8 sps:$4 sm:$0xff]  }
  0x13   :  { %v4554_v34 = vld [vmem:[%s6517_s20 + $0xa0] ss:$8 sps:$4 sm:$0xff]   ;;  %v4555_v35 = vld [vmem:[%s6517_s20 + $0xb4] ss:$8 sps:$4 sm:$0xff]   ;;  %v4557_v36 = vld [vmem:[%s6517_s20 + $0xb0] ss:$8 sps:$4 sm:$0xff]  }
  0x14   :  { %v4558_v37 = vld [vmem:[%s6517_s20 + $0xc4] ss:$8 sps:$4 sm:$0xff]   ;;  %v4560_v38 = vld [vmem:[%s6517_s20 + $0xc0] ss:$8 sps:$4 sm:$0xff]   ;;  %v4561_v39 = vld [vmem:[%s6517_s20 + $0xd4] ss:$8 sps:$4 sm:$0xff]  }
  0x15   :  { %618 = vmatpush1.bf16.msra.mxu0 %v4513_v4  ;;  %v4563_v40 = vld [vmem:[%s6517_s20 + $0xd0] ss:$8 sps:$4 sm:$0xff]   ;;  %v4564_v41 = vld [vmem:[%s6517_s20 + $0xe4] ss:$8 sps:$4 sm:$0xff]   ;;  %v4566_v42 = vld [vmem:[%s6517_s20 + $0xe0] ss:$8 sps:$4 sm:$0xff]  }
  0x16   :  { %619 = vmatprep.subr.bf16.mxu0 %v4817_v0  ;;  %v4567_v43 = vld [vmem:[%s6517_s20 + $0xf4] ss:$8 sps:$4 sm:$0xff]   ;;  %v4569_v44 = vld [vmem:[%s6517_s20 + $0xf0] ss:$8 sps:$4 sm:$0xff]   ;;  %v4570_v45 = vld [vmem:[%s6517_s20 + $0x104] ss:$8 sps:$4 sm:$0xff]  }
  0x17   :  { %v4572_v46 = vld [vmem:[%s6517_s20 + $0x100] ss:$8 sps:$4 sm:$0xff]   ;;  %v4573_v47 = vld [vmem:[%s6517_s20 + $0x114] ss:$8 sps:$4 sm:$0xff]   ;;  %v4575_v48 = vld [vmem:[%s6517_s20 + $0x110] ss:$8 sps:$4 sm:$0xff]  }
  0x18   :  { %v4576_v49 = vld [vmem:[%s6517_s20 + $0x124] ss:$8 sps:$4 sm:$0xff]   ;;  %v4578_v50 = vld [vmem:[%s6517_s20 + $0x120] ss:$8 sps:$4 sm:$0xff]   ;;  %v4579_v51 = vld [vmem:[%s6517_s20 + $0x134] ss:$8 sps:$4 sm:$0xff]  }
  0x19   :  { %620 = vmatpush1.bf16.msra.mxu0 %v4514_v6  ;;  %v4581_v52 = vld [vmem:[%s6517_s20 + $0x130] ss:$8 sps:$4 sm:$0xff]   ;;  %v4582_v53 = vld [vmem:[%s6517_s20 + $0x144] ss:$8 sps:$4 sm:$0xff]   ;;  %v4584_v54 = vld [vmem:[%s6517_s20 + $0x140] ss:$8 sps:$4 sm:$0xff]  }
  0x1a   :  { %621 = vmatprep.subr.bf16.mxu0 %v4817_v0  ;;  %v4585_v55 = vld [vmem:[%s6517_s20 + $0x154] ss:$8 sps:$4 sm:$0xff]   ;;  %v4587_v56 = vld [vmem:[%s6517_s20 + $0x150] ss:$8 sps:$4 sm:$0xff]   ;;  %v4588_v57 = vld [vmem:[%s6517_s20 + $0x164] ss:$8 sps:$4 sm:$0xff]  }
  0x1b   :  { %v4590_v58 = vld [vmem:[%s6517_s20 + $0x160] ss:$8 sps:$4 sm:$0xff]   ;;  %v4591_v59 = vld [vmem:[%s6517_s20 + $0x174] ss:$8 sps:$4 sm:$0xff]   ;;  %v4593_v60 = vld [vmem:[%s6517_s20 + $0x170] ss:$8 sps:$4 sm:$0xff]  }
  0x1d   :  { %622 = vmatpush1.bf16.msra.mxu0 %v4515_v7 }
  0x1e   :  { %623 = vmatprep.subr.bf16.mxu0 %v4817_v0 }
  0x21   :  { %624 = vmatpush1.bf16.msra.mxu0 %v4516_v8 }
  0x22   :  { %625 = vmatprep.subr.bf16.mxu0 %v4817_v0 }
  0x25   :  { %626 = vmatpush1.bf16.msra.mxu0 %v4517_v9 }
  0x26   :  { %627 = vmatprep.subr.bf16.mxu0 %v4817_v0 }
  0x29   :  { %628 = vmatpush1.bf16.msra.mxu0 %v4518_v10 }
  0x2a   :  { %629 = vmatprep.subr.bf16.mxu0 %v4817_v0 }
  0x2d   :  { %630 = vmatpush1.bf16.msra.mxu0 %v4519_v11 }
  0x2e   :  { %631 = vmatprep.subr.bf16.mxu0 %v4817_v0 }
  0x31   :  { %632 = vmatpush1.bf16.msra.mxu0 %v4520_v12 }
  0x32   :  { %633 = vmatprep.subr.bf16.mxu0 %v4817_v0 }
  0x35   :  { %634 = vmatpush1.bf16.msra.mxu0 %v4521_v13 }
  0x38   :  { %644 = vmatmul.mubr.bf16.vlgmr.msra.gmra.mrb[0].mxu0 %v4522_v14 }
  0x39   :  { %3718 = vmatprep.mubr.msk.bf16.mxu0 %vm514_vm0, %v4525_v15 }
  0x40   :  { %652 = vmatmul.mubr.bf16.gmra.mrb[4].mxu0 %v4527_v16  ;;  %v4594_v16 = vld [vmem:[%s6517_s20 + $0x184] ss:$8 sps:$4 sm:$0xff]  }
  0x41   :  { %3719 = vmatprep.mubr.msk.bf16.mxu0 %vm514_vm0, %v4528_v17  ;;  %v5147_v17 = vld [vmem:[%s6497_s4 + $0x40] sm:$0xff]  }
  0x42   :  { %4016 = vmatprep.subr.bf16.mxu1 %v5147_v17 }
  0x48   :  { %660 = vmatmul.mubr.bf16.gmra.mrb[8].mxu0 %v4530_v18  ;;  %v4597_v18 = vld [vmem:[%s6517_s20 + $0x180] ss:$8 sps:$4 sm:$0xff]  }
  0x49   :  { %3720 = vmatprep.mubr.msk.bf16.mxu0 %vm514_vm0, %v4531_v19 }
  0x50   :  { %668 = vmatmul.mubr.bf16.gmra.mrb[12].mxu0 %v4533_v20 }
  0x51   :  { %3721 = vmatprep.mubr.msk.bf16.mxu0 %vm514_vm0, %v4534_v21  ;;  %v5156_v21 = vld [vmem:[%s6497_s4] sm:$0xff]  }
  0x52   :  { %4017 = vmatpush3.bf16.msra.mxu1 %v5156_v21 }
  0x58   :  { %676 = vmatmul.mubr.bf16.gmra.mrb[16].mxu0 %v4536_v22  ;;  %v5162_v22 = vld [vmem:[%s6497_s4 + $0x48] sm:$0xff]  }
  0x59   :  { %3722 = vmatprep.mubr.msk.bf16.mxu0 %vm514_vm0, %v4537_v23  ;;  %v5169_v23 = vld [vmem:[%s6497_s4 + $0x8] sm:$0xff]   ;;  %4018 = vmatprep.subr.bf16.mxu1 %v5162_v22 }
  0x5a   :  { %4019 = vmatpush3.bf16.msra.mxu1 %v5169_v23 }
  0x60   :  { %684 = vmatmul.mubr.bf16.gmra.mrb[20].mxu0 %v4539_v24 }
  0x61   :  { %3723 = vmatprep.mubr.msk.bf16.mxu0 %vm514_vm0, %v4540_v25  ;;  %v4601_v25 = vld [vmem:[%s6517_s20 + $0x194] ss:$8 sps:$4 sm:$0xff]  }
  0x68   :  { %692 = vmatmul.mubr.bf16.gmra.mrb[24].mxu0 %v4542_v26  ;;  %v5178_v26 = vld [vmem:[%s6497_s4 + $0x50] sm:$0xff]  }
  0x69   :  { %3724 = vmatprep.mubr.msk.bf16.mxu0 %vm514_vm0, %v4543_v27  ;;  %4020 = vmatprep.subr.bf16.mxu1 %v5178_v26 }
  0x70   :  { %700 = vmatmul.mubr.bf16.gmra.mrb[28].mxu0 %v4545_v28 }
  0x71   :  { %3725 = vmatprep.mubr.msk.bf16.mxu0 %vm514_vm0, %v4546_v29 }
  0x78   :  { %708 = vmatmul.mubr.bf16.gmra.mrb[32].mxu0 %v4548_v30  ;;  %v4604_v30 = vld [vmem:[%s6517_s20 + $0x190] ss:$8 sps:$4 sm:$0xff]  }
  0x79   :  { %3726 = vmatprep.mubr.msk.bf16.mxu0 %vm514_vm0, %v4549_v31 }
  0x80   :  { %716 = vmatmul.mubr.bf16.gmra.mrb[36].mxu0 %v4551_v32 }
  0x81   :  { %3727 = vmatprep.mubr.msk.bf16.mxu0 %vm514_vm0, %v4552_v33 }
  0x88   :  { %724 = vmatmul.mubr.bf16.gmra.mrb[40].mxu0 %v4554_v34  ;;  %v5191_v34 = vld [vmem:[%s6497_s4 + $0x10] sm:$0xff]  }
  0x89   :  { %3728 = vmatprep.mubr.msk.bf16.mxu0 %vm514_vm0, %v4555_v35  ;;  %4021 = vmatpush3.bf16.msra.mxu1 %v5191_v34 }
  0x90   :  { %732 = vmatmul.mubr.bf16.gmra.mrb[44].mxu0 %v4557_v36  ;;  %v5197_v36 = vld [vmem:[%s6497_s4 + $0x58] sm:$0xff]  }
  0x91   :  { %3729 = vmatprep.mubr.msk.bf16.mxu0 %vm514_vm0, %v4558_v37  ;;  %4022 = vmatprep.subr.bf16.mxu1 %v5197_v36 }
  0x98   :  { %740 = vmatmul.mubr.bf16.gmra.mrb[48].mxu0 %v4560_v38  ;;  %v5202_v38 = vld [vmem:[%s6497_s4 + $0x18] sm:$0xff]  }
  0x99   :  { %3730 = vmatprep.mubr.msk.bf16.mxu0 %vm514_vm0, %v4561_v39  ;;  %4023 = vmatpush3.bf16.msra.mxu1 %v5202_v38 }
  0xa0   :  { %748 = vmatmul.mubr.bf16.gmra.mrb[52].mxu0 %v4563_v40 }
  0xa1   :  { %3731 = vmatprep.mubr.msk.bf16.mxu0 %vm514_vm0, %v4564_v41 }
  0xa8   :  { %756 = vmatmul.mubr.bf16.gmra.mrb[56].mxu0 %v4566_v42 }
  0xa9   :  { %3732 = vmatprep.mubr.msk.bf16.mxu0 %vm514_vm0, %v4567_v43 }
  0xb0   :  { %764 = vmatmul.mubr.bf16.gmra.mrb[60].mxu0 %v4569_v44 }
  0xb1   :  { %3733 = vmatprep.mubr.msk.bf16.mxu0 %vm514_vm0, %v4570_v45  ;;  %v4608_v45 = vld [vmem:[%s6517_s20 + $0x1a4] ss:$8 sps:$4 sm:$0xff]  }
  0xb8   :  { %772 = vmatmul.mubr.bf16.gmra.mrb[64].mxu0 %v4572_v46  ;;  %v5215_v46 = vld [vmem:[%s6497_s4 + $0x60] sm:$0xff]  }
  0xb9   :  { %3734 = vmatprep.mubr.msk.bf16.mxu0 %vm514_vm0, %v4573_v47  ;;  %v4611_v47 = vld [vmem:[%s6517_s20 + $0x1a0] ss:$8 sps:$4 sm:$0xff]   ;;  %4024 = vmatprep.subr.bf16.mxu1 %v5215_v46 }
  0xc0   :  { %780 = vmatmul.mubr.bf16.gmra.mrb[68].mxu0 %v4575_v48  ;;  %v5223_v48 = vld [vmem:[%s6497_s4 + $0x20] sm:$0xff]  }
  0xc1   :  { %3735 = vmatprep.mubr.msk.bf16.mxu0 %vm514_vm0, %v4576_v49  ;;  %v5228_v49 = vld [vmem:[%s6497_s4 + $0x68] sm:$0xff]   ;;  %4025 = vmatpush3.bf16.msra.mxu1 %v5223_v48 }
  0xc2   :  { %4026 = vmatprep.subr.bf16.mxu1 %v5228_v49 }
  0xc8   :  { %788 = vmatmul.mubr.bf16.gmra.mrb[72].mxu0 %v4578_v50 }
  0xc9   :  { %3736 = vmatprep.mubr.msk.bf16.mxu0 %vm514_vm0, %v4579_v51  ;;  %v5237_v51 = vld [vmem:[%s6497_s4 + $0x28] sm:$0xff]  }
  0xca   :  { %4027 = vmatpush3.bf16.msra.mxu1 %v5237_v51 }
  0xd0   :  { %796 = vmatmul.mubr.bf16.gmra.mrb[76].mxu0 %v4581_v52 }
  0xd1   :  { %3737 = vmatprep.mubr.msk.bf16.mxu0 %vm514_vm0, %v4582_v53 }
  0xd8   :  { %804 = vmatmul.mubr.bf16.gmra.mrb[80].mxu0 %v4584_v54 }
  0xd9   :  { %3738 = vmatprep.mubr.msk.bf16.mxu0 %vm514_vm0, %v4585_v55 }
  0xe0   :  { %812 = vmatmul.mubr.bf16.gmra.mrb[84].mxu0 %v4587_v56 }
  0xe1   :  { %3739 = vmatprep.mubr.msk.bf16.mxu0 %vm514_vm0, %v4588_v57  ;;  %v113_v57 = vld [vmem:[%s6517_s20 + $0x1b0] sm:$0xff] }
  0xe8   :  { %820 = vmatmul.mubr.bf16.gmra.mrb[88].mxu0 %v4590_v58  ;;  %v114_v58 = vld [vmem:[%s6517_s20 + $0x1b8] sm:$0xff] }
  0xe9   :  { %3740 = vmatprep.mubr.msk.bf16.mxu0 %vm514_vm0, %v4591_v59  ;;  %v4615_v59 = vld [vmem:[%s6517_s20 + $0x1b4] ss:$8 sps:$4 sm:$0xff]  }
  0xf0   :  { %828 = vmatmul.mubr.bf16.gmra.mrb[92].mxu0 %v4593_v60  ;;  %v5254_v60 = vld [vmem:[%s6497_s4 + $0x70] sm:$0xff]  }
  0xf1   :  { %3741 = vmatprep.mubr.msk.bf16.mxu0 %vm514_vm0, %v4594_v16  ;;  %4028 = vmatprep.subr.bf16.mxu1 %v5254_v60  ;;  %v4623_v16 = vld [vmem:[%s6517_s20 + $0x1c0] ss:$8 sps:$4 sm:$0xff]  }
  0xf8   :  { %836 = vmatmul.mubr.bf16.gmra.mrb[96].mxu0 %v4597_v18 }
  0xf9   :  { %3742 = vmatprep.mubr.msk.bf16.mxu0 %vm514_vm0, %v4601_v25 }
 0x100   :  { %844 = vmatmul.mubr.bf16.gmra.mrb[100].mxu0 %v4604_v30 }
 0x101   :  { %3743 = vmatprep.mubr.msk.bf16.mxu0 %vm514_vm0, %v4608_v45 }
 0x108   :  { %852 = vmatmul.mubr.bf16.gmra.mrb[104].mxu0 %v4611_v47 }
 0x109   :  { %3744 = vmatprep.mubr.msk.bf16.mxu0 %vm514_vm0, %v4615_v59  ;;  %v4628_v59 = vld [vmem:[%s6517_s20 + $0x1e0] ss:$8 sps:$4 sm:$0xff]  }
 0x10b   :  { %v645_v62 = vpop.f32.mrb[0].mxu0 }
 0x10c   :  { %v646_v63 = vadd.f32 %v5133_v61, %v645_v62  ;;  %v647_v1 = vpop.f32.mrb[1].mxu0  ;;  %v3695_v62 = vcombine.low %v113_v57, %v114_v58  ;;  %v4626_v58 = vld [vmem:[%s6517_s20 + $0x1e4] ss:$8 sps:$4 sm:$0xff]  }
 0x10d   :  { %v648_v2 = vpop.f32.mrb[2].mxu0 }
 0x10e   :  { %v649_v3 = vadd.f32 %v5133_v61, %v648_v2  ;;  %v650_v4 = vpop.f32.mrb[3].mxu0  ;;  %v900_v5 = vmax.f32 %v646_v63, 0.0  ;;  %v5259_v63 = vld [vmem:[%s6497_s4 + $0x30] sm:$0xff]  }
 0x10f   :  { %4029 = vmatpush3.bf16.msra.mxu1 %v5259_v63 }
 0x110   :  { %v901_v6 = vmax.f32 %v649_v3, 0.0  ;;  %860 = vmatmul.mubr.bf16.gmra.mrb[108].mxu0 %v3695_v62  ;;  %v5266_v3 = vld [vmem:[%s6497_s4 + $0x78] sm:$0xff]  }
 0x111   :  { %4030 = vmatprep.subr.bf16.mxu1 %v5266_v3 }
 0x112   :  { %v964_v7 = vpack.c.bf16 %v901_v6, %v900_v5  ;;  %v3964_v8 = vpack.c.bf16 %v901_v6, %v901_v6 }
 0x113   :  { %v653_v9 = vpop.f32.mrb[4].mxu0 }
 0x114   :  { %v654_v10 = vadd.f32 %v5133_v61, %v653_v9  ;;  %v655_v11 = vpop.f32.mrb[5].mxu0  ;;  %1001 = vrot.lane.b32.xlu0 %v3964_v8, %s4818_s22  ;;  %997 = vst.msk [vmem:[#allocation2] sm:$0xf] %vm996_vm1, %v964_v7  ;;  %v5273_v7 = vld [vmem:[%s6497_s4 + $0x38] sm:$0xff]  }
 0x115   :  { %v656_v12 = vpop.f32.mrb[6].mxu0  ;;  %4031 = vmatpush3.bf16.msra.mxu1 %v5273_v7 }
 0x116   :  { %v902_v13 = vmax.f32 %v654_v10, 0.0  ;;  %v657_v14 = vadd.f32 %v5133_v61, %v656_v12  ;;  %v658_v15 = vpop.f32.mrb[7].mxu0 }
 0x117   :  { %v4621_v15 = vld [vmem:[%s6517_s20 + $0x1c4] ss:$8 sps:$4 sm:$0xff]  }
 0x118   :  { %v903_v19 = vmax.f32 %v657_v14, 0.0  ;;  %v3965_v20 = vpack.c.bf16 %v902_v13, %v902_v13  ;;  %3745 = vmatprep.mubr.msk.bf16.mxu0 %vm514_vm0, %v4621_v15 }
 0x119   :  { %868 = vmatmul.mubr.bf16.gmra.mrb[112].mxu0 %v4623_v16 }
 0x11a   :  { %1009 = vrot.lane.b32.xlu1 %v3965_v20, %s4819_s19  ;;  %v3966_v27 = vpack.c.bf16 %v903_v19, %v903_v19 }
 0x11b   :  { %v661_v24 = vpop.f32.mrb[8].mxu0 }
 0x11c   :  { %v662_v28 = vadd.f32 %v5133_v61, %v661_v24  ;;  %v663_v29 = vpop.f32.mrb[9].mxu0 }
 0x11d   :  { %v664_v31 = vpop.f32.mrb[10].mxu0 }
 0x11e   :  { %v665_v32 = vadd.f32 %v5133_v61, %v664_v31  ;;  %v666_v33 = vpop.f32.mrb[11].mxu0  ;;  %1016 = vrot.lane.b32.xlu1 %v3966_v27, %s4820_s2  ;;  %v904_v35 = vmax.f32 %v662_v28, 0.0 }
 0x11f   :  { %v117_v33 = vld [vmem:[%s6517_s20 + $0x1d0] sm:$0xff] }
 0x120   :  { %v905_v37 = vmax.f32 %v665_v32, 0.0 }
 0x122   :  { %v966_v39 = vpack.c.bf16 %v905_v37, %v904_v35  ;;  %v3967_v40 = vpack.c.bf16 %v905_v37, %v905_v37  ;;  %v118_v35 = vld [vmem:[%s6517_s20 + $0x1d8] sm:$0xff] }
 0x123   :  { %v669_v41 = vpop.f32.mrb[12].mxu0  ;;  %v4624_v37 = vld [vmem:[%s6517_s20 + $0x1d4] ss:$8 sps:$4 sm:$0xff]  }
 0x124   :  { %v671_v42 = vpop.f32.mrb[13].mxu0  ;;  %1025 = vrot.lane.b32.xlu1 %v3967_v40, %s4818_s22  ;;  %1021 = vst.msk [vmem:[#allocation2 + $0x4] sm:$0xf] %vm996_vm1, %v966_v39  ;;  %v670_v8 = vadd.f32 %v5133_v61, %v669_v41  ;;  %3746 = vmatprep.mubr.msk.bf16.mxu0 %vm514_vm0, %v4624_v37  ;;  %v3699_v41 = vcombine.low %v117_v33, %v118_v35 }
 0x125   :  { %v672_v43 = vpop.f32.mrb[14].mxu0 }
 0x126   :  { %v674_v44 = vpop.f32.mrb[15].mxu0  ;;  %v906_v18 = vmax.f32 %v670_v8, 0.0  ;;  %v673_v19 = vadd.f32 %v5133_v61, %v672_v43  ;;  %876 = vmatmul.mubr.bf16.gmra.mrb[116].mxu0 %v3699_v41 }
 0x127   :  { %3747 = vmatprep.mubr.msk.bf16.mxu0 %vm514_vm0, %v4626_v58  ;;  %v5378_v58 = vld [vmem:[%s6497_s4 + $0xd8] sm:$0xff]  }
 0x128   :  { %v3968_v28 = vpack.c.bf16 %v906_v18, %v906_v18  ;;  %v907_v29 = vmax.f32 %v673_v19, 0.0 }
 0x12a   :  { %v3969_v42 = vpack.c.bf16 %v907_v29, %v907_v29  ;;  %v5334_v29 = vld [vmem:[%s6497_s4 + $0xc0] sm:$0xff]  }
 0x12b   :  { %v677_v50 = vpop.f32.mrb[16].mxu0  ;;  %4038 = vmatprep.subr.bf16.mxu1 %v5334_v29  ;;  %4214 = vmatprep.subr.bf16.mxu0 %v5334_v29 }
 0x12c   :  { %v678_v52 = vadd.f32 %v5133_v61, %v677_v50  ;;  %v679_v53 = vpop.f32.mrb[17].mxu0 }
 0x12d   :  { %v680_v54 = vpop.f32.mrb[18].mxu0 }
 0x12e   :  { %v681_v55 = vadd.f32 %v5133_v61, %v680_v54  ;;  %v682_v56 = vpop.f32.mrb[19].mxu0  ;;  %v908_v1 = vmax.f32 %v678_v52, 0.0  ;;  %884 = vmatmul.mubr.bf16.gmra.mrb[120].mxu0 %v4628_v59 }
 0x130   :  { %v909_v2 = vmax.f32 %v681_v55, 0.0 }
 0x132   :  { %v968_v4 = vpack.c.bf16 %v909_v2, %v908_v1  ;;  %v3970_v5 = vpack.c.bf16 %v909_v2, %v909_v2 }
 0x133   :  { %v685_v6 = vpop.f32.mrb[20].mxu0 }
 0x134   :  { %v686_v9 = vadd.f32 %v5133_v61, %v685_v6  ;;  %v687_v10 = vpop.f32.mrb[21].mxu0  ;;  %1046 = vrot.lane.b32.xlu0 %v3970_v5, %s4818_s22  ;;  %1042 = vst.msk [vmem:[#allocation2 + $0x8] sm:$0xf] %vm996_vm1, %v968_v4 }
 0x135   :  { %v688_v11 = vpop.f32.mrb[22].mxu0 }
 0x136   :  { %v910_v12 = vmax.f32 %v686_v9, 0.0  ;;  %v689_v13 = vadd.f32 %v5133_v61, %v688_v11  ;;  %v690_v14 = vpop.f32.mrb[23].mxu0 }
 0x137   :  { %v4635_v14 = vld [vmem:[%s6517_s20 + $0x1f0] ss:$8 sps:$4 sm:$0xff]  }
 0x138   :  { %v3971_v20 = vpack.c.bf16 %v910_v12, %v910_v12  ;;  %v911_v24 = vmax.f32 %v689_v13, 0.0  ;;  %v4633_v13 = vld [vmem:[%s6517_s20 + $0x1f4] ss:$8 sps:$4 sm:$0xff]  }
 0x139   :  { %3748 = vmatprep.mubr.msk.bf16.mxu0 %vm514_vm0, %v4633_v13 }
 0x13a   :  { %v3972_v25 = vpack.c.bf16 %v911_v24, %v911_v24  ;;  %1053 = vrot.lane.b32.xlu1 %v3971_v20, %s4819_s19  ;;  %892 = vmatmul.mubr.bf16.gmra.mrb[124].mxu0 %v4635_v14  ;;  %v5405_v14 = vld [vmem:[%s6497_s4 + $0xe8] sm:$0xff]  }
 0x13b   :  { %v693_v27 = vpop.f32.mrb[24].mxu0 }
 0x13c   :  { %v694_v30 = vadd.f32 %v5133_v61, %v693_v27  ;;  %v695_v31 = vpop.f32.mrb[25].mxu0  ;;  %1059 = vrot.lane.b32.xlu0 %v3972_v25, %s4820_s2 }
 0x13d   :  { %v696_v32 = vpop.f32.mrb[26].mxu0 }
 0x13e   :  { %v697_v39 = vadd.f32 %v5133_v61, %v696_v32  ;;  %v698_v40 = vpop.f32.mrb[27].mxu0  ;;  %1032 = vrot.lane.b32.xlu1 %v3968_v28, %s4819_s19  ;;  %v912_v43 = vmax.f32 %v694_v30, 0.0  ;;  %v5339_v32 = vld [vmem:[%s6497_s4 + $0x80] sm:$0xff]  }
 0x13f   :  { %4215 = vmatpush3.bf16.msra.mxu0 %v5339_v32  ;;  %v5349_v40 = vld [vmem:[%s6497_s4 + $0xc8] sm:$0xff]  }
 0x140   :  { %v913_v44 = vmax.f32 %v697_v39, 0.0  ;;  %4216 = vmatprep.subr.bf16.mxu0 %v5349_v40 }
 0x142   :  { %v970_v45 = vpack.c.bf16 %v913_v44, %v912_v43  ;;  %v3973_v47 = vpack.c.bf16 %v913_v44, %v913_v44  ;;  %1038 = vrot.lane.b32.xlu1 %v3969_v42, %s4820_s2  ;;  %v5354_v42 = vld [vmem:[%s6497_s4 + $0x88] sm:$0xff]  }
 0x143   :  { %v701_v50 = vpop.f32.mrb[28].mxu0  ;;  %4217 = vmatpush3.bf16.msra.mxu0 %v5354_v42 }
 0x144   :  { %v702_v52 = vadd.f32 %v5133_v61, %v701_v50  ;;  %v703_v53 = vpop.f32.mrb[29].mxu0  ;;  %1067 = vrot.lane.b32.xlu0 %v3973_v47, %s4818_s22  ;;  %1063 = vst.msk [vmem:[#allocation2 + $0xc] sm:$0xf] %vm996_vm1, %v970_v45  ;;  %v5363_v50 = vld [vmem:[%s6497_s4 + $0xd0] sm:$0xff]  }
 0x145   :  { %v704_v54 = vpop.f32.mrb[30].mxu0  ;;  %4218 = vmatprep.subr.bf16.mxu0 %v5363_v50 }
 0x146   :  { %v914_v55 = vmax.f32 %v702_v52, 0.0  ;;  %v705_v56 = vadd.f32 %v5133_v61, %v704_v54  ;;  %v706_v57 = vpop.f32.mrb[31].mxu0  ;;  %v5368_v52 = vld [vmem:[%s6497_s4 + $0x90] sm:$0xff]  }
 0x147   :  { %4219 = vmatpush3.bf16.msra.mxu0 %v5368_v52 }
 0x148   :  { %v3974_v62 = vpack.c.bf16 %v914_v55, %v914_v55  ;;  %v915_v1 = vmax.f32 %v705_v56, 0.0  ;;  %4220 = vmatprep.subr.bf16.mxu0 %v5378_v58 }
 0x14a   :  { %1074 = vrot.lane.b32.xlu0 %v3974_v62, %s4819_s19  ;;  %v3975_v4 = vpack.c.bf16 %v915_v1, %v915_v1  ;;  %v5383_v62 = vld [vmem:[%s6497_s4 + $0x98] sm:$0xff]  }
 0x14b   :  { %v709_v2 = vpop.f32.mrb[32].mxu0  ;;  %4221 = vmatpush3.bf16.msra.mxu0 %v5383_v62 }
 0x14c   :  { %v710_v5 = vadd.f32 %v5133_v61, %v709_v2  ;;  %v711_v6 = vpop.f32.mrb[33].mxu0 }
 0x14d   :  { %v712_v8 = vpop.f32.mrb[34].mxu0 }
 0x14e   :  { %v713_v9 = vadd.f32 %v5133_v61, %v712_v8  ;;  %v714_v10 = vpop.f32.mrb[35].mxu0  ;;  %1080 = vrot.lane.b32.xlu0 %v3975_v4, %s4820_s2  ;;  %v916_v11 = vmax.f32 %v710_v5, 0.0  ;;  %v5390_v5 = vld [vmem:[%s6497_s4 + $0xe0] sm:$0xff]  }
 0x14f   :  { %4222 = vmatprep.subr.bf16.mxu0 %v5390_v5 }
 0x150   :  { %v917_v12 = vmax.f32 %v713_v9, 0.0  ;;  %v5396_v9 = vld [vmem:[%s6497_s4 + $0xa0] sm:$0xff]  }
 0x151   :  { %4223 = vmatpush3.bf16.msra.mxu0 %v5396_v9 }
 0x152   :  { %v972_v15 = vpack.c.bf16 %v917_v12, %v916_v11  ;;  %v3976_v16 = vpack.c.bf16 %v917_v12, %v917_v12  ;;  %4224 = vmatprep.subr.bf16.mxu0 %v5405_v14 }
 0x153   :  { %v717_v18 = vpop.f32.mrb[36].mxu0 }
 0x154   :  { %v718_v19 = vadd.f32 %v5133_v61, %v717_v18  ;;  %v719_v20 = vpop.f32.mrb[37].mxu0  ;;  %1088 = vrot.lane.b32.xlu1 %v3976_v16, %s4818_s22  ;;  %1084 = vst.msk [vmem:[#allocation2 + $0x10] sm:$0xf] %vm996_vm1, %v972_v15  ;;  %v5410_v16 = vld [vmem:[%s6497_s4 + $0xa8] sm:$0xff]  }
 0x155   :  { %v720_v24 = vpop.f32.mrb[38].mxu0  ;;  %4225 = vmatpush3.bf16.msra.mxu0 %v5410_v16 }
 0x156   :  { %v918_v25 = vmax.f32 %v718_v19, 0.0  ;;  %v721_v27 = vadd.f32 %v5133_v61, %v720_v24  ;;  %v722_v28 = vpop.f32.mrb[39].mxu0 }
 0x158   :  { %v3977_v30 = vpack.c.bf16 %v918_v25, %v918_v25  ;;  %v919_v31 = vmax.f32 %v721_v27, 0.0  ;;  %v5419_v25 = vld [vmem:[%s6497_s4 + $0xf0] sm:$0xff]  }
 0x159   :  { %v5424_v27 = vld [vmem:[%s6497_s4 + $0xb0] sm:$0xff]   ;;  %4226 = vmatprep.subr.bf16.mxu0 %v5419_v25 }
 0x15a   :  { %1095 = vrot.lane.b32.xlu1 %v3977_v30, %s4819_s19  ;;  %v3978_v35 = vpack.c.bf16 %v919_v31, %v919_v31  ;;  %4227 = vmatpush3.bf16.msra.mxu0 %v5424_v27 }
 0x15b   :  { %v725_v33 = vpop.f32.mrb[40].mxu0 }
 0x15c   :  { %v726_v37 = vadd.f32 %v5133_v61, %v725_v33  ;;  %v727_v39 = vpop.f32.mrb[41].mxu0 }
 0x15d   :  { %v728_v41 = vpop.f32.mrb[42].mxu0 }
 0x15e   :  { %v729_v43 = vadd.f32 %v5133_v61, %v728_v41  ;;  %v730_v44 = vpop.f32.mrb[43].mxu0  ;;  %1101 = vrot.lane.b32.xlu1 %v3978_v35, %s4820_s2  ;;  %v920_v45 = vmax.f32 %v726_v37, 0.0  ;;  %v5434_v37 = vld [vmem:[%s6497_s4 + $0xf8] sm:$0xff]  }
 0x15f   :  { %v5439_v41 = vld [vmem:[%s6497_s4 + $0xb8] sm:$0xff]   ;;  %4228 = vmatprep.subr.bf16.mxu0 %v5434_v37 }
 0x160   :  { %v921_v47 = vmax.f32 %v729_v43, 0.0  ;;  %4229 = vmatpush3.bf16.msra.mxu0 %v5439_v41 }
 0x161   :  { %4258 = vmatprep.subr.bf16.mxu0 %v5334_v29 }
 0x162   :  { %v974_v53 = vpack.c.bf16 %v921_v47, %v920_v45  ;;  %v3979_v54 = vpack.c.bf16 %v921_v47, %v921_v47 }
 0x163   :  { %v733_v55 = vpop.f32.mrb[44].mxu0 }
 0x164   :  { %v734_v56 = vadd.f32 %v5133_v61, %v733_v55  ;;  %v735_v57 = vpop.f32.mrb[45].mxu0  ;;  %1109 = vrot.lane.b32.xlu1 %v3979_v54, %s4818_s22  ;;  %1105 = vst.msk [vmem:[#allocation2 + $0x14] sm:$0xf] %vm996_vm1, %v974_v53 }
 0x165   :  { %v736_v59 = vpop.f32.mrb[46].mxu0 }
 0x166   :  { %v922_v1 = vmax.f32 %v734_v56, 0.0  ;;  %v737_v2 = vadd.f32 %v5133_v61, %v736_v59  ;;  %v738_v4 = vpop.f32.mrb[47].mxu0 }
 0x168   :  { %v3980_v6 = vpack.c.bf16 %v922_v1, %v922_v1  ;;  %v923_v8 = vmax.f32 %v737_v2, 0.0 }
 0x16a   :  { %1116 = vrot.lane.b32.xlu1 %v3980_v6, %s4819_s19  ;;  %v3981_v11 = vpack.c.bf16 %v923_v8, %v923_v8 }
 0x16b   :  { %v741_v10 = vpop.f32.mrb[48].mxu0 }
 0x16c   :  { %v742_v12 = vadd.f32 %v5133_v61, %v741_v10  ;;  %v743_v13 = vpop.f32.mrb[49].mxu0 }
 0x16d   :  { %v744_v15 = vpop.f32.mrb[50].mxu0 }
 0x16e   :  { %v745_v18 = vadd.f32 %v5133_v61, %v744_v15  ;;  %v746_v19 = vpop.f32.mrb[51].mxu0  ;;  %1122 = vrot.lane.b32.xlu1 %v3981_v11, %s4820_s2  ;;  %v924_v20 = vmax.f32 %v742_v12, 0.0 }
 0x170   :  { %v925_v24 = vmax.f32 %v745_v18, 0.0 }
 0x172   :  { %v976_v28 = vpack.c.bf16 %v925_v24, %v924_v20  ;;  %v3982_v30 = vpack.c.bf16 %v925_v24, %v925_v24 }
 0x173   :  { %v749_v31 = vpop.f32.mrb[52].mxu0 }
 0x174   :  { %v750_v33 = vadd.f32 %v5133_v61, %v749_v31  ;;  %v751_v35 = vpop.f32.mrb[53].mxu0  ;;  %1130 = vrot.lane.b32.xlu0 %v3982_v30, %s4818_s22  ;;  %1126 = vst.msk [vmem:[#allocation2 + $0x18] sm:$0xf] %vm996_vm1, %v976_v28 }
 0x175   :  { %v752_v39 = vpop.f32.mrb[54].mxu0 }
 0x176   :  { %v926_v43 = vmax.f32 %v750_v33, 0.0  ;;  %v753_v44 = vadd.f32 %v5133_v61, %v752_v39  ;;  %v754_v45 = vpop.f32.mrb[55].mxu0 }
 0x178   :  { %v3983_v47 = vpack.c.bf16 %v926_v43, %v926_v43  ;;  %v927_v53 = vmax.f32 %v753_v44, 0.0 }
 0x17a   :  { %1137 = vrot.lane.b32.xlu0 %v3983_v47, %s4819_s19  ;;  %v3984_v55 = vpack.c.bf16 %v927_v53, %v927_v53 }
 0x17b   :  { %v757_v54 = vpop.f32.mrb[56].mxu0 }
 0x17c   :  { %v758_v56 = vadd.f32 %v5133_v61, %v757_v54  ;;  %v759_v57 = vpop.f32.mrb[57].mxu0 }
 0x17d   :  { %v760_v59 = vpop.f32.mrb[58].mxu0 }
 0x17e   :  { %v761_v1 = vadd.f32 %v5133_v61, %v760_v59  ;;  %v762_v2 = vpop.f32.mrb[59].mxu0  ;;  %1143 = vrot.lane.b32.xlu0 %v3984_v55, %s4820_s2  ;;  %v928_v4 = vmax.f32 %v758_v56, 0.0 }
 0x180   :  { %v929_v6 = vmax.f32 %v761_v1, 0.0 }
 0x182   :  { %v978_v8 = vpack.c.bf16 %v929_v6, %v928_v4  ;;  %v3985_v10 = vpack.c.bf16 %v929_v6, %v929_v6 }
 0x183   :  { %v765_v11 = vpop.f32.mrb[60].mxu0 }
 0x184   :  { %v766_v12 = vadd.f32 %v5133_v61, %v765_v11  ;;  %v767_v13 = vpop.f32.mrb[61].mxu0  ;;  %1151 = vrot.lane.b32.xlu0 %v3985_v10, %s4818_s22  ;;  %1147 = vst.msk [vmem:[#allocation2 + $0x1c] sm:$0xf] %vm996_vm1, %v978_v8 }
 0x185   :  { %v768_v15 = vpop.f32.mrb[62].mxu0 }
 0x186   :  { %v930_v18 = vmax.f32 %v766_v12, 0.0  ;;  %v769_v19 = vadd.f32 %v5133_v61, %v768_v15  ;;  %v770_v20 = vpop.f32.mrb[63].mxu0  ;;  %v1002_v24 = vpop.permute.xlu0 %1001 }
 0x187   :  { %1005 = vst.msk [vmem:[#allocation2] sm:$0xf] %vm1004_vm2, %v1002_v24 }
 0x188   :  { %v3986_v28 = vpack.c.bf16 %v930_v18, %v930_v18  ;;  %v931_v30 = vmax.f32 %v769_v19, 0.0 }
 0x18a   :  { %1158 = vrot.lane.b32.xlu0 %v3986_v28, %s4819_s19  ;;  %v3987_v33 = vpack.c.bf16 %v931_v30, %v931_v30 }
 0x18b   :  { %v773_v31 = vpop.f32.mrb[64].mxu0 }
 0x18c   :  { %v1010_v35 = vpop.permute.xlu1 %1009  ;;  %v774_v39 = vadd.f32 %v5133_v61, %v773_v31  ;;  %v775_v43 = vpop.f32.mrb[65].mxu0 }
 0x18d   :  { %1013 = vst.msk [vmem:[#allocation2] sm:$0xf] %vm1012_vm3, %v1010_v35  ;;  %v776_v44 = vpop.f32.mrb[66].mxu0 }
 0x18e   :  { %1164 = vrot.lane.b32.xlu0 %v3987_v33, %s4820_s2  ;;  %v932_v45 = vmax.f32 %v774_v39, 0.0  ;;  %v777_v47 = vadd.f32 %v5133_v61, %v776_v44  ;;  %v778_v53 = vpop.f32.mrb[67].mxu0 }
 0x190   :  { %v1017_v54 = vpop.permute.xlu1 %1016  ;;  %v5459_v55 = vmax.f32 %v777_v47, 0.0 }
 0x191   :  { %1020 = vst.msk [vmem:[#allocation2] sm:$0xf] %vm1019_vm4, %v1017_v54 }
 0x192   :  { %v980_v56 = vpack.c.bf16 %v5459_v55, %v932_v45 }
 0x193   :  { %v5463_v57 = vpop.f32.mrb[68].mxu0 }
 0x194   :  { %1168 = vst.msk [vmem:[#allocation2 + $0x20] sm:$0xf] %vm996_vm1, %v980_v56  ;;  %v783_v59 = vpop.f32.mrb[69].mxu0 }
 0x195   :  { %v5466_v1 = vpop.f32.mrb[70].mxu0 }
 0x196   :  { %v1026_v2 = vpop.permute.xlu1 %1025  ;;  %v786_v4 = vpop.f32.mrb[71].mxu0 }
 0x197   :  { %1028 = vst.msk [vmem:[#allocation2 + $0x4] sm:$0xf] %vm1004_vm2, %v1026_v2 }
 0x19b   :  { %v789_v6 = vpop.f32.mrb[72].mxu0 }
 0x19c   :  { %v790_v8 = vadd.f32 %v5133_v61, %v789_v6  ;;  %v791_v10 = vpop.f32.mrb[73].mxu0 }
 0x19d   :  { %v792_v11 = vpop.f32.mrb[74].mxu0 }
 0x19e   :  { %v936_v12 = vmax.f32 %v790_v8, 0.0  ;;  %v793_v13 = vadd.f32 %v5133_v61, %v792_v11  ;;  %v794_v15 = vpop.f32.mrb[75].mxu0 }
 0x19f   :  { %v1401_v15 = vld [vmem:[#allocation2] sm:$0xf] }
 0x1a0   :  { %v5471_v18 = vmax.f32 %v793_v13, 0.0 }
 0x1a2   :  { %v982_v19 = vpack.c.bf16 %v5471_v18, %v936_v12 }
 0x1a3   :  { %v5474_v20 = vpop.f32.mrb[76].mxu0 }
 0x1a4   :  { %1189 = vst.msk [vmem:[#allocation2 + $0x24] sm:$0xf] %vm996_vm1, %v982_v19  ;;  %v799_v24 = vpop.f32.mrb[77].mxu0 }
 0x1a5   :  { %v5477_v28 = vpop.f32.mrb[78].mxu0 }
 0x1a6   :  { %v1047_v30 = vpop.permute.xlu0 %1046  ;;  %v802_v31 = vpop.f32.mrb[79].mxu0 }
 0x1a7   :  { %1049 = vst.msk [vmem:[#allocation2 + $0x8] sm:$0xf] %vm1004_vm2, %v1047_v30 }
 0x1ab   :  { %v805_v33 = vpop.f32.mrb[80].mxu0 }
 0x1ac   :  { %v1054_v35 = vpop.permute.xlu1 %1053  ;;  %v806_v39 = vadd.f32 %v5133_v61, %v805_v33  ;;  %v807_v43 = vpop.f32.mrb[81].mxu0 }
 0x1ad   :  { %1056 = vst.msk [vmem:[#allocation2 + $0x8] sm:$0xf] %vm1012_vm3, %v1054_v35  ;;  %v808_v44 = vpop.f32.mrb[82].mxu0 }
 0x1ae   :  { %v1060_v45 = vpop.permute.xlu0 %1059  ;;  %v940_v47 = vmax.f32 %v806_v39, 0.0  ;;  %v809_v53 = vadd.f32 %v5133_v61, %v808_v44  ;;  %v810_v54 = vpop.f32.mrb[83].mxu0 }
 0x1af   :  { %1062 = vst.msk [vmem:[#allocation2 + $0x8] sm:$0xf] %vm1019_vm4, %v1060_v45 }
 0x1b0   :  { %v1033_v56 = vpop.permute.xlu1 %1032  ;;  %v5484_v59 = vmax.f32 %v809_v53, 0.0 }
 0x1b1   :  { %1035 = vst.msk [vmem:[#allocation2 + $0x4] sm:$0xf] %vm1012_vm3, %v1033_v56 }
 0x1b2   :  { %v984_v2 = vpack.c.bf16 %v5484_v59, %v940_v47 }
 0x1b3   :  { %v5488_v4 = vpop.f32.mrb[84].mxu0 }
 0x1b4   :  { %v1039_v6 = vpop.permute.xlu1 %1038  ;;  %1210 = vst.msk [vmem:[#allocation2 + $0x28] sm:$0xf] %vm996_vm1, %v984_v2  ;;  %v815_v8 = vpop.f32.mrb[85].mxu0 }
 0x1b5   :  { %1041 = vst.msk [vmem:[#allocation2 + $0x4] sm:$0xf] %vm1019_vm4, %v1039_v6  ;;  %v5492_v10 = vpop.f32.mrb[86].mxu0 }
 0x1b6   :  { %v1068_v11 = vpop.permute.xlu0 %1067  ;;  %v1402_v12 = vld [vmem:[#allocation2 + $0x8] sm:$0xf]  ;;  %v818_v13 = vpop.f32.mrb[87].mxu0 }
 0x1b7   :  { %1070 = vst.msk [vmem:[#allocation2 + $0xc] sm:$0xf] %vm1004_vm2, %v1068_v11  ;;  %1635 = vmatprep.mubr.bf16.mxu1 %v1402_v12 }
 0x1b8   :  { %1636 = vmatmul.mubr.bf16.vlgmr.msra.gmra.mrb[0].mxu1 %v1401_v15 }
 0x1b9   :  { %4039 = vmatpush3.bf16.msra.mxu1 %v5339_v32 }
 0x1ba   :  { %4040 = vmatprep.subr.bf16.mxu1 %v5349_v40 }
 0x1bb   :  { %v821_v19 = vpop.f32.mrb[88].mxu0 }
 0x1bc   :  { %v1075_v24 = vpop.permute.xlu0 %1074  ;;  %v822_v30 = vadd.f32 %v5133_v61, %v821_v19  ;;  %v823_v31 = vpop.f32.mrb[89].mxu0  ;;  %v1687_v13 = vld [vmem:[#allocation2] sm:$0xff] }
 0x1bd   :  { %1077 = vst.msk [vmem:[#allocation2 + $0xc] sm:$0xf] %vm1012_vm3, %v1075_v24  ;;  %4041 = vmatpush3.bf16.msra.mxu1 %v5354_v42  ;;  %v824_v33 = vpop.f32.mrb[90].mxu0  ;;  %v3831_v19 = vcombine.high %v1687_v13, %v1687_v13  ;;  %v3830_v24 = vcombine.low %v1687_v13, %v1687_v13 }
 0x1be   :  { %4042 = vmatprep.subr.bf16.mxu1 %v5363_v50  ;;  %v944_v35 = vmax.f32 %v822_v30, 0.0  ;;  %v825_v39 = vadd.f32 %v5133_v61, %v824_v33  ;;  %v826_v43 = vpop.f32.mrb[91].mxu0 }
 0x1c0   :  { %v1081_v44 = vpop.permute.xlu0 %1080  ;;  %v5502_v45 = vmax.f32 %v825_v39, 0.0 }
 0x1c1   :  { %1083 = vst.msk [vmem:[#allocation2 + $0xc] sm:$0xf] %vm1019_vm4, %v1081_v44  ;;  %4043 = vmatpush3.bf16.msra.mxu1 %v5368_v52 }
 0x1c2   :  { %4044 = vmatprep.subr.bf16.mxu1 %v5378_v58  ;;  %v986_v47 = vpack.c.bf16 %v5502_v45, %v944_v35 }
 0x1c3   :  { %v5508_v53 = vpop.f32.mrb[92].mxu0 }
 0x1c4   :  { %1231 = vst.msk [vmem:[#allocation2 + $0x2c] sm:$0xf] %vm996_vm1, %v986_v47  ;;  %v831_v54 = vpop.f32.mrb[93].mxu0 }
 0x1c5   :  { %4045 = vmatpush3.bf16.msra.mxu1 %v5383_v62  ;;  %v5512_v56 = vpop.f32.mrb[94].mxu0 }
 0x1c6   :  { %v1089_v2 = vpop.permute.xlu1 %1088  ;;  %4046 = vmatprep.subr.bf16.mxu1 %v5390_v5  ;;  %v834_v6 = vpop.f32.mrb[95].mxu0 }
 0x1c7   :  { %1091 = vst.msk [vmem:[#allocation2 + $0x10] sm:$0xf] %vm1004_vm2, %v1089_v2 }
 0x1c8   :  { %v1688_v8 = vld [vmem:[#allocation2 + $0x8] sm:$0xff] }
 0x1c9   :  { %v3833_v11 = vcombine.high %v1688_v8, %v1688_v8  ;;  %v3832_v12 = vcombine.low %v1688_v8, %v1688_v8  ;;  %4047 = vmatpush3.bf16.msra.mxu1 %v5396_v9 }
 0x1ca   :  { %4048 = vmatprep.subr.bf16.mxu1 %v5405_v14 }
 0x1cb   :  { %1710 = vrot.lane.b32.xlu1 %v3833_v11, %s4819_s19  ;;  %1708 = vrot.lane.b32.xlu0 %v3832_v12, %s4819_s19  ;;  %v837_v44 = vpop.f32.mrb[96].mxu0 }
 0x1cc   :  { %v1096_v15 = vpop.permute.xlu1 %1095  ;;  %v838_v47 = vadd.f32 %v5133_v61, %v837_v44  ;;  %v839_v54 = vpop.f32.mrb[97].mxu0 }
 0x1cd   :  { %1098 = vst.msk [vmem:[#allocation2 + $0x10] sm:$0xf] %vm1012_vm3, %v1096_v15  ;;  %4049 = vmatpush3.bf16.msra.mxu1 %v5410_v16  ;;  %v840_v2 = vpop.f32.mrb[98].mxu0 }
 0x1ce   :  { %4050 = vmatprep.subr.bf16.mxu1 %v5419_v25  ;;  %v841_v6 = vadd.f32 %v5133_v61, %v840_v2  ;;  %v842_v8 = vpop.f32.mrb[99].mxu0 }
 0x1cf   :  { %1698 = vrot.lane.b32.xlu1 %v3831_v19, %s4819_s19  ;;  %1696 = vrot.lane.b32.xlu0 %v3830_v24, %s4819_s19 }
 0x1d0   :  { %v1102_v30 = vpop.permute.xlu1 %1101  ;;  %v5538_v12 = vmax.f32 %v841_v6, 0.0 }
 0x1d1   :  { %1104 = vst.msk [vmem:[#allocation2 + $0x10] sm:$0xf] %vm1019_vm4, %v1102_v30  ;;  %4051 = vmatpush3.bf16.msra.mxu1 %v5424_v27 }
 0x1d2   :  { %4052 = vmatprep.subr.bf16.mxu1 %v5434_v37 }
 0x1d3   :  { %v5541_v15 = vpop.f32.mrb[100].mxu0 }
 0x1d4   :  { %v847_v19 = vpop.f32.mrb[101].mxu0 }
 0x1d5   :  { %4053 = vmatpush3.bf16.msra.mxu1 %v5439_v41  ;;  %v5544_v30 = vpop.f32.mrb[102].mxu0 }
 0x1d6   :  { %v1110_v31 = vpop.permute.xlu1 %1109  ;;  %4060 = vmatprep.subr.bf16.mxu1 %v5147_v17  ;;  %v948_v17 = vmax.f32 %v838_v47, 0.0 }
 0x1d7   :  { %1112 = vst.msk [vmem:[#allocation2 + $0x14] sm:$0xf] %vm1004_vm2, %v1110_v31  ;;  %v850_v31 = vpop.f32.mrb[103].mxu0 }
 0x1d8   :  { %v988_v13 = vpack.c.bf16 %v5538_v12, %v948_v17 }
 0x1da   :  { %1252 = vst.msk [vmem:[#allocation2 + $0x30] sm:$0xf] %vm996_vm1, %v988_v13 }
 0x1dc   :  { %v1117_v33 = vpop.permute.xlu1 %1116 }
 0x1dd   :  { %1119 = vst.msk [vmem:[#allocation2 + $0x14] sm:$0xf] %vm1012_vm3, %v1117_v33  ;;  %v1403_v33 = vld [vmem:[#allocation2 + $0x10] sm:$0xf] }
 0x1e0   :  { %v1123_v35 = vpop.permute.xlu1 %1122 }
 0x1e1   :  { %1125 = vst.msk [vmem:[#allocation2 + $0x14] sm:$0xf] %vm1019_vm4, %v1123_v35 }
 0x1e6   :  { %v1131_v39 = vpop.permute.xlu0 %1130 }
 0x1e7   :  { %1133 = vst.msk [vmem:[#allocation2 + $0x18] sm:$0xf] %vm1004_vm2, %v1131_v39  ;;  %v853_v39 = vpop.f32.mrb[104].mxu0 }
 0x1e8   :  { %v855_v47 = vpop.f32.mrb[105].mxu0  ;;  %v1689_v31 = vld [vmem:[#allocation2 + $0x10] sm:$0xff] }
 0x1e9   :  { %v856_v54 = vpop.f32.mrb[106].mxu0 }
 0x1ea   :  { %v858_v17 = vpop.f32.mrb[107].mxu0 }
 0x1ec   :  { %v1138_v43 = vpop.permute.xlu0 %1137 }
 0x1ed   :  { %1140 = vst.msk [vmem:[#allocation2 + $0x18] sm:$0xf] %vm1012_vm3, %v1138_v43  ;;  %v5553_v43 = vld [vmem:[%s6496_s3] ss:$0 sm:$0xff] }
 0x1ee   :  { %v854_v44 = vadd.f32 %v5553_v43, %v853_v39  ;;  %v798_v17 = vadd.f32 %v5553_v43, %v5474_v20  ;;  %v817_v20 = vadd.f32 %v5553_v43, %v5492_v10 }
 0x1f0   :  { %v1144_v11 = vpop.permute.xlu0 %1143  ;;  %v952_v2 = vmax.f32 %v854_v44, 0.0 }
 0x1f1   :  { %1146 = vst.msk [vmem:[#allocation2 + $0x18] sm:$0xf] %vm1019_vm4, %v1144_v11  ;;  %v5565_v11 = vpop.f32.mrb[108].mxu0 }
 0x1f6   :  { %v1152_v24 = vpop.permute.xlu0 %1151 }
 0x1f7   :  { %1154 = vst.msk [vmem:[#allocation2 + $0x1c] sm:$0xf] %vm1004_vm2, %v1152_v24 }
 0x1f8   :  { %v1404_v61 = vld [vmem:[#allocation2 + $0x18] sm:$0xf] }
 0x1f9   :  { %1675 = vmatprep.mubr.bf16.mxu1 %v1404_v61  ;;  %v5581_v61 = vcombine.high %v1689_v31, %v1689_v31 }
 0x1fa   :  { %1676 = vmatmul.mubr.bf16.vlgmr.msra.gmra.mrb[4].mxu1 %v1403_v33 }
 0x1fb   :  { %4061 = vmatpush3.bf16.msra.mxu1 %v5156_v21  ;;  %v857_v21 = vadd.f32 %v5553_v43, %v856_v54  ;;  %v814_v54 = vadd.f32 %v5553_v43, %v5488_v4 }
 0x1fc   :  { %v1159_v35 = vpop.permute.xlu0 %1158  ;;  %4062 = vmatprep.subr.bf16.mxu1 %v5162_v22 }
 0x1fd   :  { %1161 = vst.msk [vmem:[#allocation2 + $0x1c] sm:$0xf] %vm1012_vm3, %v1159_v35  ;;  %v5560_v22 = vmax.f32 %v857_v21, 0.0  ;;  %v830_v35 = vadd.f32 %v5553_v43, %v5508_v53 }
 0x1ff   :  { %4063 = vmatpush3.bf16.msra.mxu1 %v5169_v23  ;;  %v990_v8 = vpack.c.bf16 %v5560_v22, %v952_v2  ;;  %v863_v23 = vpop.f32.mrb[109].mxu0  ;;  %v3997_v2 = vpack.c.bf16 %v5502_v45, %v5502_v45  ;;  %v946_v53 = vmax.f32 %v830_v35, 0.0  ;;  %v3988_v45 = vpack.c.bf16 %v5459_v55, %v5459_v55 }
 0x200   :  { %v1165_v6 = vpop.permute.xlu0 %1164  ;;  %4064 = vmatprep.subr.bf16.mxu1 %v5178_v26  ;;  %v5568_v13 = vpop.f32.mrb[110].mxu0 }
 0x201   :  { %1167 = vst.msk [vmem:[#allocation2 + $0x1c] sm:$0xf] %vm1019_vm4, %v1165_v6  ;;  %v866_v26 = vpop.f32.mrb[111].mxu0  ;;  %v942_v6 = vmax.f32 %v814_v54, 0.0 }
 0x202   :  { %1273 = vst.msk [vmem:[#allocation2 + $0x34] sm:$0xf] %vm996_vm1, %v990_v8 }
 0x203   :  { %4065 = vmatpush3.bf16.msra.mxu1 %v5191_v34  ;;  %v3995_v26 = vpack.c.bf16 %v942_v6, %v942_v6 }
 0x204   :  { %4066 = vmatprep.subr.bf16.mxu1 %v5197_v36  ;;  %v869_v36 = vpop.f32.mrb[112].mxu0 }
 0x205   :  { %v871_v33 = vpop.f32.mrb[113].mxu0 }
 0x206   :  { %v943_v33 = vmax.f32 %v817_v20, 0.0 }
 0x207   :  { %4067 = vmatpush3.bf16.msra.mxu1 %v5202_v38  ;;  %v5583_v38 = vcombine.low %v1689_v31, %v1689_v31  ;;  %v785_v31 = vadd.f32 %v5553_v43, %v5466_v1 }
 0x208   :  { %v1690_v19 = vld [vmem:[#allocation2 + $0x18] sm:$0xff]  ;;  %4068 = vmatprep.subr.bf16.mxu1 %v5215_v46  ;;  %v870_v46 = vadd.f32 %v5553_v43, %v869_v36  ;;  %v3996_v54 = vpack.c.bf16 %v943_v33, %v943_v33  ;;  %v5694_v33 = vld [vmem:[%s6497_s4 + $0x48] sm:$0xff]  }
 0x209   :  { %v5572_v24 = vcombine.high %v1690_v19, %v1690_v19  ;;  %v5574_v34 = vcombine.low %v1690_v19, %v1690_v19  ;;  %v935_v1 = vmax.f32 %v785_v31, 0.0  ;;  %v1827_v31 = vld [vmem:[#allocation2 + $0xc] sm:$0xf] }
 0x20a   :  { %v956_v39 = vmax.f32 %v870_v46, 0.0 }
 0x20b   :  { %1732 = vrot.lane.b32.xlu1 %v5572_v24, %s4819_s19  ;;  %1730 = vrot.lane.b32.xlu0 %v5574_v34, %s4819_s19 }
 0x20c   :  { %4069 = vmatpush3.bf16.msra.mxu1 %v5223_v48  ;;  %v872_v48 = vpop.f32.mrb[114].mxu0 }
 0x20d   :  { %4070 = vmatprep.subr.bf16.mxu1 %v5228_v49  ;;  %v873_v44 = vadd.f32 %v5553_v43, %v872_v48  ;;  %v874_v47 = vpop.f32.mrb[115].mxu0  ;;  %v3994_v49 = vpack.c.bf16 %v5484_v59, %v5484_v59 }
 0x20e   :  { %v5610_v4 = vpop.f32.mrb[116].mxu0 }
 0x20f   :  { %1721 = vrot.lane.b32.xlu1 %v5581_v61, %s4819_s19  ;;  %1719 = vrot.lane.b32.xlu0 %v5583_v38, %s4819_s19  ;;  %v5602_v21 = vmax.f32 %v873_v44, 0.0  ;;  %v879_v8 = vpop.f32.mrb[117].mxu0 }
 0x210   :  { %4071 = vmatpush3.bf16.msra.mxu1 %v5237_v51  ;;  %v782_v51 = vadd.f32 %v5553_v43, %v5463_v57  ;;  %v3998_v57 = vpack.c.bf16 %v946_v53, %v946_v53 }
 0x211   :  { %4072 = vmatprep.subr.bf16.mxu1 %v5254_v60  ;;  %v992_v59 = vpack.c.bf16 %v5602_v21, %v956_v39  ;;  %v3991_v60 = vpack.c.bf16 %v5471_v18, %v5471_v18  ;;  %v938_v18 = vmax.f32 %v798_v17, 0.0 }
 0x212   :  { %v934_v23 = vmax.f32 %v782_v51, 0.0  ;;  %v3990_v51 = vpack.c.bf16 %v935_v1, %v935_v1 }
 0x213   :  { %1235 = vrot.lane.b32.xlu1 %v3997_v2, %s4818_s22  ;;  %1214 = vrot.lane.b32.xlu0 %v3994_v49, %s4818_s22  ;;  %1294 = vst.msk [vmem:[#allocation2 + $0x38] sm:$0xf] %vm996_vm1, %v992_v59  ;;  %v3992_v46 = vpack.c.bf16 %v938_v18, %v938_v18 }
 0x214   :  { %4073 = vmatpush3.bf16.msra.mxu1 %v5259_v63  ;;  %v5620_v63 = vpop.f32.mrb[118].mxu0  ;;  %v3989_v19 = vpack.c.bf16 %v934_v23, %v934_v23 }
 0x215   :  { %4074 = vmatprep.subr.bf16.mxu1 %v5266_v3  ;;  %v882_v55 = vpop.f32.mrb[119].mxu0  ;;  %v833_v3 = vadd.f32 %v5553_v43, %v5512_v56 }
 0x216   :  { %v885_v36 = vpop.f32.mrb[120].mxu0 }
 0x217   :  { %1193 = vrot.lane.b32.xlu1 %v3991_v60, %s4818_s22  ;;  %1172 = vrot.lane.b32.xlu0 %v3988_v45, %s4818_s22  ;;  %v947_v10 = vmax.f32 %v833_v3, 0.0  ;;  %v886_v35 = vadd.f32 %v5553_v43, %v885_v36  ;;  %v887_v56 = vpop.f32.mrb[121].mxu0 }
 0x218   :  { %4075 = vmatpush3.bf16.msra.mxu1 %v5273_v7  ;;  %v801_v7 = vadd.f32 %v5553_v43, %v5477_v28  ;;  %v888_v48 = vpop.f32.mrb[122].mxu0 }
 0x219   :  { %4082 = vmatprep.subr.bf16.mxu1 %v5334_v29  ;;  %v960_v39 = vmax.f32 %v886_v35, 0.0  ;;  %v889_v44 = vadd.f32 %v5553_v43, %v888_v48  ;;  %v890_v47 = vpop.f32.mrb[123].mxu0  ;;  %v3999_v28 = vpack.c.bf16 %v947_v10, %v947_v10  ;;  %v5702_v10 = vld [vmem:[%s6497_s4 + $0x8] sm:$0xff]   ;;  %v5708_v48 = vld [vmem:[%s6497_s4 + $0x50] sm:$0xff]  }
 0x21a   :  { %v939_v49 = vmax.f32 %v801_v7, 0.0  ;;  %v5646_v45 = vpop.f32.mrb[124].mxu0  ;;  %v5688_v7 = vld [vmem:[%s6497_s4] sm:$0xff]  }
 0x21b   :  { %1242 = vrot.lane.b32.xlu1 %v3998_v57, %s4819_s19  ;;  %1221 = vrot.lane.b32.xlu0 %v3995_v26, %s4819_s19  ;;  %v5640_v2 = vmax.f32 %v889_v44, 0.0  ;;  %v895_v60 = vpop.f32.mrb[125].mxu0  ;;  %v5716_v44 = vld [vmem:[%s6497_s4 + $0x10] sm:$0xff]  }
 0x21c   :  { %v3993_v59 = vpack.c.bf16 %v939_v49, %v939_v49  ;;  %v5650_v17 = vpop.f32.mrb[126].mxu0 }
 0x21d   :  { %v994_v53 = vpack.c.bf16 %v5640_v2, %v960_v39  ;;  %v898_v6 = vpop.f32.mrb[127].mxu0 }
 0x21f   :  { %1200 = vrot.lane.b32.xlu1 %v3992_v46, %s4819_s19  ;;  %1179 = vrot.lane.b32.xlu0 %v3989_v19, %s4819_s19  ;;  %1315 = vst.msk [vmem:[#allocation2 + $0x3c] sm:$0xf] %vm996_vm1, %v994_v53 }
 0x223   :  { %1248 = vrot.lane.b32.xlu1 %v3999_v28, %s4820_s2  ;;  %1227 = vrot.lane.b32.xlu0 %v3996_v54, %s4820_s2  ;;  %v5724_v28 = vld [vmem:[%s6497_s4 + $0x58] sm:$0xff]  }
 0x227   :  { %1206 = vrot.lane.b32.xlu1 %v3993_v59, %s4820_s2  ;;  %1185 = vrot.lane.b32.xlu0 %v3990_v51, %s4820_s2  ;;  %v5732_v59 = vld [vmem:[%s6497_s4 + $0x18] sm:$0xff]  }
 0x22b   :  { %2017 = vrot.lane.b32.xlu1 %v5581_v61, %s4819_s19  ;;  %2015 = vrot.lane.b32.xlu0 %v5583_v38, %s4819_s19 }
 0x22f   :  { %2028 = vrot.lane.b32.xlu1 %v5572_v24, %s4819_s19  ;;  %2026 = vrot.lane.b32.xlu0 %v5574_v34, %s4819_s19  ;;  %v5680_v24 = vld [vmem:[%s6497_s4 + $0x40] sm:$0xff]  }
 0x23d   :  { %v1711_v8 = vpop.permute.xlu1 %1710  ;;  %v1709_v57 = vpop.permute.xlu0 %1708 }
 0x23e   :  { %v1712_v55 = vsel %vm514_vm0, %v1709_v57, %v1711_v8  ;;  %v5738_v8 = vld [vmem:[%s6497_s4 + $0x60] sm:$0xff]  }
 0x23f   :  { %1768 = vmatprep.mubr.bf16.mxu1 %v1712_v55  ;;  %v5746_v57 = vld [vmem:[%s6497_s4 + $0x20] sm:$0xff]  }
 0x241   :  { %v1699_v23 = vpop.permute.xlu1 %1698  ;;  %v1697_v18 = vpop.permute.xlu0 %1696 }
 0x242   :  { %v1701_v26 = vsel %vm514_vm0, %v1697_v18, %v1699_v23  ;;  %v5752_v18 = vld [vmem:[%s6497_s4 + $0x68] sm:$0xff]  }
 0x243   :  { %1769 = vmatmul.mubr.bf16.vlgmr.msra.gmra.mrb[8].mxu1 %v1701_v26  ;;  %v5760_v26 = vld [vmem:[%s6497_s4 + $0x28] sm:$0xff]  }
 0x244   :  { %4083 = vmatpush3.bf16.msra.mxu1 %v5339_v32 }
 0x245   :  { %4084 = vmatprep.subr.bf16.mxu1 %v5349_v40 }
 0x248   :  { %4085 = vmatpush3.bf16.msra.mxu1 %v5354_v42 }
 0x249   :  { %4086 = vmatprep.subr.bf16.mxu1 %v5363_v50 }
 0x24c   :  { %4087 = vmatpush3.bf16.msra.mxu1 %v5368_v52 }
 0x24d   :  { %4088 = vmatprep.subr.bf16.mxu1 %v5378_v58 }
 0x250   :  { %4089 = vmatpush3.bf16.msra.mxu1 %v5383_v62 }
 0x251   :  { %4090 = vmatprep.subr.bf16.mxu1 %v5390_v5 }
 0x254   :  { %4091 = vmatpush3.bf16.msra.mxu1 %v5396_v9 }
 0x255   :  { %4092 = vmatprep.subr.bf16.mxu1 %v5405_v14 }
 0x258   :  { %4093 = vmatpush3.bf16.msra.mxu1 %v5410_v16 }
 0x259   :  { %4094 = vmatprep.subr.bf16.mxu1 %v5419_v25 }
 0x25c   :  { %4095 = vmatpush3.bf16.msra.mxu1 %v5424_v27 }
 0x25d   :  { %4096 = vmatprep.subr.bf16.mxu1 %v5434_v37 }
 0x260   :  { %4097 = vmatpush3.bf16.msra.mxu1 %v5439_v41 }
 0x261   :  { %4104 = vmatprep.subr.bf16.mxu1 %v5680_v24 }
 0x27d   :  { %v1733_v34 = vpop.permute.xlu1 %1732  ;;  %v1731_v61 = vpop.permute.xlu0 %1730 }
 0x27e   :  { %v1734_v38 = vsel %vm514_vm0, %v1731_v61, %v1733_v34 }
 0x27f   :  { %1808 = vmatprep.mubr.bf16.mxu1 %v1734_v38  ;;  %v5766_v38 = vld [vmem:[%s6497_s4 + $0x70] sm:$0xff]  }
 0x281   :  { %v1722_v20 = vpop.permute.xlu1 %1721  ;;  %v1720_v3 = vpop.permute.xlu0 %1719 }
 0x282   :  { %v1723_v19 = vsel %vm514_vm0, %v1720_v3, %v1722_v20  ;;  %v5774_v20 = vld [vmem:[%s6497_s4 + $0x30] sm:$0xff]   ;;  %v5780_v3 = vld [vmem:[%s6497_s4 + $0x78] sm:$0xff]  }
 0x283   :  { %1809 = vmatmul.mubr.bf16.vlgmr.msra.gmra.mrb[12].mxu1 %v1723_v19 }
 0x284   :  { %4105 = vmatpush3.bf16.msra.mxu1 %v5688_v7  ;;  %1862 = vmatprep.mubr.bf16.mxu1 %v1827_v31 }
 0x285   :  { %v1236_v36 = vpop.permute.xlu1 %1235  ;;  %v1215_v46 = vpop.permute.xlu0 %1214  ;;  %4106 = vmatprep.subr.bf16.mxu1 %v5694_v33 }
 0x286   :  { %1238 = vst.msk [vmem:[#allocation2 + $0x2c] sm:$0xf] %vm1004_vm2, %v1236_v36  ;;  %1217 = vst.msk [vmem:[#allocation2 + $0x28] sm:$0xf] %vm1004_vm2, %v1215_v46  ;;  %v5790_v46 = vld [vmem:[%s6497_s4 + $0x38] sm:$0xff]  }
 0x288   :  { %4107 = vmatpush3.bf16.msra.mxu1 %v5702_v10 }
 0x289   :  { %v1194_v35 = vpop.permute.xlu1 %1193  ;;  %v1173_v56 = vpop.permute.xlu0 %1172  ;;  %4108 = vmatprep.subr.bf16.mxu1 %v5708_v48 }
 0x28a   :  { %1196 = vst.msk [vmem:[#allocation2 + $0x24] sm:$0xf] %vm1004_vm2, %v1194_v35  ;;  %1175 = vst.msk [vmem:[#allocation2 + $0x20] sm:$0xf] %vm1004_vm2, %v1173_v56  ;;  %v1826_v56 = vld [vmem:[#allocation2 + $0x4] sm:$0xf] }
 0x28b   :  { %v4032_v39 = vpop.f32.mrb[0].mxu1 }
 0x28c   :  { %4109 = vmatpush3.bf16.msra.mxu1 %v5716_v44  ;;  %v4033_v47 = vpop.f32.mrb[1].mxu1 }
 0x28d   :  { %v5719_v1 = vadd.f32 %v4033_v47, %v4032_v39  ;;  %v1243_v49 = vpop.permute.xlu1 %1242  ;;  %v1222_v54 = vpop.permute.xlu0 %1221  ;;  %4110 = vmatprep.subr.bf16.mxu1 %v5724_v28 }
 0x28e   :  { %1245 = vst.msk [vmem:[#allocation2 + $0x2c] sm:$0xf] %vm1012_vm3, %v1243_v49  ;;  %1224 = vst.msk [vmem:[#allocation2 + $0x28] sm:$0xf] %vm1012_vm3, %v1222_v54  ;;  %v4035_v53 = vpop.f32.mrb[2].mxu1  ;;  %v894_v54 = vadd.f32 %v5553_v43, %v5646_v45  ;;  %v846_v45 = vadd.f32 %v5553_v43, %v5541_v15 }
 0x28f   :  { %v4036_v51 = vpop.f32.mrb[3].mxu1  ;;  %v1829_v49 = vld [vmem:[#allocation2 + $0x1c] sm:$0xf]  ;;  %v878_v53 = vadd.f32 %v5553_v43, %v5610_v4  ;;  %v862_v4 = vadd.f32 %v5553_v43, %v5565_v11  ;;  %v849_v11 = vadd.f32 %v5553_v43, %v5544_v30 }
 0x290   :  { %4111 = vmatpush3.bf16.msra.mxu1 %v5732_v59  ;;  %v4009_v51 = vpack.c.bf16 %v5640_v2, %v5640_v2  ;;  %v950_v15 = vmax.f32 %v846_v45, 0.0  ;;  %v5932_v45 = vld [vmem:[%s6497_s4 + $0xe0] sm:$0xff]  }
 0x291   :  { %v1201_v60 = vpop.permute.xlu1 %1200  ;;  %v1180_v6 = vpop.permute.xlu0 %1179  ;;  %4112 = vmatprep.subr.bf16.mxu1 %v5738_v8 }
 0x292   :  { %1203 = vst.msk [vmem:[#allocation2 + $0x24] sm:$0xf] %vm1012_vm3, %v1201_v60  ;;  %1182 = vst.msk [vmem:[#allocation2 + $0x20] sm:$0xf] %vm1012_vm3, %v1180_v6  ;;  %v865_v6 = vadd.f32 %v5553_v43, %v5568_v13 }
 0x294   :  { %4113 = vmatpush3.bf16.msra.mxu1 %v5746_v57 }
 0x295   :  { %v1249_v55 = vpop.permute.xlu1 %1248  ;;  %v1228_v23 = vpop.permute.xlu0 %1227  ;;  %4114 = vmatprep.subr.bf16.mxu1 %v5752_v18 }
 0x296   :  { %1251 = vst.msk [vmem:[#allocation2 + $0x2c] sm:$0xf] %vm1019_vm4, %v1249_v55  ;;  %1230 = vst.msk [vmem:[#allocation2 + $0x28] sm:$0xf] %vm1019_vm4, %v1228_v23 }
 0x298   :  { %4115 = vmatpush3.bf16.msra.mxu1 %v5760_v26 }
 0x299   :  { %v1207_v34 = vpop.permute.xlu1 %1206  ;;  %v1186_v61 = vpop.permute.xlu0 %1185  ;;  %4116 = vmatprep.subr.bf16.mxu1 %v5766_v38 }
 0x29a   :  { %1209 = vst.msk [vmem:[#allocation2 + $0x24] sm:$0xf] %vm1019_vm4, %v1207_v34  ;;  %1188 = vst.msk [vmem:[#allocation2 + $0x20] sm:$0xf] %vm1019_vm4, %v1186_v61 }
 0x29c   :  { %4117 = vmatpush3.bf16.msra.mxu1 %v5774_v20 }
 0x29d   :  { %4118 = vmatprep.subr.bf16.mxu1 %v5780_v3  ;;  %v2009_v19 = vld [vmem:[#allocation2 + $0x28] sm:$0xff] }
 0x29e   :  { %v5783_v31 = vcombine.high %v2009_v19, %v2009_v19  ;;  %v5785_v36 = vcombine.low %v2009_v19, %v2009_v19 }
 0x2a0   :  { %4119 = vmatpush3.bf16.msra.mxu1 %v5790_v46  ;;  %2050 = vrot.lane.b32.xlu1 %v5783_v31, %s4819_s19 }
 0x2a1   :  { %2048 = vrot.lane.b32.xlu0 %v5785_v36, %s4819_s19  ;;  %4126 = vmatprep.subr.bf16.mxu1 %v5334_v29  ;;  %v2008_v35 = vld [vmem:[#allocation2 + $0x20] sm:$0xff]  ;;  %v4006_v29 = vpack.c.bf16 %v5602_v21, %v5602_v21  ;;  %v4003_v21 = vpack.c.bf16 %v5560_v22, %v5560_v22  ;;  %v897_v22 = vadd.f32 %v5553_v43, %v5650_v17  ;;  %v955_v17 = vmax.f32 %v865_v6, 0.0 }
 0x2a2   :  { %v3845_v39 = vcombine.high %v2008_v35, %v2008_v35  ;;  %v3844_v47 = vcombine.low %v2008_v35, %v2008_v35 }
 0x2a3   :  { %1863 = vmatmul.mubr.bf16.vlgmr.msra.gmra.mrb[16].mxu1 %v1826_v56  ;;  %v963_v55 = vmax.f32 %v897_v22, 0.0  ;;  %v1913_v56 = vld [vmem:[#allocation2 + $0x10] sm:$0xf]  ;;  %v1915_v22 = vld [vmem:[#allocation2 + $0x20] sm:$0xf] }
 0x2a4   :  { %4127 = vmatpush3.bf16.msra.mxu1 %v5339_v32  ;;  %1902 = vmatprep.mubr.bf16.mxu1 %v1829_v49  ;;  %v962_v32 = vmax.f32 %v894_v54, 0.0  ;;  %v5896_v49 = vld [vmem:[%s6497_s4 + $0xc8] sm:$0xff]  }
 0x2a5   :  { %2039 = vrot.lane.b32.xlu1 %v3845_v39, %s4819_s19  ;;  %2037 = vrot.lane.b32.xlu0 %v3844_v47, %s4819_s19  ;;  %v4011_v30 = vpack.c.bf16 %v963_v55, %v963_v55  ;;  %v5902_v54 = vld [vmem:[%s6497_s4 + $0x88] sm:$0xff]  }
 0x2a6   :  { %4128 = vmatprep.subr.bf16.mxu1 %v5349_v40  ;;  %v4000_v40 = vpack.c.bf16 %v5538_v12, %v5538_v12  ;;  %v4010_v2 = vpack.c.bf16 %v962_v32, %v962_v32  ;;  %v881_v12 = vadd.f32 %v5553_v43, %v5620_v63  ;;  %v5926_v32 = vld [vmem:[%s6497_s4 + $0x98] sm:$0xff]  }
 0x2a8   :  { %4129 = vmatpush3.bf16.msra.mxu1 %v5354_v42  ;;  %v958_v42 = vmax.f32 %v878_v53, 0.0  ;;  %v959_v63 = vmax.f32 %v881_v12, 0.0  ;;  %v5914_v53 = vld [vmem:[%s6497_s4 + $0x90] sm:$0xff]  }
 0x2a9   :  { %1319 = vrot.lane.b32.xlu1 %v4009_v51, %s4818_s22  ;;  %1298 = vrot.lane.b32.xlu0 %v4006_v29, %s4818_s22  ;;  %v5908_v29 = vld [vmem:[%s6497_s4 + $0xd0] sm:$0xff]   ;;  %v5920_v51 = vld [vmem:[%s6497_s4 + $0xd8] sm:$0xff]  }
 0x2aa   :  { %4130 = vmatprep.subr.bf16.mxu1 %v5363_v50  ;;  %v954_v50 = vmax.f32 %v862_v4, 0.0  ;;  %v4007_v60 = vpack.c.bf16 %v958_v42, %v958_v42  ;;  %v4008_v23 = vpack.c.bf16 %v959_v63, %v959_v63  ;;  %v5950_v4 = vld [vmem:[%s6497_s4 + $0xa8] sm:$0xff]   ;;  %v5956_v42 = vld [vmem:[%s6497_s4 + $0xf0] sm:$0xff]  }
 0x2ac   :  { %4131 = vmatpush3.bf16.msra.mxu1 %v5368_v52  ;;  %v4001_v52 = vpack.c.bf16 %v950_v15, %v950_v15  ;;  %v2016_v15 = vpop.permute.xlu0 %2015 }
 0x2ad   :  { %1277 = vrot.lane.b32.xlu1 %v4003_v21, %s4818_s22  ;;  %1256 = vrot.lane.b32.xlu0 %v4000_v40, %s4818_s22  ;;  %v5938_v40 = vld [vmem:[%s6497_s4 + $0xa0] sm:$0xff]   ;;  %v5944_v21 = vld [vmem:[%s6497_s4 + $0xe8] sm:$0xff]  }
 0x2ae   :  { %4132 = vmatprep.subr.bf16.mxu1 %v5378_v58  ;;  %v4004_v58 = vpack.c.bf16 %v954_v50, %v954_v50  ;;  %v5962_v50 = vld [vmem:[%s6497_s4 + $0xb0] sm:$0xff]  }
 0x2b0   :  { %4133 = vmatpush3.bf16.msra.mxu1 %v5383_v62  ;;  %v951_v62 = vmax.f32 %v849_v11, 0.0  ;;  %v2027_v12 = vpop.permute.xlu0 %2026 }
 0x2b1   :  { %1326 = vrot.lane.b32.xlu1 %v4010_v2, %s4819_s19  ;;  %1305 = vrot.lane.b32.xlu0 %v4007_v60, %s4819_s19  ;;  %v2018_v2 = vpop.permute.xlu1 %2017 }
 0x2b2   :  { %4134 = vmatprep.subr.bf16.mxu1 %v5390_v5  ;;  %v4002_v5 = vpack.c.bf16 %v951_v62, %v951_v62 }
 0x2b4   :  { %4135 = vmatpush3.bf16.msra.mxu1 %v5396_v9  ;;  %v4005_v9 = vpack.c.bf16 %v955_v17, %v955_v17 }
 0x2b5   :  { %1284 = vrot.lane.b32.xlu1 %v4004_v58, %s4819_s19  ;;  %1263 = vrot.lane.b32.xlu0 %v4001_v52, %s4819_s19  ;;  %v2029_v60 = vpop.permute.xlu1 %2028 }
 0x2b6   :  { %4136 = vmatprep.subr.bf16.mxu1 %v5405_v14  ;;  %v1828_v14 = vld [vmem:[#allocation2 + $0x14] sm:$0xf]  ;;  %v2030_v52 = vsel %vm514_vm0, %v2027_v12, %v2029_v60 }
 0x2b8   :  { %4137 = vmatpush3.bf16.msra.mxu1 %v5410_v16  ;;  %v1914_v16 = vld [vmem:[#allocation2 + $0x18] sm:$0xf] }
 0x2b9   :  { %1332 = vrot.lane.b32.xlu1 %v4011_v30, %s4820_s2  ;;  %1311 = vrot.lane.b32.xlu0 %v4008_v23, %s4820_s2  ;;  %v2140_v30 = vld [vmem:[#allocation2 + $0x2c] sm:$0xf] }
 0x2ba   :  { %4138 = vmatprep.subr.bf16.mxu1 %v5419_v25  ;;  %v5865_v25 = vld [vmem:[%s6498_s5] ss:$0 sm:$0xff] }
 0x2bb   :  { %v1638_v13 = vadd.f32 %v5719_v1, %v5865_v25  ;;  %v5884_v1 = vld [vmem:[%s6497_s4 + $0xc0] sm:$0xff]  }
 0x2bc   :  { %4139 = vmatpush3.bf16.msra.mxu1 %v5424_v27 }
 0x2bd   :  { %1290 = vrot.lane.b32.xlu1 %v4005_v9, %s4820_s2  ;;  %1269 = vrot.lane.b32.xlu0 %v4002_v5, %s4820_s2 }
 0x2be   :  { %4140 = vmatprep.subr.bf16.mxu1 %v5434_v37 }
 0x2c0   :  { %4141 = vmatpush3.bf16.msra.mxu1 %v5439_v41 }
 0x2c1   :  { %2328 = vrot.lane.b32.xlu1 %v3845_v39, %s4819_s19  ;;  %2326 = vrot.lane.b32.xlu0 %v3844_v47, %s4819_s19  ;;  %v1916_v39 = vld [vmem:[#allocation2 + $0x28] sm:$0xf]  ;;  %v5890_v47 = vld [vmem:[%s6497_s4 + $0x80] sm:$0xff]  }
 0x2c2   :  { %4148 = vmatprep.subr.bf16.mxu1 %v5680_v24 }
 0x2c3   :  { %1903 = vmatmul.mubr.bf16.vlgmr.msra.gmra.mrb[20].mxu1 %v1828_v14 }
 0x2c4   :  { %4149 = vmatpush3.bf16.msra.mxu1 %v5688_v7  ;;  %1949 = vmatprep.mubr.bf16.mxu1 %v1914_v16 }
 0x2c5   :  { %2339 = vrot.lane.b32.xlu1 %v5783_v31, %s4819_s19  ;;  %2337 = vrot.lane.b32.xlu0 %v5785_v36, %s4819_s19 }
 0x2c6   :  { %4150 = vmatprep.subr.bf16.mxu1 %v5694_v33 }
 0x2c8   :  { %4151 = vmatpush3.bf16.msra.mxu1 %v5702_v10 }
 0x2c9   :  { %4152 = vmatprep.subr.bf16.mxu1 %v5708_v48 }
 0x2cc   :  { %4153 = vmatpush3.bf16.msra.mxu1 %v5716_v44 }
 0x2cd   :  { %v4054_v27 = vpop.f32.mrb[4].mxu1  ;;  %4154 = vmatprep.subr.bf16.mxu1 %v5724_v28 }
 0x2ce   :  { %v4055_v43 = vpop.f32.mrb[5].mxu1 }
 0x2cf   :  { %v4056_v34 = vadd.f32 %v4055_v43, %v4054_v27  ;;  %v4057_v61 = vpop.f32.mrb[6].mxu1  ;;  %v2019_v43 = vsel %vm514_vm0, %v2016_v15, %v2018_v2  ;;  %v6026_v2 = vld [vmem:[%s6497_s4 + $0xf8] sm:$0xff]  }
 0x2d0   :  { %4155 = vmatpush3.bf16.msra.mxu1 %v5732_v59  ;;  %v4058_v19 = vpop.f32.mrb[7].mxu1  ;;  %v2138_v61 = vld [vmem:[#allocation2 + $0x1c] sm:$0xf] }
 0x2d1   :  { %v1678_v31 = vadd.f32 %v4056_v34, %v1638_v13  ;;  %4156 = vmatprep.subr.bf16.mxu1 %v5738_v8 }
 0x2d3   :  { %v1683_v36 = vmax.f32 %v1678_v31, 0.0 }
 0x2d4   :  { %4157 = vmatpush3.bf16.msra.mxu1 %v5746_v57 }
 0x2d5   :  { %v1684_v35 = vpack.c.bf16 %v1683_v36, %v1683_v36  ;;  %4158 = vmatprep.subr.bf16.mxu1 %v5752_v18 }
 0x2d7   :  { %1686 = vst.msk [vmem:[#allocation3] sm:$0xf] %vm1685_vm5, %v1684_v35 }
 0x2d8   :  { %4159 = vmatpush3.bf16.msra.mxu1 %v5760_v26 }
 0x2d9   :  { %4160 = vmatprep.subr.bf16.mxu1 %v5766_v38 }
 0x2dc   :  { %4161 = vmatpush3.bf16.msra.mxu1 %v5774_v20 }
 0x2dd   :  { %4162 = vmatprep.subr.bf16.mxu1 %v5780_v3 }
 0x2e0   :  { %4163 = vmatpush3.bf16.msra.mxu1 %v5790_v46 }
 0x2e1   :  { %4170 = vmatprep.subr.bf16.mxu1 %v5884_v1 }
 0x2e3   :  { %1950 = vmatmul.mubr.bf16.vlgmr.msra.gmra.mrb[24].mxu1 %v1913_v56 }
 0x2e4   :  { %4171 = vmatpush3.bf16.msra.mxu1 %v5890_v47  ;;  %1989 = vmatprep.mubr.bf16.mxu1 %v1916_v39 }
 0x2e5   :  { %4172 = vmatprep.subr.bf16.mxu1 %v5896_v49 }
 0x2e8   :  { %4173 = vmatpush3.bf16.msra.mxu1 %v5902_v54 }
 0x2e9   :  { %4174 = vmatprep.subr.bf16.mxu1 %v5908_v29 }
 0x2ec   :  { %4175 = vmatpush3.bf16.msra.mxu1 %v5914_v53 }
 0x2ed   :  { %4176 = vmatprep.subr.bf16.mxu1 %v5920_v51 }
 0x2f0   :  { %4177 = vmatpush3.bf16.msra.mxu1 %v5926_v32 }
 0x2f1   :  { %4178 = vmatprep.subr.bf16.mxu1 %v5932_v45 }
 0x2f4   :  { %4179 = vmatpush3.bf16.msra.mxu1 %v5938_v40 }
 0x2f5   :  { %4180 = vmatprep.subr.bf16.mxu1 %v5944_v21 }
 0x2f8   :  { %4181 = vmatpush3.bf16.msra.mxu1 %v5950_v4 }
 0x2f9   :  { %4182 = vmatprep.subr.bf16.mxu1 %v5956_v42 }
 0x2fc   :  { %4183 = vmatpush3.bf16.msra.mxu1 %v5962_v50 }
 0x2fd   :  { %4184 = vmatprep.subr.bf16.mxu1 %v5434_v37 }
 0x300   :  { %4185 = vmatpush3.bf16.msra.mxu1 %v5439_v41 }
 0x301   :  { %4192 = vmatprep.subr.bf16.mxu1 %v5680_v24 }
 0x303   :  { %1990 = vmatmul.mubr.bf16.vlgmr.msra.gmra.mrb[28].mxu1 %v1915_v22  ;;  %v6034_v22 = vld [vmem:[%s6497_s4 + $0xb8] sm:$0xff]  }
 0x304   :  { %4193 = vmatpush3.bf16.msra.mxu1 %v5688_v7  ;;  %2086 = vmatprep.mubr.bf16.mxu1 %v2030_v52 }
 0x305   :  { %4194 = vmatprep.subr.bf16.mxu1 %v5694_v33 }
 0x308   :  { %4195 = vmatpush3.bf16.msra.mxu1 %v5702_v10 }
 0x309   :  { %4196 = vmatprep.subr.bf16.mxu1 %v5708_v48 }
 0x30c   :  { %4197 = vmatpush3.bf16.msra.mxu1 %v5716_v44 }
 0x30d   :  { %4198 = vmatprep.subr.bf16.mxu1 %v5724_v28 }
 0x310   :  { %4199 = vmatpush3.bf16.msra.mxu1 %v5732_v59 }
 0x311   :  { %4200 = vmatprep.subr.bf16.mxu1 %v5738_v8 }
 0x312   :  { %v2051_v37 = vpop.permute.xlu1 %2050 }
 0x313   :  { %v2049_v41 = vpop.permute.xlu0 %2048 }
 0x314   :  { %4201 = vmatpush3.bf16.msra.mxu1 %v5746_v57  ;;  %v2052_v11 = vsel %vm514_vm0, %v2049_v41, %v2051_v37  ;;  %v2139_v37 = vld [vmem:[#allocation2 + $0x24] sm:$0xf] }
 0x315   :  { %2126 = vmatprep.mubr.bf16.mxu0 %v2052_v11  ;;  %4202 = vmatprep.subr.bf16.mxu1 %v5752_v18 }
 0x316   :  { %v4076_v58 = vpop.f32.mrb[8].mxu1 }
 0x317   :  { %v2040_v6 = vpop.permute.xlu1 %2039  ;;  %v2038_v63 = vpop.permute.xlu0 %2037 }
 0x318   :  { %v2041_v55 = vsel %vm514_vm0, %v2038_v63, %v2040_v6  ;;  %v4077_v62 = vpop.f32.mrb[9].mxu1  ;;  %4203 = vmatpush3.bf16.msra.mxu1 %v5760_v26  ;;  %v2137_v6 = vld [vmem:[#allocation2 + $0x14] sm:$0xf]  ;;  %v2231_v63 = vld [vmem:[#allocation2 + $0x28] sm:$0xf] }
 0x319   :  { %v5982_v17 = vadd.f32 %v4077_v62, %v4076_v58  ;;  %v4079_v23 = vpop.f32.mrb[10].mxu1  ;;  %2127 = vmatmul.mubr.bf16.vlgmr.msra.gmra.mrb[128].mxu0 %v2041_v55  ;;  %4204 = vmatprep.subr.bf16.mxu1 %v5766_v38 }
 0x31a   :  { %4259 = vmatpush3.bf16.msra.mxu0 %v5890_v47  ;;  %v4080_v5 = vpop.f32.mrb[11].mxu1  ;;  %2213 = vmatprep.mubr.bf16.mxu0 %v2140_v30 }
 0x31b   :  { %v1320_v9 = vpop.permute.xlu1 %1319  ;;  %v1299_v14 = vpop.permute.xlu0 %1298  ;;  %4260 = vmatprep.subr.bf16.mxu0 %v5896_v49  ;;  %v1771_v23 = vadd.f32 %v5982_v17, %v5865_v25 }
 0x31c   :  { %1322 = vst.msk [vmem:[#allocation2 + $0x3c] sm:$0xf] %vm1004_vm2, %v1320_v9  ;;  %1301 = vst.msk [vmem:[#allocation2 + $0x38] sm:$0xf] %vm1004_vm2, %v1299_v14  ;;  %4205 = vmatpush3.bf16.msra.mxu1 %v5774_v20 }
 0x31d   :  { %4206 = vmatprep.subr.bf16.mxu1 %v5780_v3 }
 0x31e   :  { %4261 = vmatpush3.bf16.msra.mxu0 %v5902_v54 }
 0x31f   :  { %v1278_v16 = vpop.permute.xlu1 %1277  ;;  %v1257_v27 = vpop.permute.xlu0 %1256  ;;  %4262 = vmatprep.subr.bf16.mxu0 %v5908_v29 }
 0x320   :  { %1280 = vst.msk [vmem:[#allocation2 + $0x34] sm:$0xf] %vm1004_vm2, %v1278_v16  ;;  %1259 = vst.msk [vmem:[#allocation2 + $0x30] sm:$0xf] %vm1004_vm2, %v1257_v27  ;;  %4207 = vmatpush3.bf16.msra.mxu1 %v5790_v46 }
 0x321   :  { %4236 = vmatprep.subr.bf16.mxu1 %v5680_v24 }
 0x322   :  { %4263 = vmatpush3.bf16.msra.mxu0 %v5914_v53 }
 0x323   :  { %v1327_v13 = vpop.permute.xlu1 %1326  ;;  %v1306_v34 = vpop.permute.xlu0 %1305  ;;  %2087 = vmatmul.mubr.bf16.vlgmr.msra.gmra.mrb[32].mxu1 %v2019_v43  ;;  %4264 = vmatprep.subr.bf16.mxu0 %v5920_v51 }
 0x324   :  { %1329 = vst.msk [vmem:[#allocation2 + $0x3c] sm:$0xf] %vm1012_vm3, %v1327_v13  ;;  %1308 = vst.msk [vmem:[#allocation2 + $0x38] sm:$0xf] %vm1012_vm3, %v1306_v34  ;;  %4237 = vmatpush3.bf16.msra.mxu1 %v5688_v7  ;;  %2173 = vmatprep.mubr.bf16.mxu1 %v2138_v61 }
 0x325   :  { %4238 = vmatprep.subr.bf16.mxu1 %v5694_v33 }
 0x326   :  { %4265 = vmatpush3.bf16.msra.mxu0 %v5926_v32 }
 0x327   :  { %v1285_v19 = vpop.permute.xlu1 %1284  ;;  %v1264_v31 = vpop.permute.xlu0 %1263  ;;  %4266 = vmatprep.subr.bf16.mxu0 %v5932_v45 }
 0x328   :  { %1287 = vst.msk [vmem:[#allocation2 + $0x34] sm:$0xf] %vm1012_vm3, %v1285_v19  ;;  %1266 = vst.msk [vmem:[#allocation2 + $0x30] sm:$0xf] %vm1012_vm3, %v1264_v31  ;;  %4239 = vmatpush3.bf16.msra.mxu1 %v5702_v10  ;;  %v2230_v19 = vld [vmem:[#allocation2 + $0x20] sm:$0xf] }
 0x329   :  { %4240 = vmatprep.subr.bf16.mxu1 %v5708_v48 }
 0x32a   :  { %4267 = vmatpush3.bf16.msra.mxu0 %v5938_v40 }
 0x32b   :  { %v1333_v36 = vpop.permute.xlu1 %1332  ;;  %v1312_v35 = vpop.permute.xlu0 %1311  ;;  %4268 = vmatprep.subr.bf16.mxu0 %v5944_v21 }
 0x32c   :  { %1335 = vst.msk [vmem:[#allocation2 + $0x3c] sm:$0xf] %vm1019_vm4, %v1333_v36  ;;  %1314 = vst.msk [vmem:[#allocation2 + $0x38] sm:$0xf] %vm1019_vm4, %v1312_v35  ;;  %4241 = vmatpush3.bf16.msra.mxu1 %v5716_v44 }
 0x32d   :  { %4242 = vmatprep.subr.bf16.mxu1 %v5724_v28 }
 0x32e   :  { %4269 = vmatpush3.bf16.msra.mxu0 %v5950_v4 }
 0x32f   :  { %v1291_v56 = vpop.permute.xlu1 %1290  ;;  %v1270_v39 = vpop.permute.xlu0 %1269  ;;  %4270 = vmatprep.subr.bf16.mxu0 %v5956_v42 }
 0x330   :  { %1293 = vst.msk [vmem:[#allocation2 + $0x34] sm:$0xf] %vm1019_vm4, %v1291_v56  ;;  %1272 = vst.msk [vmem:[#allocation2 + $0x30] sm:$0xf] %vm1019_vm4, %v1270_v39  ;;  %4243 = vmatpush3.bf16.msra.mxu1 %v5732_v59 }
 0x331   :  { %4244 = vmatprep.subr.bf16.mxu1 %v5738_v8 }
 0x332   :  { %4271 = vmatpush3.bf16.msra.mxu0 %v5962_v50 }
 0x333   :  { %4272 = vmatprep.subr.bf16.mxu0 %v6026_v2  ;;  %v2320_v15 = vld [vmem:[#allocation2 + $0x38] sm:$0xff]  ;;  %v2329_v16 = vpop.permute.xlu1 %2328  ;;  %v2327_v27 = vpop.permute.xlu0 %2326 }
 0x334   :  { %4245 = vmatpush3.bf16.msra.mxu1 %v5746_v57  ;;  %v3856_v60 = vcombine.high %v2320_v15, %v2320_v15  ;;  %v3855_v12 = vcombine.low %v2320_v15, %v2320_v15  ;;  %v2233_v58 = vld [vmem:[#allocation2 + $0x38] sm:$0xf] }
 0x335   :  { %4246 = vmatprep.subr.bf16.mxu1 %v5752_v18 }
 0x336   :  { %4273 = vmatpush3.bf16.msra.mxu0 %v6034_v22  ;;  %2361 = vrot.lane.b32.xlu1 %v3856_v60, %s4819_s19  ;;  %v2330_v60 = vsel %vm514_vm0, %v2327_v27, %v2329_v16  ;;  %v4679_v16 = vld [vmem:[%s6499_s6 + $0x38] sm:$0xff]  }
 0x337   :  { %2359 = vrot.lane.b32.xlu0 %v3855_v12, %s4819_s19  ;;  %4302 = vmatprep.subr.bf16.mxu0 %v5884_v1  ;;  %v2319_v52 = vld [vmem:[#allocation2 + $0x30] sm:$0xff]  ;;  %v2340_v34 = vpop.permute.xlu1 %2339  ;;  %v2338_v61 = vpop.permute.xlu0 %2337  ;;  %v2455_v12 = vld [vmem:[#allocation2 + $0x2c] sm:$0xf] }
 0x338   :  { %4247 = vmatpush3.bf16.msra.mxu1 %v5760_v26  ;;  %v3854_v41 = vcombine.high %v2319_v52, %v2319_v52  ;;  %v3853_v11 = vcombine.low %v2319_v52, %v2319_v52  ;;  %v2232_v5 = vld [vmem:[#allocation2 + $0x30] sm:$0xf]  ;;  %v2341_v31 = vsel %vm514_vm0, %v2338_v61, %v2340_v34 }
 0x339   :  { %2214 = vmatmul.mubr.bf16.vlgmr.msra.gmra.mrb[132].mxu0 %v2139_v37  ;;  %4248 = vmatprep.subr.bf16.mxu1 %v5766_v38 }
 0x33a   :  { %4303 = vmatpush3.bf16.msra.mxu0 %v5890_v47  ;;  %2306 = vmatprep.mubr.bf16.mxu0 %v2233_v58 }
 0x33b   :  { %2350 = vrot.lane.b32.xlu1 %v3854_v41, %s4819_s19  ;;  %2348 = vrot.lane.b32.xlu0 %v3853_v11, %s4819_s19 }
 0x33c   :  { %4249 = vmatpush3.bf16.msra.mxu1 %v5774_v20  ;;  %4304 = vmatprep.subr.bf16.mxu0 %v5896_v49 }
 0x33d   :  { %4250 = vmatprep.subr.bf16.mxu1 %v5780_v3 }
 0x33e   :  { %4305 = vmatpush3.bf16.msra.mxu0 %v5902_v54 }
 0x33f   :  { %4306 = vmatprep.subr.bf16.mxu0 %v5908_v29 }
 0x340   :  { %4251 = vmatpush3.bf16.msra.mxu1 %v5790_v46 }
 0x341   :  { %4280 = vmatprep.subr.bf16.mxu1 %v5680_v24 }
 0x342   :  { %4307 = vmatpush3.bf16.msra.mxu0 %v5914_v53 }
 0x343   :  { %2174 = vmatmul.mubr.bf16.vlgmr.msra.gmra.mrb[36].mxu1 %v2137_v6  ;;  %4308 = vmatprep.subr.bf16.mxu0 %v5920_v51 }
 0x344   :  { %4281 = vmatpush3.bf16.msra.mxu1 %v5688_v7  ;;  %2266 = vmatprep.mubr.bf16.mxu1 %v2231_v63 }
 0x345   :  { %4282 = vmatprep.subr.bf16.mxu1 %v5694_v33 }
 0x346   :  { %4309 = vmatpush3.bf16.msra.mxu0 %v5926_v32 }
 0x347   :  { %4310 = vmatprep.subr.bf16.mxu0 %v5932_v45 }
 0x348   :  { %4283 = vmatpush3.bf16.msra.mxu1 %v5702_v10 }
 0x349   :  { %4284 = vmatprep.subr.bf16.mxu1 %v5708_v48 }
 0x34a   :  { %4311 = vmatpush3.bf16.msra.mxu0 %v5938_v40 }
 0x34b   :  { %4312 = vmatprep.subr.bf16.mxu0 %v5944_v21 }
 0x34c   :  { %4285 = vmatpush3.bf16.msra.mxu1 %v5716_v44 }
 0x34d   :  { %4286 = vmatprep.subr.bf16.mxu1 %v5724_v28 }
 0x34e   :  { %4313 = vmatpush3.bf16.msra.mxu0 %v5950_v4 }
 0x34f   :  { %4314 = vmatprep.subr.bf16.mxu0 %v5956_v42 }
 0x350   :  { %4287 = vmatpush3.bf16.msra.mxu1 %v5732_v59 }
 0x351   :  { %4288 = vmatprep.subr.bf16.mxu1 %v5738_v8 }
 0x352   :  { %4315 = vmatpush3.bf16.msra.mxu0 %v5962_v50 }
 0x353   :  { %4316 = vmatprep.subr.bf16.mxu0 %v6026_v2 }
 0x354   :  { %4289 = vmatpush3.bf16.msra.mxu1 %v5746_v57 }
 0x355   :  { %4290 = vmatprep.subr.bf16.mxu1 %v5752_v18 }
 0x356   :  { %4317 = vmatpush3.bf16.msra.mxu0 %v6034_v22  ;;  %v4098_v55 = vpop.f32.mrb[12].mxu1 }
 0x357   :  { %v4099_v62 = vpop.f32.mrb[13].mxu1  ;;  %4346 = vmatprep.subr.bf16.mxu0 %v5884_v1 }
 0x358   :  { %v4100_v30 = vadd.f32 %v4099_v62, %v4098_v55  ;;  %4291 = vmatpush3.bf16.msra.mxu1 %v5760_v26  ;;  %v4101_v9 = vpop.f32.mrb[14].mxu1  ;;  %v4677_v55 = vld [vmem:[%s6499_s6 + $0x30] sm:$0xff]  }
 0x359   :  { %2307 = vmatmul.mubr.bf16.vlgmr.msra.gmra.mrb[136].mxu0 %v2232_v5  ;;  %v4102_v14 = vpop.f32.mrb[15].mxu1  ;;  %4292 = vmatprep.subr.bf16.mxu1 %v5766_v38 }
 0x35a   :  { %v1811_v43 = vadd.f32 %v4100_v30, %v1771_v23  ;;  %4347 = vmatpush3.bf16.msra.mxu0 %v5890_v47  ;;  %v4678_v14 = vld [vmem:[%s6499_s6 + $0x78] sm:$0xff]  }
 0x35b   :  { %4348 = vmatprep.subr.bf16.mxu0 %v5896_v49 }
 0x35c   :  { %v1816_v13 = vmax.f32 %v1811_v43, 0.0  ;;  %4293 = vmatpush3.bf16.msra.mxu1 %v5774_v20 }
 0x35d   :  { %4294 = vmatprep.subr.bf16.mxu1 %v5780_v3 }
 0x35e   :  { %v4012_v17 = vpack.c.bf16 %v1816_v13, %v1816_v13  ;;  %4349 = vmatpush3.bf16.msra.mxu0 %v5902_v54 }
 0x35f   :  { %4350 = vmatprep.subr.bf16.mxu0 %v5908_v29 }
 0x360   :  { %4295 = vmatpush3.bf16.msra.mxu1 %v5790_v46  ;;  %1821 = vrot.lane.b32.xlu0 %v4012_v17, %s4819_s19 }
 0x361   :  { %4324 = vmatprep.subr.bf16.mxu1 %v5680_v24 }
 0x362   :  { %4351 = vmatpush3.bf16.msra.mxu0 %v5914_v53 }
 0x363   :  { %2267 = vmatmul.mubr.bf16.vlgmr.msra.gmra.mrb[40].mxu1 %v2230_v19  ;;  %4352 = vmatprep.subr.bf16.mxu0 %v5920_v51 }
 0x364   :  { %4325 = vmatpush3.bf16.msra.mxu1 %v5688_v7  ;;  %2397 = vmatprep.mubr.bf16.mxu1 %v2341_v31 }
 0x365   :  { %4326 = vmatprep.subr.bf16.mxu1 %v5694_v33 }
 0x366   :  { %4353 = vmatpush3.bf16.msra.mxu0 %v5926_v32 }
 0x367   :  { %4354 = vmatprep.subr.bf16.mxu0 %v5932_v45 }
 0x368   :  { %4327 = vmatpush3.bf16.msra.mxu1 %v5702_v10 }
 0x369   :  { %4328 = vmatprep.subr.bf16.mxu1 %v5708_v48 }
 0x36a   :  { %4355 = vmatpush3.bf16.msra.mxu0 %v5938_v40 }
 0x36b   :  { %4356 = vmatprep.subr.bf16.mxu0 %v5944_v21 }
 0x36c   :  { %4329 = vmatpush3.bf16.msra.mxu1 %v5716_v44 }
 0x36d   :  { %4330 = vmatprep.subr.bf16.mxu1 %v5724_v28 }
 0x36e   :  { %4357 = vmatpush3.bf16.msra.mxu0 %v5950_v4 }
 0x36f   :  { %4358 = vmatprep.subr.bf16.mxu0 %v5956_v42 }
 0x370   :  { %4331 = vmatpush3.bf16.msra.mxu1 %v5732_v59 }
 0x371   :  { %4332 = vmatprep.subr.bf16.mxu1 %v5738_v8 }
 0x372   :  { %4359 = vmatpush3.bf16.msra.mxu0 %v5962_v50 }
 0x373   :  { %4360 = vmatprep.subr.bf16.mxu0 %v6026_v2 }
 0x374   :  { %4333 = vmatpush3.bf16.msra.mxu1 %v5746_v57 }
 0x375   :  { %4334 = vmatprep.subr.bf16.mxu1 %v5752_v18 }
 0x376   :  { %v4120_v36 = vpop.f32.mrb[16].mxu1  ;;  %4361 = vmatpush3.bf16.msra.mxu0 %v6034_v22 }
 0x377   :  { %v4121_v35 = vpop.f32.mrb[17].mxu1  ;;  %4390 = vmatprep.subr.bf16.mxu0 %v5884_v1 }
 0x378   :  { %v4122_v56 = vadd.f32 %v4121_v35, %v4120_v36  ;;  %v4123_v39 = vpop.f32.mrb[18].mxu1  ;;  %4335 = vmatpush3.bf16.msra.mxu1 %v5760_v26 }
 0x379   :  { %v4124_v15 = vpop.f32.mrb[19].mxu1  ;;  %4336 = vmatprep.subr.bf16.mxu1 %v5766_v38 }
 0x37c   :  { %4337 = vmatpush3.bf16.msra.mxu1 %v5774_v20 }
 0x37d   :  { %4338 = vmatprep.subr.bf16.mxu1 %v5780_v3 }
 0x380   :  { %4339 = vmatpush3.bf16.msra.mxu1 %v5790_v46 }
 0x381   :  { %4368 = vmatprep.subr.bf16.mxu1 %v5680_v24 }
 0x383   :  { %2398 = vmatmul.mubr.bf16.vlgmr.msra.gmra.mrb[44].mxu1 %v2330_v60 }
 0x384   :  { %4369 = vmatpush3.bf16.msra.mxu1 %v5688_v7  ;;  %2490 = vmatprep.mubr.bf16.mxu1 %v2455_v12 }
 0x385   :  { %4370 = vmatprep.subr.bf16.mxu1 %v5694_v33  ;;  %v1865_v33 = vadd.f32 %v4122_v56, %v5865_v25 }
 0x388   :  { %4371 = vmatpush3.bf16.msra.mxu1 %v5702_v10 }
 0x389   :  { %4372 = vmatprep.subr.bf16.mxu1 %v5708_v48 }
 0x38c   :  { %4373 = vmatpush3.bf16.msra.mxu1 %v5716_v44 }
 0x38d   :  { %4374 = vmatprep.subr.bf16.mxu1 %v5724_v28 }
 0x390   :  { %4375 = vmatpush3.bf16.msra.mxu1 %v5732_v59 }
 0x391   :  { %4376 = vmatprep.subr.bf16.mxu1 %v5738_v8  ;;  %v2454_v8 = vld [vmem:[#allocation2 + $0x24] sm:$0xf] }
 0x394   :  { %4377 = vmatpush3.bf16.msra.mxu1 %v5746_v57 }
 0x395   :  { %4378 = vmatprep.subr.bf16.mxu1 %v5752_v18 }
 0x396   :  { %v4142_v24 = vpop.f32.mrb[20].mxu1 }
 0x397   :  { %v4143_v7 = vpop.f32.mrb[21].mxu1 }
 0x398   :  { %v4144_v1 = vadd.f32 %v4143_v7, %v4142_v24  ;;  %v4145_v10 = vpop.f32.mrb[22].mxu1  ;;  %4379 = vmatpush3.bf16.msra.mxu1 %v5760_v26 }
 0x399   :  { %v4146_v48 = vpop.f32.mrb[23].mxu1  ;;  %4380 = vmatprep.subr.bf16.mxu1 %v5766_v38 }
 0x39a   :  { %v1905_v44 = vadd.f32 %v4144_v1, %v1865_v33 }
 0x39c   :  { %v1910_v28 = vmax.f32 %v1905_v44, 0.0  ;;  %4381 = vmatpush3.bf16.msra.mxu1 %v5774_v20  ;;  %v2457_v20 = vld [vmem:[#allocation2 + $0x3c] sm:$0xf] }
 0x39d   :  { %4382 = vmatprep.subr.bf16.mxu1 %v5780_v3 }
 0x39e   :  { %v1911_v59 = vpack.c.bf16 %v1910_v28, %v1910_v28 }
 0x3a0   :  { %4383 = vmatpush3.bf16.msra.mxu1 %v5790_v46  ;;  %1912 = vst.msk [vmem:[#allocation3 + $0x4] sm:$0xf] %vm1685_vm5, %v1911_v59 }
 0x3a3   :  { %2491 = vmatmul.mubr.bf16.vlgmr.msra.gmra.mrb[48].mxu1 %v2454_v8 }
 0x3a8   :  { %v2362_v57 = vpop.permute.xlu1 %2361 }
 0x3a9   :  { %v2360_v18 = vpop.permute.xlu0 %2359 }
 0x3aa   :  { %v2363_v26 = vsel %vm514_vm0, %v2360_v18, %v2362_v57 }
 0x3ab   :  { %2437 = vmatprep.mubr.bf16.mxu0 %v2363_v26 }
 0x3ad   :  { %v2351_v52 = vpop.permute.xlu1 %2350  ;;  %v2349_v38 = vpop.permute.xlu0 %2348 }
 0x3ae   :  { %v2352_v37 = vsel %vm514_vm0, %v2349_v38, %v2351_v52 }
 0x3af   :  { %2438 = vmatmul.mubr.bf16.vlgmr.msra.gmra.mrb[140].mxu0 %v2352_v37  ;;  %v4821_v37 = vmov 0.0  }
 0x3b0   :  { %4391 = vmatpush3.bf16.msra.mxu0 %v5890_v47  ;;  %2530 = vmatprep.mubr.bf16.mxu0 %v2457_v20  ;;  %v4664_v47 = vld [vmem:[%s6499_s6 + $0x40] sm:$0xff]  }
 0x3b1   :  { %4392 = vmatprep.subr.bf16.mxu0 %v5896_v49  ;;  %v4665_v49 = vld [vmem:[%s6499_s6] sm:$0xff]   ;;  %4412 = vmatprep.subr.bf16.mxu1 %v4664_v47 }
 0x3b2   :  { %4413 = vmatpush3.bf16.msra.mxu1 %v4665_v49  ;;  %v4688_v47 = vld [vmem:[%s6499_s6 + $0x80] sm:$0xff]   ;;  %v4689_v49 = vld [vmem:[%s6499_s6 + $0xc8] sm:$0xff]  }
 0x3b4   :  { %4393 = vmatpush3.bf16.msra.mxu0 %v5902_v54  ;;  %v4666_v54 = vld [vmem:[%s6499_s6 + $0x48] sm:$0xff]  }
 0x3b5   :  { %4394 = vmatprep.subr.bf16.mxu0 %v5908_v29  ;;  %v4667_v29 = vld [vmem:[%s6499_s6 + $0x8] sm:$0xff]   ;;  %4414 = vmatprep.subr.bf16.mxu1 %v4666_v54 }
 0x3b6   :  { %v4164_v3 = vpop.f32.mrb[24].mxu1  ;;  %4415 = vmatpush3.bf16.msra.mxu1 %v4667_v29 }
 0x3b7   :  { %v4165_v46 = vpop.f32.mrb[25].mxu1 }
 0x3b8   :  { %4395 = vmatpush3.bf16.msra.mxu0 %v5914_v53  ;;  %v4166_v41 = vadd.f32 %v4165_v46, %v4164_v3  ;;  %v4167_v11 = vpop.f32.mrb[26].mxu1  ;;  %v4668_v53 = vld [vmem:[%s6499_s6 + $0x50] sm:$0xff]  }
 0x3b9   :  { %v4168_v58 = vpop.f32.mrb[27].mxu1  ;;  %4396 = vmatprep.subr.bf16.mxu0 %v5920_v51  ;;  %v4669_v51 = vld [vmem:[%s6499_s6 + $0x10] sm:$0xff]   ;;  %4416 = vmatprep.subr.bf16.mxu1 %v4668_v53 }
 0x3ba   :  { %4417 = vmatpush3.bf16.msra.mxu1 %v4669_v51  ;;  %v1952_v62 = vadd.f32 %v4166_v41, %v5865_v25  ;;  %v4687_v58 = vld [vmem:[%s6499_s6 + $0xc0] sm:$0xff]  }
 0x3bc   :  { %4397 = vmatpush3.bf16.msra.mxu0 %v5926_v32  ;;  %v4670_v32 = vld [vmem:[%s6499_s6 + $0x58] sm:$0xff]  }
 0x3bd   :  { %4398 = vmatprep.subr.bf16.mxu0 %v5932_v45  ;;  %v4671_v45 = vld [vmem:[%s6499_s6 + $0x18] sm:$0xff]   ;;  %4418 = vmatprep.subr.bf16.mxu1 %v4670_v32  ;;  %v4690_v32 = vld [vmem:[%s6499_s6 + $0x88] sm:$0xff]  }
 0x3be   :  { %4419 = vmatpush3.bf16.msra.mxu1 %v4671_v45 }
 0x3c0   :  { %4399 = vmatpush3.bf16.msra.mxu0 %v5938_v40  ;;  %v4672_v40 = vld [vmem:[%s6499_s6 + $0x60] sm:$0xff]  }
 0x3c1   :  { %4400 = vmatprep.subr.bf16.mxu0 %v5944_v21  ;;  %v4673_v21 = vld [vmem:[%s6499_s6 + $0x20] sm:$0xff]   ;;  %4420 = vmatprep.subr.bf16.mxu1 %v4672_v40  ;;  %v4691_v40 = vld [vmem:[%s6499_s6 + $0xd0] sm:$0xff]  }
 0x3c2   :  { %4421 = vmatpush3.bf16.msra.mxu1 %v4673_v21 }
 0x3c4   :  { %4401 = vmatpush3.bf16.msra.mxu0 %v5950_v4  ;;  %v2456_v4 = vld [vmem:[#allocation2 + $0x34] sm:$0xf] }
 0x3c5   :  { %4402 = vmatprep.subr.bf16.mxu0 %v5956_v42  ;;  %v4674_v42 = vld [vmem:[%s6499_s6 + $0x68] sm:$0xff]  }
 0x3c6   :  { %4422 = vmatprep.subr.bf16.mxu1 %v4674_v42  ;;  %v4692_v42 = vld [vmem:[%s6499_s6 + $0x90] sm:$0xff]  }
 0x3c8   :  { %4403 = vmatpush3.bf16.msra.mxu0 %v5962_v50 }
 0x3c9   :  { %4404 = vmatprep.subr.bf16.mxu0 %v6026_v2  ;;  %v4675_v2 = vld [vmem:[%s6499_s6 + $0x28] sm:$0xff]  }
 0x3ca   :  { %4423 = vmatpush3.bf16.msra.mxu1 %v4675_v2 }
 0x3cc   :  { %4405 = vmatpush3.bf16.msra.mxu0 %v6034_v22  ;;  %v4676_v22 = vld [vmem:[%s6499_s6 + $0x70] sm:$0xff]  }
 0x3cd   :  { %4424 = vmatprep.subr.bf16.mxu1 %v4676_v22  ;;  %4434 = vmatprep.subr.bf16.mxu0 %v4687_v58  ;;  %v4694_v22 = vld [vmem:[%s6499_s6 + $0x98] sm:$0xff]  }
 0x3ce   :  { %4425 = vmatpush3.bf16.msra.mxu1 %v4677_v55  ;;  %v4697_v55 = vld [vmem:[%s6499_s6 + $0xe8] sm:$0xff]  }
 0x3cf   :  { %2531 = vmatmul.mubr.bf16.vlgmr.msra.gmra.mrb[144].mxu0 %v2456_v4  ;;  %4426 = vmatprep.subr.bf16.mxu1 %v4678_v14 }
 0x3d0   :  { %4435 = vmatpush3.bf16.msra.mxu0 %v4688_v47 }
 0x3d1   :  { %4436 = vmatprep.subr.bf16.mxu0 %v4689_v49 }
 0x3d2   :  { %v1822_v50 = vpop.permute.xlu0 %1821  ;;  %4427 = vmatpush3.bf16.msra.mxu1 %v4679_v16 }
 0x3d3   :  { %1825 = vst.msk [vmem:[#allocation3] sm:$0xf] %vm1824_vm6, %v1822_v50  ;;  %4485 = vmatprep.subr.bf16.mxu1 %v4821_v37  ;;  %v4693_v50 = vld [vmem:[%s6499_s6 + $0xd8] sm:$0xff]  }
 0x3d4   :  { %4437 = vmatpush3.bf16.msra.mxu0 %v4690_v32  ;;  %v4707_v32 = vld [vmem:[%s6500_s8 + $0x4] ss:$8 sps:$4 sm:$0xff]  }
 0x3d5   :  { %4438 = vmatprep.subr.bf16.mxu0 %v4691_v40 }
 0x3d6   :  { %v4186_v6 = vpop.f32.mrb[28].mxu1 }
 0x3d7   :  { %v4187_v63 = vpop.f32.mrb[29].mxu1 }
 0x3d8   :  { %v4188_v23 = vadd.f32 %v4187_v63, %v4186_v6  ;;  %v4189_v30 = vpop.f32.mrb[30].mxu1  ;;  %4439 = vmatpush3.bf16.msra.mxu0 %v4692_v42  ;;  %v4696_v63 = vld [vmem:[%s6499_s6 + $0xa0] sm:$0xff]  }
 0x3d9   :  { %v4190_v5 = vpop.f32.mrb[31].mxu1  ;;  %4440 = vmatprep.subr.bf16.mxu0 %v4693_v50  ;;  %v4710_v50 = vld [vmem:[%s6500_s8 + $0x14] ss:$8 sps:$4 sm:$0xff]  }
 0x3da   :  { %v1992_v9 = vadd.f32 %v4188_v23, %v1952_v62 }
 0x3dc   :  { %v1997_v27 = vmax.f32 %v1992_v9, 0.0  ;;  %4441 = vmatpush3.bf16.msra.mxu0 %v4694_v22  ;;  %v4711_v22 = vld [vmem:[%s6500_s8 + $0x20] ss:$8 sps:$4 sm:$0xff]  }
 0x3de   :  { %v4013_v43 = vpack.c.bf16 %v1997_v27, %v1997_v27 }
 0x3e0   :  { %2002 = vrot.lane.b32.xlu1 %v4013_v43, %s4819_s19 }
 0x3ec   :  { %v4230_v13 = vpop.f32.mrb[128].mxu0 }
 0x3ed   :  { %v4231_v17 = vpop.f32.mrb[129].mxu0 }
 0x3ee   :  { %v4232_v34 = vadd.f32 %v4231_v17, %v4230_v13  ;;  %v4233_v61 = vpop.f32.mrb[130].mxu0  ;;  %v4682_v13 = vld [vmem:[%s6499_s6 + $0x100] sm:$0xff]   ;;  %v4683_v17 = vld [vmem:[%s6499_s6 + $0x108] sm:$0xff]  }
 0x3ef   :  { %v4234_v19 = vpop.f32.mrb[131].mxu0  ;;  %v4685_v61 = vld [vmem:[%s6499_s6 + $0x118] sm:$0xff]  }
 0x3f6   :  { %v4208_v31 = vpop.f32.mrb[32].mxu1 }
 0x3f7   :  { %v4209_v36 = vpop.f32.mrb[33].mxu1 }
 0x3f8   :  { %v4210_v35 = vadd.f32 %v4209_v36, %v4208_v31  ;;  %v4211_v56 = vpop.f32.mrb[34].mxu1 }
 0x3f9   :  { %v4212_v39 = vpop.f32.mrb[35].mxu1 }
 0x3fa   :  { %v2089_v15 = vadd.f32 %v4210_v35, %v5865_v25  ;;  %v4698_v39 = vld [vmem:[%s6499_s6 + $0xa8] sm:$0xff]  }
 0x3fc   :  { %v2129_v60 = vadd.f32 %v4232_v34, %v2089_v15  ;;  %v4684_v34 = vld [vmem:[%s6499_s6 + $0x110] sm:$0xff]  }
 0x3fd   :  { %v4699_v15 = vld [vmem:[%s6499_s6 + $0xf0] sm:$0xff]  }
 0x3fe   :  { %v2134_v12 = vmax.f32 %v2129_v60, 0.0  ;;  %v4700_v60 = vld [vmem:[%s6499_s6 + $0xb0] sm:$0xff]  }
 0x400   :  { %v2135_v24 = vpack.c.bf16 %v2134_v12, %v2134_v12  ;;  %v4701_v12 = vld [vmem:[%s6499_s6 + $0xf8] sm:$0xff]  }
 0x402   :  { %2136 = vst.msk [vmem:[#allocation3 + $0x8] sm:$0xf] %vm1685_vm5, %v2135_v24 }
 0x40c   :  { %v4274_v7 = vpop.f32.mrb[132].mxu0 }
 0x40d   :  { %v4275_v33 = vpop.f32.mrb[133].mxu0 }
 0x40e   :  { %v4276_v1 = vadd.f32 %v4275_v33, %v4274_v7  ;;  %v4277_v10 = vpop.f32.mrb[134].mxu0  ;;  %v4816_v33 = vld [vmem:[%s6498_s5] ss:$0 sm:$0xff] }
 0x40f   :  { %v4278_v48 = vpop.f32.mrb[135].mxu0 }
 0x416   :  { %v4252_v44 = vpop.f32.mrb[36].mxu1 }
 0x417   :  { %v4253_v28 = vpop.f32.mrb[37].mxu1 }
 0x418   :  { %v4254_v59 = vadd.f32 %v4253_v28, %v4252_v44  ;;  %v4255_v8 = vpop.f32.mrb[38].mxu1  ;;  %v4702_v44 = vld [vmem:[%s6499_s6 + $0xb8] sm:$0xff]  }
 0x419   :  { %v4256_v57 = vpop.f32.mrb[39].mxu1 }
 0x41a   :  { %v2176_v18 = vadd.f32 %v4254_v59, %v5865_v25 }
 0x41c   :  { %v2216_v26 = vadd.f32 %v4276_v1, %v2176_v18 }
 0x41e   :  { %v2221_v52 = vmax.f32 %v2216_v26, 0.0 }
 0x420   :  { %v4014_v38 = vpack.c.bf16 %v2221_v52, %v2221_v52 }
 0x422   :  { %2226 = vrot.lane.b32.xlu0 %v4014_v38, %s4819_s19 }
 0x42c   :  { %v4318_v20 = vpop.f32.mrb[136].mxu0 }
 0x42d   :  { %v4319_v3 = vpop.f32.mrb[137].mxu0 }
 0x42e   :  { %v4320_v46 = vadd.f32 %v4319_v3, %v4318_v20  ;;  %v4321_v41 = vpop.f32.mrb[138].mxu0 }
 0x42f   :  { %v4322_v11 = vpop.f32.mrb[139].mxu0 }
 0x436   :  { %v4296_v54 = vpop.f32.mrb[40].mxu1 }
 0x437   :  { %v4297_v29 = vpop.f32.mrb[41].mxu1 }
 0x438   :  { %v4298_v53 = vadd.f32 %v4297_v29, %v4296_v54  ;;  %v4299_v51 = vpop.f32.mrb[42].mxu1 }
 0x439   :  { %v4300_v45 = vpop.f32.mrb[43].mxu1  ;;  %v4705_v51 = vld [vmem:[%s6500_s8] ss:$8 sps:$4 sm:$0xff]  }
 0x43a   :  { %v2269_v21 = vadd.f32 %v4298_v53, %v5865_v25  ;;  %v4695_v25 = vld [vmem:[%s6499_s6 + $0xe0] sm:$0xff]  }
 0x43b   :  { %4442 = vmatprep.subr.bf16.mxu0 %v4695_v25  ;;  %v4716_v25 = vld [vmem:[%s6500_s8 + $0x34] ss:$8 sps:$4 sm:$0xff]  }
 0x43c   :  { %v2309_v4 = vadd.f32 %v4320_v46, %v2269_v21  ;;  %4443 = vmatpush3.bf16.msra.mxu0 %v4696_v63  ;;  %v4714_v63 = vld [vmem:[%s6500_s8 + $0x30] ss:$8 sps:$4 sm:$0xff]  }
 0x43d   :  { %4444 = vmatprep.subr.bf16.mxu0 %v4697_v55  ;;  %v4717_v55 = vld [vmem:[%s6501_s10] ss:$8 sps:$4 sm:$0xff]  }
 0x43e   :  { %v2314_v2 = vmax.f32 %v2309_v4, 0.0 }
 0x440   :  { %v2315_v6 = vpack.c.bf16 %v2314_v2, %v2314_v2  ;;  %4445 = vmatpush3.bf16.msra.mxu0 %v4698_v39  ;;  %v4708_v2 = vld [vmem:[%s6500_s8 + $0x10] ss:$8 sps:$4 sm:$0xff]  }
 0x441   :  { %4446 = vmatprep.subr.bf16.mxu0 %v4699_v15  ;;  %v4741_v15 = vld [vmem:[%s6501_s10 + $0x80] ss:$8 sps:$4 sm:$0xff]  }
 0x442   :  { %2316 = vst.msk [vmem:[#allocation3 + $0xc] sm:$0xf] %vm1685_vm5, %v2315_v6  ;;  %v4713_v6 = vld [vmem:[%s6500_s8 + $0x24] ss:$8 sps:$4 sm:$0xff]  }
 0x444   :  { %4447 = vmatpush3.bf16.msra.mxu0 %v4700_v60 }
 0x445   :  { %4448 = vmatprep.subr.bf16.mxu0 %v4701_v12  ;;  %v4746_v12 = vld [vmem:[%s6501_s10 + $0x94] ss:$8 sps:$4 sm:$0xff]  }
 0x448   :  { %4449 = vmatpush3.bf16.msra.mxu0 %v4702_v44  ;;  %v4753_v44 = vld [vmem:[%s6501_s10 + $0xc0] ss:$8 sps:$4 sm:$0xff]  }
 0x449   :  { %3044 = vmatprep.subr.bf16.mxu0 %v4707_v32  ;;  %v4764_v32 = vld [vmem:[%s6501_s10 + $0xf0] ss:$8 sps:$4 sm:$0xff]  }
 0x452   :  { %v2003_v62 = vpop.permute.xlu1 %2002 }
 0x453   :  { %2005 = vst.msk [vmem:[#allocation3 + $0x4] sm:$0xf] %vm1824_vm6, %v2003_v62  ;;  %v4719_v62 = vld [vmem:[%s6501_s10 + $0x4] ss:$8 sps:$4 sm:$0xff]  }
 0x456   :  { %v4340_v23 = vpop.f32.mrb[44].mxu1 }
 0x457   :  { %v4341_v30 = vpop.f32.mrb[45].mxu1 }
 0x458   :  { %v4342_v5 = vadd.f32 %v4341_v30, %v4340_v23  ;;  %v4343_v9 = vpop.f32.mrb[46].mxu1  ;;  %v4722_v23 = vld [vmem:[%s6501_s10 + $0x14] ss:$8 sps:$4 sm:$0xff]   ;;  %v4720_v30 = vld [vmem:[%s6501_s10 + $0x10] ss:$8 sps:$4 sm:$0xff]  }
 0x459   :  { %v4344_v14 = vpop.f32.mrb[47].mxu1  ;;  %v4723_v9 = vld [vmem:[%s6501_s10 + $0x20] ss:$8 sps:$4 sm:$0xff]  }
 0x45a   :  { %v2541_v16 = vld [vmem:[#allocation3] sm:$0xff]  ;;  %v2400_v1 = vadd.f32 %v4816_v33, %v4342_v5  ;;  %v4728_v14 = vld [vmem:[%s6501_s10 + $0x34] ss:$8 sps:$4 sm:$0xff]  }
 0x45b   :  { %v3859_v27 = vcombine.low %v2541_v16, %v2541_v16  ;;  %v3860_v43 = vcombine.high %v2541_v16, %v2541_v16  ;;  %v4725_v5 = vld [vmem:[%s6501_s10 + $0x24] ss:$8 sps:$4 sm:$0xff]   ;;  %v4726_v16 = vld [vmem:[%s6501_s10 + $0x30] ss:$8 sps:$4 sm:$0xff]  }
 0x45d   :  { %2891 = vmatprep.mubr.bf16.mxu1 %v3860_v43  ;;  %v4729_v43 = vld [vmem:[%s6501_s10 + $0x40] ss:$8 sps:$4 sm:$0xff]  }
 0x45e   :  { %2892 = vmatmul.mubr.bf16.vlgmr.msra.gmra.mrb[52].mxu1 %v3859_v27  ;;  %v4731_v27 = vld [vmem:[%s6501_s10 + $0x44] ss:$8 sps:$4 sm:$0xff]  }
 0x45f   :  { %4486 = vmatpush3.bf16.msra.mxu1 %v4682_v13  ;;  %4493 = vmatprep.mubr.msk.bf16.mxu1 %vm4822_vm7, %v4821_v37  ;;  %v4734_v13 = vld [vmem:[%s6501_s10 + $0x54] ss:$8 sps:$4 sm:$0xff]  }
 0x460   :  { %4487 = vmatprep.subr.bf16.mxu1 %v4821_v37 }
 0x463   :  { %4488 = vmatpush3.bf16.msra.mxu1 %v4683_v17  ;;  %v4732_v17 = vld [vmem:[%s6501_s10 + $0x50] ss:$8 sps:$4 sm:$0xff]  }
 0x464   :  { %4489 = vmatprep.subr.bf16.mxu1 %v4821_v37 }
 0x467   :  { %4490 = vmatpush3.bf16.msra.mxu1 %v4684_v34  ;;  %v4737_v34 = vld [vmem:[%s6501_s10 + $0x64] ss:$8 sps:$4 sm:$0xff]  }
 0x468   :  { %4491 = vmatprep.subr.bf16.mxu1 %v4821_v37 }
 0x46b   :  { %4492 = vmatpush3.bf16.msra.mxu1 %v4685_v61  ;;  %v4735_v61 = vld [vmem:[%s6501_s10 + $0x60] ss:$8 sps:$4 sm:$0xff]  }
 0x46c   :  { %3341 = vmatprep.subr.bf16.mxu1 %v4719_v62  ;;  %v2991_v62 = vlaneseq }
 0x476   :  { %v4384_v19 = vpop.f32.mrb[48].mxu1 }
 0x477   :  { %v4385_v31 = vpop.f32.mrb[49].mxu1 }
 0x478   :  { %v4386_v36 = vadd.f32 %v4385_v31, %v4384_v19  ;;  %v4387_v35 = vpop.f32.mrb[50].mxu1  ;;  %v4740_v19 = vld [vmem:[%s6501_s10 + $0x74] ss:$8 sps:$4 sm:$0xff]   ;;  %v4738_v31 = vld [vmem:[%s6501_s10 + $0x70] ss:$8 sps:$4 sm:$0xff]  }
 0x479   :  { %v4388_v56 = vpop.f32.mrb[51].mxu1 }
 0x47a   :  { %v2493_v38 = vadd.f32 %v4816_v33, %v4386_v36  ;;  %v4743_v36 = vld [vmem:[%s6501_s10 + $0x84] ss:$8 sps:$4 sm:$0xff]   ;;  %v4747_v33 = vld [vmem:[%s6501_s10 + $0xa0] ss:$8 sps:$4 sm:$0xff]  }
 0x482   :  { %v4362_v24 = vpop.f32.mrb[140].mxu0 }
 0x483   :  { %v4363_v7 = vpop.f32.mrb[141].mxu0 }
 0x484   :  { %v4364_v10 = vadd.f32 %v4363_v7, %v4362_v24  ;;  %v4365_v48 = vpop.f32.mrb[142].mxu0  ;;  %v4744_v24 = vld [vmem:[%s6501_s10 + $0x90] ss:$8 sps:$4 sm:$0xff]   ;;  %v4749_v7 = vld [vmem:[%s6501_s10 + $0xa4] ss:$8 sps:$4 sm:$0xff]  }
 0x485   :  { %v4366_v28 = vpop.f32.mrb[143].mxu0  ;;  %v4755_v48 = vld [vmem:[%s6501_s10 + $0xc4] ss:$8 sps:$4 sm:$0xff]  }
 0x486   :  { %v2440_v59 = vadd.f32 %v4364_v10, %v2400_v1  ;;  %v4752_v1 = vld [vmem:[%s6501_s10 + $0xb4] ss:$8 sps:$4 sm:$0xff]   ;;  %v4750_v10 = vld [vmem:[%s6501_s10 + $0xb0] ss:$8 sps:$4 sm:$0xff]  }
 0x487   :  { %v4758_v28 = vld [vmem:[%s6501_s10 + $0xd4] ss:$8 sps:$4 sm:$0xff]  }
 0x488   :  { %v2445_v8 = vmax.f32 %v2440_v59, 0.0  ;;  %v4756_v59 = vld [vmem:[%s6501_s10 + $0xd0] ss:$8 sps:$4 sm:$0xff]  }
 0x48a   :  { %v4015_v57 = vpack.c.bf16 %v2445_v8, %v2445_v8  ;;  %v3858_v8 = vld [vmem:[%s6502_s7] ss:$0 sm:$0xff] }
 0x48c   :  { %2450 = vrot.lane.b32.xlu1 %v4015_v57, %s4819_s19 }
 0x494   :  { %v2227_v18 = vpop.permute.xlu0 %2226 }
 0x495   :  { %2229 = vst.msk [vmem:[#allocation3 + $0x8] sm:$0xf] %vm1824_vm6, %v2227_v18 }
 0x4a2   :  { %v4406_v26 = vpop.f32.mrb[144].mxu0 }
 0x4a3   :  { %v4407_v52 = vpop.f32.mrb[145].mxu0 }
 0x4a4   :  { %v4408_v20 = vadd.f32 %v4407_v52, %v4406_v26  ;;  %v4409_v3 = vpop.f32.mrb[146].mxu0 }
 0x4a5   :  { %v4410_v46 = vpop.f32.mrb[147].mxu0 }
 0x4a6   :  { %v2533_v41 = vadd.f32 %v4408_v20, %v2493_v38 }
 0x4a8   :  { %v2538_v11 = vmax.f32 %v2533_v41, 0.0 }
 0x4aa   :  { %v2539_v58 = vpack.c.bf16 %v2538_v11, %v2538_v11 }
 0x4ac   :  { %2540 = vst.msk [vmem:[#allocation3 + $0x10] sm:$0xf] %vm1685_vm5, %v2539_v58  ;;  %v3123_v58 = vld [vmem:[%s6503_s11] sm:$0xff] }
 0x4b3   :  { %v4686_v47 = vld [vmem:[#allocation3 + $0x10] ss:$0 sps:$4 sm:$0xff]  }
 0x4b4   :  { %4494 = vmatmul.mubr.msk.bf16.vlgmr.msra.gmra.mrb[56].mxu1 %vm514_vm0, %v4686_v47  ;;  %v4762_v47 = vld [vmem:[%s6501_s10 + $0xe4] ss:$8 sps:$4 sm:$0xff]  }
 0x4b5   :  { %3342 = vmatpush1.bf16.msra.mxu1 %v4717_v55  ;;  %v4777_v55 = vld [vmem:[%s6505_s13 + $0x68] sm:$0xff]  }
 0x4b6   :  { %3343 = vmatprep.subr.bf16.mxu1 %v4722_v23  ;;  %v2992_v23 = vshrl.u32 %v2991_v62, 7 }
 0x4b9   :  { %3344 = vmatpush1.bf16.msra.mxu1 %v4720_v30  ;;  %v6451_v30 = vsub.s32 0, %v2992_v23 }
 0x4ba   :  { %3345 = vmatprep.subr.bf16.mxu1 %v4725_v5  ;;  %v2989_v5 = vld [vmem:[%s6506_s9] sm:$0x3] }
 0x4bd   :  { %3346 = vmatpush1.bf16.msra.mxu1 %v4723_v9  ;;  %v2997_v9 = vsub.s32 1, %v2992_v23 }
 0x4be   :  { %3347 = vmatprep.subr.bf16.mxu1 %v4728_v14  ;;  %v2994_v14 = vrot.slane %v2989_v5, %v6451_v30 }
 0x4c1   :  { %3348 = vmatpush1.bf16.msra.mxu1 %v4726_v16  ;;  %v2998_v16 = vrot.slane %v2989_v5, %v2997_v9 }
 0x4c2   :  { %3349 = vmatprep.subr.bf16.mxu1 %v4731_v27 }
 0x4c5   :  { %3350 = vmatpush1.bf16.msra.mxu1 %v4729_v43 }
 0x4c6   :  { %3351 = vmatprep.subr.bf16.mxu1 %v4734_v13 }
 0x4c9   :  { %3352 = vmatpush1.bf16.msra.mxu1 %v4732_v17 }
 0x4ca   :  { %3353 = vmatprep.subr.bf16.mxu1 %v4737_v34 }
 0x4cd   :  { %3354 = vmatpush1.bf16.msra.mxu1 %v4735_v61 }
 0x4ce   :  { %3355 = vmatprep.subr.bf16.mxu1 %v4740_v19 }
 0x4d1   :  { %3356 = vmatpush1.bf16.msra.mxu1 %v4738_v31 }
 0x4d2   :  { %3357 = vmatprep.subr.bf16.mxu1 %v4743_v36 }
 0x4d5   :  { %3358 = vmatpush1.bf16.msra.mxu1 %v4741_v15  ;;  %v4778_v15 = vld [vmem:[%s6505_s13 + $0x28] sm:$0xff]  }
 0x4d6   :  { %3359 = vmatprep.subr.bf16.mxu1 %v4746_v12 }
 0x4d9   :  { %3360 = vmatpush1.bf16.msra.mxu1 %v4744_v24  ;;  %v4779_v24 = vld [vmem:[%s6505_s13 + $0x70] sm:$0xff]  }
 0x4da   :  { %3361 = vmatprep.subr.bf16.mxu1 %v4749_v7  ;;  %v4780_v7 = vld [vmem:[%s6505_s13 + $0x30] sm:$0xff]  }
 0x4dd   :  { %3362 = vmatpush1.bf16.msra.mxu1 %v4747_v33  ;;  %v4781_v33 = vld [vmem:[%s6505_s13 + $0x78] sm:$0xff]  }
 0x4de   :  { %3363 = vmatprep.subr.bf16.mxu1 %v4752_v1  ;;  %v4782_v1 = vld [vmem:[%s6505_s13 + $0x38] sm:$0xff]  }
 0x4e1   :  { %3364 = vmatpush1.bf16.msra.mxu1 %v4750_v10  ;;  %v3382_v10 = vld [vmem:[%s6507_s12] sm:$0x3] }
 0x4e2   :  { %3365 = vmatprep.subr.bf16.mxu1 %v4755_v48  ;;  %v3387_v48 = vrot.slane %v3382_v10, %v6451_v30 }
 0x4e5   :  { %3366 = vmatpush1.bf16.msra.mxu1 %v4753_v44 }
 0x4e6   :  { %3367 = vmatprep.subr.bf16.mxu1 %v4758_v28  ;;  %v3391_v28 = vrot.slane %v3382_v10, %v2997_v9 }
 0x4e9   :  { %3368 = vmatpush1.bf16.msra.mxu1 %v4756_v59 }
 0x4ea   :  { %3369 = vmatprep.subr.bf16.mxu1 %v4762_v47 }
 0x4fe   :  { %v2451_v49 = vpop.permute.xlu1 %2450 }
 0x4ff   :  { %2453 = vst.msk [vmem:[#allocation3 + $0xc] sm:$0xf] %vm1824_vm6, %v2451_v49  ;;  %v3911_v49 = vcombine.high %v3123_v58, %v3123_v58 }
 0x506   :  { %v2542_v54 = vld [vmem:[#allocation3 + $0x8] sm:$0xff] }
 0x507   :  { %v3861_v29 = vcombine.low %v2542_v54, %v2542_v54  ;;  %v3862_v53 = vcombine.high %v2542_v54, %v2542_v54  ;;  %v4760_v54 = vld [vmem:[%s6501_s10 + $0xe0] ss:$8 sps:$4 sm:$0xff]  }
 0x508   :  { %3370 = vmatpush1.bf16.msra.mxu1 %v4760_v54 }
 0x509   :  { %2931 = vmatprep.mubr.bf16.mxu0 %v3862_v53 }
 0x50a   :  { %2932 = vmatmul.mubr.bf16.vlgmr.msra.gmra.mrb[148].mxu0 %v3861_v29  ;;  %v3910_v29 = vcombine.low %v3123_v58, %v3123_v58 }
 0x50b   :  { %3076 = vmatprep.mubr.bf16.mxu0 %v4817_v0  ;;  %3045 = vmatpush1.bf16.msra.mxu0 %v4705_v51  ;;  %v3121_v51 = vld [vmem:[%s6504_s1] sm:$0xff] }
 0x50c   :  { %3046 = vmatprep.subr.bf16.mxu0 %v4710_v50  ;;  %v3135_v53 = vsel %vm3133_vm8, %v3910_v29, 0  ;;  %v4771_v50 = vld [vmem:[%s6505_s13 + $0x50] sm:$0xff]  }
 0x50f   :  { %3047 = vmatpush1.bf16.msra.mxu0 %v4708_v2  ;;  %v4772_v2 = vld [vmem:[%s6505_s13 + $0x10] sm:$0xff]  }
 0x510   :  { %3048 = vmatprep.subr.bf16.mxu0 %v4713_v6  ;;  %v4773_v6 = vld [vmem:[%s6505_s13 + $0x58] sm:$0xff]  }
 0x513   :  { %3049 = vmatpush1.bf16.msra.mxu0 %v4711_v22  ;;  %v4774_v22 = vld [vmem:[%s6505_s13 + $0x18] sm:$0xff]  }
 0x514   :  { %3050 = vmatprep.subr.bf16.mxu0 %v4716_v25  ;;  %v4775_v25 = vld [vmem:[%s6505_s13 + $0x60] sm:$0xff]  }
 0x517   :  { %3051 = vmatpush1.bf16.msra.mxu0 %v4714_v63  ;;  %v4776_v63 = vld [vmem:[%s6505_s13 + $0x20] sm:$0xff]  }
 0x518   :  { %3912 = vmatprep.subr.msk.bf16.mxu0 %vm3133_vm8, %v3911_v49  ;;  %v3946_v49 = vld [vmem:[%s6509_s14] ss:$0 sm:$0xff] }
 0x531   :  { %v4428_v45 = vpop.f32.mrb[52].mxu1 }
 0x532   :  { %v4429_v40 = vpop.f32.mrb[53].mxu1 }
 0x533   :  { %v6290_v21 = vadd.f32 %v4429_v40, %v4428_v45  ;;  %v4431_v4 = vpop.f32.mrb[54].mxu1  ;;  %v3122_v45 = vpack.c.bf16 %v3121_v51, %v3121_v51  ;;  %v4767_v40 = vld [vmem:[%s6505_s13 + $0x40] sm:$0xff]  }
 0x534   :  { %v4432_v42 = vpop.f32.mrb[55].mxu1  ;;  %v4769_v4 = vld [vmem:[%s6505_s13 + $0x48] sm:$0xff]  }
 0x535   :  { %v2894_v26 = vadd.f32 %v6290_v21, %v3858_v8  ;;  %v4768_v21 = vld [vmem:[%s6505_s13] sm:$0xff]   ;;  %v4770_v42 = vld [vmem:[%s6505_s13 + $0x8] sm:$0xff]  }
 0x587   :  { %v2973_v35 = vpop.f32.mrb[56].mxu1 }
 0x588   :  { %v4495_v56 = vpop.f32.mrb[57].mxu1 }
 0x589   :  { %v2976_v39 = vpop.f32.mrb[58].mxu1 }
 0x58a   :  { %v4496_v60 = vpop.f32.mrb[59].mxu1 }
 0x5dd   :  { %v4450_v57 = vpop.f32.mrb[148].mxu0 }
 0x5de   :  { %v4451_v18 = vpop.f32.mrb[149].mxu0 }
 0x5df   :  { %v4452_v52 = vadd.f32 %v4451_v18, %v4450_v57  ;;  %v4453_v38 = vpop.f32.mrb[150].mxu0 }
 0x5e0   :  { %v4454_v20 = vpop.f32.mrb[151].mxu0 }
 0x5e1   :  { %v2934_v3 = vadd.f32 %v4452_v52, %v2894_v26 }
 0x5e3   :  { %v2974_v46 = vadd.f32 %v2973_v35, %v2934_v3 }
 0x5e5   :  { %v2979_v41 = vmax.f32 %v2974_v46, 0.0 }
 0x5e7   :  { %v2980_v11 = vpack.c.bf16 %v2979_v41, %v2979_v41 }
 0x5e9   :  { %3909 = vmatmul.mubr.msk.bf16.vlgmr.msra.gmra.mrb[152].mxu0 %vm514_vm0, %v2980_v11  ;;  %v22_v11 = vstv %s6508_s16 }
 0x5ea   :  { %3172 = vmatprep.mubr.bf16.mxu0 %v4817_v0  ;;  %3141 = vmatpush1.bf16.msra.mxu0 %v3135_v53  ;;  %v4766_v0 = vld [vmem:[%s6501_s10 + $0xf4] ss:$8 sps:$4 sm:$0xff]   ;;  %23 = vst [vmem:[#allocation4] sm:$0x1] %v22_v11 }
 0x5eb   :  { %3371 = vmatprep.subr.bf16.mxu1 %v4766_v0  ;;  %4461 = vmatprep.subr.bf16.mxu0 %v4767_v40  ;;  %v3577_v40 = vld [vmem:[%s6510_s15] sm:$0x1] }
 0x5ec   :  { %3372 = vmatpush1.bf16.msra.mxu1 %v4764_v32 }
 0x5f1   :  { %3913 = vmatmul.mubr.msk.bf16.vlgmr.msra.gmra.mrb[156].mxu0 %vm3129_vm9, %v3122_v45  ;;  %v3578_v58 = vld [vmem:[#allocation4] sm:$0x1] }
 0x5f2   :  { %4462 = vmatpush3.bf16.msra.mxu0 %v4768_v21  ;;  %3581 = vperm.xlu0 %4509, %v3578_v58  }
 0x5f3   :  { %4463 = vmatprep.subr.bf16.mxu0 %v4769_v4 }
 0x5f6   :  { %4464 = vmatpush3.bf16.msra.mxu0 %v4770_v42 }
 0x5f7   :  { %4465 = vmatprep.subr.bf16.mxu0 %v4771_v50 }
 0x5fa   :  { %4466 = vmatpush3.bf16.msra.mxu0 %v4772_v2 }
 0x5fb   :  { %4467 = vmatprep.subr.bf16.mxu0 %v4773_v6 }
 0x5fe   :  { %4468 = vmatpush3.bf16.msra.mxu0 %v4774_v22 }
 0x5ff   :  { %4469 = vmatprep.subr.bf16.mxu0 %v4775_v25 }
 0x602   :  { %4470 = vmatpush3.bf16.msra.mxu0 %v4776_v63 }
 0x603   :  { %4471 = vmatprep.subr.bf16.mxu0 %v4777_v55 }
 0x606   :  { %4472 = vmatpush3.bf16.msra.mxu0 %v4778_v15 }
 0x607   :  { %4473 = vmatprep.subr.bf16.mxu0 %v4779_v24 }
 0x60a   :  { %4474 = vmatpush3.bf16.msra.mxu0 %v4780_v7 }
 0x60b   :  { %4475 = vmatprep.subr.bf16.mxu0 %v4781_v33 }
 0x60e   :  { %4476 = vmatpush3.bf16.msra.mxu0 %v4782_v1 }
 0x60f   :  { %4497 = vmatprep.subr.bf16.mxu0 %v4821_v37 }
 0x671   :  { %v3582_v21 = vpop.permute.xlu0 %3581 }
 0x672   :  { %v3587_v4 = vrot.slane %v3582_v21, %v6451_v30 }
 0x6bc   :  { %v3078_v27 = vpop.f32.mrb[152].mxu0 }
 0x6bd   :  { %v3079_v43 = vadd.f32 %v3078_v27, %v2994_v14  ;;  %v3080_v13 = vpop.f32.mrb[153].mxu0 }
 0x6be   :  { %v3081_v17 = vadd.f32 %v3080_v13, %v2998_v16  ;;  %v3082_v34 = vpop.f32.mrb[154].mxu0 }
 0x6bf   :  { %v3085_v61 = vmax.f32 %v3079_v43, 0.0  ;;  %v3083_v19 = vpop.f32.mrb[155].mxu0 }
 0x6c0   :  { %v3086_v31 = vmax.f32 %v3081_v17, 0.0 }
 0x6c1   :  { %v3087_v35 = vpack.c.bf16 %v3085_v61, %v3085_v61 }
 0x6c2   :  { %v3088_v36 = vpack.c.bf16 %v3086_v31, %v3086_v31 }
 0x6c4   :  { %3373 = vmatprep.mubr.bf16.mxu1 %v3088_v36  ;;  %v3174_v56 = vpop.f32.mrb[156].mxu0 }
 0x6c5   :  { %3374 = vmatmul.mubr.bf16.vlgmr.msra.gmra.mrb[60].mxu1 %v3087_v35  ;;  %v3176_v39 = vpop.f32.mrb[157].mxu0 }
 0x6c6   :  { %v3178_v60 = vpop.f32.mrb[158].mxu0 }
 0x6c7   :  { %v3179_v12 = vpop.f32.mrb[159].mxu0 }
 0x798   :  { %v3375_v44 = vpop.f32.mrb[60].mxu1 }
 0x799   :  { %v3376_v59 = vadd.f32 %v3375_v44, %v3174_v56  ;;  %v3377_v8 = vpop.f32.mrb[61].mxu1 }
 0x79a   :  { %v3378_v57 = vadd.f32 %v3377_v8, %v3176_v39  ;;  %v3379_v18 = vpop.f32.mrb[62].mxu1 }
 0x79b   :  { %v3394_v26 = vadd.f32 %v3387_v48, %v3376_v59  ;;  %v3380_v52 = vpop.f32.mrb[63].mxu1 }
 0x79c   :  { %v3395_v38 = vadd.f32 %v3391_v28, %v3378_v57 }
 0x79d   :  { %v3396_v20 = vmax.f32 %v3394_v26, 0.0 }
 0x79e   :  { %v3397_v3 = vmax.f32 %v3395_v38, 0.0 }
 0x79f   :  { %v3398_v41 = vpack.c.bf16 %v3396_v20, %v3396_v20 }
 0x7a0   :  { %v3399_v46 = vpack.c.bf16 %v3397_v3, %v3397_v3 }
 0x7a2   :  { %3567 = vmatprep.mubr.bf16.mxu0 %v3399_v46 }
 0x7a3   :  { %3568 = vmatmul.mubr.bf16.vlgmr.msra.gmra.mrb[160].mxu0 %v3398_v41 }
 0x7a4   :  { %4499 = vmatprep.mubr.msk.bf16.mxu0 %vm4822_vm7, %v4821_v37 }
 0x876   :  { %v4477_v47 = vpop.f32.mrb[160].mxu0 }
 0x877   :  { %v4478_v54 = vpop.f32.mrb[161].mxu0 }
 0x878   :  { %v4479_v29 = vadd.f32 %v4478_v54, %v4477_v47  ;;  %v4480_v53 = vpop.f32.mrb[162].mxu0 }
 0x879   :  { %v4481_v0 = vpop.f32.mrb[163].mxu0 }
 0x87a   :  { %v3570_v51 = vadd.f32 %v4479_v29, %v3946_v49 }
 0x87c   :  { %v3575_v32 = vmax.f32 %v3570_v51, 0.0 }
 0x87e   :  { %v3576_v45 = vpack.c.bf16 %v3575_v32, %v3575_v32 }
 0x880   :  { %v3592_v37 = vsel %vm514_vm0, %v3576_v45, 0 }
 0x881   :  { %4498 = vmatpush3.bf16.xpose.msra.mxu0 %v3592_v37 }
 0x888   :  { %4500 = vmatmul.mubr.msk.bf16.vlgmr.msra.gmra.mrb[164].mxu0 %vm514_vm0, %v3577_v40 }
 0x95b   :  { %v3628_v42 = vpop.f32.mrb[164].mxu0 }
 0x95c   :  { %v3629_v50 = vadd.f32 %v3628_v42, %v3587_v4  ;;  %v4501_v2 = vpop.f32.mrb[165].mxu0 }
 0x95d   :  { %v3631_v6 = vpop.f32.mrb[166].mxu0 }
 0x95e   :  { %3635 = vst.msk [vmem:[%s6511_s17] sm:$0x1] %vm3634_vm10, %v3629_v50  ;;  %v4502_v22 = vpop.f32.mrb[167].mxu0 }

</bundles_post_ra>
